<compile_context>
chip_gen: v7x
topology: tpu7x:2x2x1
jax: 0.10.0
libtpu: 0.0.40
codegen_flags: <defaults>
</compile_context>

<pallas_src>
import math
import functools

import jax
import jax.numpy as jnp
from jax.experimental import pallas as pl
from jax.experimental.pallas import tpu as pltpu

MIN_NORM = 1e-15
BALL_EPS = 4e-3          # geoopt float32 projection epsilon for the Poincare ball (c=1)


# ---------------- hyperbolic math helpers (traced inside kernels) ----------------
def _artanh(x):
    x = jnp.clip(x, -1.0 + 1e-7, 1.0 - 1e-7)
    return 0.5 * (jnp.log1p(x) - jnp.log1p(-x))


def _tanh(x):
    return jnp.tanh(jnp.clip(x, -15.0, 15.0))


def _norm_last(x):
    return jnp.sqrt(jnp.sum(x * x, axis=-1, keepdims=True))


def _project(x):
    norm = jnp.maximum(_norm_last(x), MIN_NORM)
    maxnorm = 1.0 - BALL_EPS
    return jnp.where(norm > maxnorm, x / norm * maxnorm, x)


def _logmap0(x):
    n = jnp.maximum(_norm_last(x), MIN_NORM)
    return x / n * _artanh(n)


def _expmap0(u):
    n = jnp.maximum(_norm_last(u), MIN_NORM)
    return _project(_tanh(n) * u / n)


def _mobius_add(x, y):
    x2 = jnp.sum(x * x, axis=-1, keepdims=True)
    y2 = jnp.sum(y * y, axis=-1, keepdims=True)
    xy = jnp.sum(x * y, axis=-1, keepdims=True)
    num = (1.0 + 2.0 * xy + y2) * x + (1.0 - x2) * y
    den = 1.0 + 2.0 * xy + x2 * y2
    return num / jnp.maximum(den, MIN_NORM)


def _mobius_matvec_post(mx, x_n, art_xn):
    """Hyperbolic renormalization after mx = x @ W^T (per-projection norm over mx)."""
    mx_n = jnp.maximum(_norm_last(mx), MIN_NORM)
    res = _tanh(mx_n / x_n * art_xn) * (mx / mx_n)
    zero_row = jnp.sum(jnp.abs(mx), axis=-1, keepdims=True) == 0.0
    res = jnp.where(zero_row, jnp.zeros_like(res), res)
    return _project(res)                          # geoopt mobius_matvec projects


def _hyp_bias_add(res, b):
    out = _mobius_add(res, jnp.broadcast_to(b, res.shape))
    return _project(out)                          # geoopt mobius_add projects


def _hyp_linear(x, wt, b):
    """mobius_matvec(W, x) + mobius_add(., bias), wt is (in, out) pre-transposed."""
    mx = jnp.dot(x, wt, preferred_element_type=jnp.float32)
    x_n = jnp.maximum(_norm_last(x), MIN_NORM)
    return _hyp_bias_add(_mobius_matvec_post(mx, x_n, _artanh(x_n)), b)


# --------------------------------- Pallas kernels ---------------------------------
def _logmap0_kernel(x_ref, o_ref):
    o_ref[...] = _logmap0(x_ref[...])


def _fused_forward_kernel(patches_ref, conv_wmat_ref, conv_b_ref, pos_ref,
                          wqkv_ref, bqkv_ref, wo_ref, bo_ref,
                          w1_ref, b1_ref, w2_ref, b2_ref,
                          fc_wt_ref, fc_b_ref, out_ref,
                          *, num_layers, num_heads, hp, wp, embed_dim):
    S = hp * wp
    E = embed_dim
    Dh = E // num_heads
    eps = 1e-5
    inv_sqrt_dh = 1.0 / math.sqrt(Dh)
    maxnorm = 1.0 - BALL_EPS

    # ---- FastHyperbolicConv2d: euclidean per-patch matmul + bias ----
    patches = patches_ref[0]                                            # (S, C*P*P)
    conv = jnp.dot(patches, conv_wmat_ref[...],
                   preferred_element_type=jnp.float32) + conv_b_ref[...]  # (S, E)

    # expmap0 over the Wp axis (dim=-1 of the NCHW conv output), faithful to reference:
    # rows s = hp*Wp + wp, so the norm runs over groups of Wp consecutive rows per column.
    rows = []
    for h_i in range(hp):
        blk = conv[h_i * wp:(h_i + 1) * wp, :]                          # (Wp, E)
        n = jnp.maximum(jnp.sqrt(jnp.sum(blk * blk, axis=0, keepdims=True)), MIN_NORM)
        sc = _tanh(n) * blk / n
        n2 = jnp.maximum(jnp.sqrt(jnp.sum(sc * sc, axis=0, keepdims=True)), MIN_NORM)
        rows.append(jnp.where(n2 > maxnorm, sc / n2 * maxnorm, sc))
    x = jnp.concatenate(rows, axis=0)                                   # (S, E) hyperbolic

    # ---- learned position encoding (mobius add) ----
    x = _project(_mobius_add(x, pos_ref[...]))

    # head-membership selector matrices, built once from iota (hoisted out of the layer
    # loop): sel_eh[e,h] = 1 iff column e belongs to head h; sel_he is its (H,E) twin.
    sel_eh = (jax.lax.broadcasted_iota(jnp.int32, (E, num_heads), 0) // Dh
              == jax.lax.broadcasted_iota(jnp.int32, (E, num_heads), 1)).astype(jnp.float32)
    sel_he = (jax.lax.broadcasted_iota(jnp.int32, (num_heads, E), 1) // Dh
              == jax.lax.broadcasted_iota(jnp.int32, (num_heads, E), 0)).astype(jnp.float32)

    # ---- transformer stack (fully unrolled; weights already resident in VMEM) ----
    for l in range(num_layers):
        wqkv = wqkv_ref[l]
        bqkv = bqkv_ref[l]

        # fused QKV mobius_matvec: one matmul, per-projection hyperbolic renorm + bias
        x_n = jnp.maximum(_norm_last(x), MIN_NORM)
        art = _artanh(x_n)
        mx = jnp.dot(x, wqkv, preferred_element_type=jnp.float32)       # (S, 3E)
        q = _hyp_bias_add(_mobius_matvec_post(mx[:, 0:E], x_n, art), bqkv[:, 0:E])
        k = _hyp_bias_add(_mobius_matvec_post(mx[:, E:2 * E], x_n, art), bqkv[:, E:2 * E])
        v = _hyp_bias_add(_mobius_matvec_post(mx[:, 2 * E:3 * E], x_n, art), bqkv[:, 2 * E:3 * E])

        # per-head squared norms for ALL heads via two MXU matmuls (no per-head XLU
        # reductions, no transposes): q2 is (S,H) columns, k2t is (H,S) row vectors.
        q2 = jnp.minimum(jnp.dot(q * q, sel_eh,
                                 preferred_element_type=jnp.float32), 1.0 - eps)      # (S,H)
        k2t = jnp.minimum(
            jax.lax.dot_general(sel_he, k * k, (((1,), (1,)), ((), ())),
                                preferred_element_type=jnp.float32), 1.0 - eps)       # (H,S)

        # approximate hyperbolic attention, all heads in-kernel (contiguous column slices)
        heads = []
        for h in range(num_heads):
            sl = slice(h * Dh, (h + 1) * Dh)
            qh, kh, vh = q[:, sl], k[:, sl], v[:, sl]
            q2h = q2[:, h:h + 1]                                         # (S,1)
            k2h = k2t[h:h + 1, :]                                        # (1,S)
            qk = jax.lax.dot_general(qh, kh, (((1,), (1,)), ((), ())),
                                     preferred_element_type=jnp.float32)              # (S,S)
            denom = (1.0 - q2h) * (1.0 - k2h) + eps
            delta = 2.0 * (qk - q2h * k2h) / denom
            scores = -jnp.sqrt(jnp.maximum(delta, eps)) * inv_sqrt_dh
            scores = scores - jnp.max(scores, axis=-1, keepdims=True)
            p = jnp.exp(scores)
            wgt = p * pl.reciprocal(jnp.sum(p, axis=-1, keepdims=True), approx=True)
            heads.append(jnp.dot(wgt, vh, preferred_element_type=jnp.float32))        # (S,Dh)
        attn = jnp.concatenate(heads, axis=-1)                                        # (S,E)

        # output projection (hyperbolic linear)
        attn = _hyp_linear(attn, wo_ref[l], bo_ref[l])

        # TODO(synk): nn.Dropout treated as identity (inference / eval mode)
        x = _project(_mobius_add(x, attn))                              # residual 1

        # feed-forward: hyp linear -> mobius relu -> hyp linear
        hdd = _hyp_linear(x, w1_ref[l], b1_ref[l])
        hdd = _expmap0(jnp.maximum(_logmap0(hdd), 0.0))
        hdd = _hyp_linear(hdd, w2_ref[l], b2_ref[l])

        x = _project(_mobius_add(x, hdd))                               # residual 2

    # ---- classification head: logmap0 -> mean over sequence -> fc ----
    xe = _logmap0(x)                                                    # (S, E)
    xm = jnp.mean(xe, axis=0, keepdims=True)                            # (1, E)
    # TODO(synk): final nn.Dropout treated as identity (inference / eval mode)
    logits = jnp.dot(xm, fc_wt_ref[...],
                     preferred_element_type=jnp.float32) + fc_b_ref[...]  # (1, classes)
    out_ref[0] = logits


# ------------------------------ pallas_call wrappers ------------------------------
def _logmap0_rows(x2d):
    """Whole-array (no grid) logmap0 over the last axis of a 2-D tensor."""
    return pl.pallas_call(
        _logmap0_kernel,
        out_shape=jax.ShapeDtypeStruct(x2d.shape, jnp.float32),
        in_specs=[pl.BlockSpec(memory_space=pltpu.MemorySpace.VMEM)],
        out_specs=pl.BlockSpec(memory_space=pltpu.MemorySpace.VMEM),
    )(x2d)


def net_forward(prepared, x, *, patch_size, embedding_dim, num_heads, num_layers,
                num_classes):
    B, C, H, W = x.shape
    P = patch_size
    Hp, Wp = H // P, W // P
    S = Hp * Wp
    E = embedding_dim
    CPP = C * P * P

    # logmap0 over dim=-1 of the NCHW input (must precede patch extraction because
    # the row norm spans the full image width, crossing patch boundaries)
    x_e = _logmap0_rows(x.reshape(B * C * H, W)).reshape(B, C, H, W)

    # stride == kernel_size conv == per-patch matmul; patch extraction is layout glue
    patches = (x_e.reshape(B, C, Hp, P, Wp, P)
                  .transpose(0, 2, 4, 1, 3, 5)
                  .reshape(B, S, CPP))

    def full(shp):
        return pl.BlockSpec(shp, lambda b, _n=len(shp): (0,) * _n)

    kernel = functools.partial(_fused_forward_kernel, num_layers=num_layers,
                               num_heads=num_heads, hp=Hp, wp=Wp, embed_dim=E)

    out = pl.pallas_call(
        kernel,
        out_shape=jax.ShapeDtypeStruct((B, 1, num_classes), jnp.float32),
        grid=(B,),
        in_specs=[
            pl.BlockSpec((1, S, CPP), lambda b: (b, 0, 0)),
            full(prepared["conv_wmat"].shape),
            full(prepared["conv_b"].shape),
            full(prepared["pos"].shape),
            full(prepared["wqkv"].shape),
            full(prepared["bqkv"].shape),
            full(prepared["wo"].shape),
            full(prepared["bo"].shape),
            full(prepared["w1"].shape),
            full(prepared["b1"].shape),
            full(prepared["w2"].shape),
            full(prepared["b2"].shape),
            full(prepared["fc_wt"].shape),
            full(prepared["fc_b"].shape),
        ],
        out_specs=pl.BlockSpec((1, 1, num_classes), lambda b: (b, 0, 0)),
        compiler_params=pltpu.CompilerParams(dimension_semantics=("parallel",)),
    )(patches, prepared["conv_wmat"], prepared["conv_b"], prepared["pos"],
      prepared["wqkv"], prepared["bqkv"], prepared["wo"], prepared["bo"],
      prepared["w1"], prepared["b1"], prepared["w2"], prepared["b2"],
      prepared["fc_wt"], prepared["fc_b"])
    return out.reshape(B, num_classes)


# --------------------------------- params / prep ---------------------------------
def xavier_uniform(key, shape, fan_in, fan_out):
    bound = math.sqrt(6.0 / (fan_in + fan_out))
    return jax.random.uniform(key, shape, jnp.float32, -bound, bound)


def init_params(key, *, in_channels, embedding_dim, num_layers, patch_size,
                num_patches, num_classes):
    E = embedding_dim
    keys = jax.random.split(key, 4 + num_layers)
    params = {}
    params["conv_w"] = xavier_uniform(
        keys[0], (E, in_channels, patch_size, patch_size),
        in_channels * patch_size * patch_size, E * patch_size * patch_size)
    params["conv_b"] = jnp.zeros((E,), jnp.float32)
    params["pos"] = xavier_uniform(keys[1], (1, num_patches, E), num_patches * E, E)
    params["fc_w"] = xavier_uniform(keys[2], (num_classes, E), E, num_classes)
    params["fc_b"] = jnp.zeros((num_classes,), jnp.float32)
    layers = []
    for l in range(num_layers):
        ks = jax.random.split(keys[4 + l], 6)
        layers.append({
            "wq": xavier_uniform(ks[0], (E, E), E, E), "bq": jnp.zeros((E,)),
            "wk": xavier_uniform(ks[1], (E, E), E, E), "bk": jnp.zeros((E,)),
            "wv": xavier_uniform(ks[2], (E, E), E, E), "bv": jnp.zeros((E,)),
            "wo": xavier_uniform(ks[3], (E, E), E, E), "bo": jnp.zeros((E,)),
            "w1": xavier_uniform(ks[4], (4 * E, E), E, 4 * E), "b1": jnp.zeros((4 * E,)),
            "w2": xavier_uniform(ks[5], (E, 4 * E), 4 * E, E), "b2": jnp.zeros((E,)),
        })
    params["layers"] = layers
    return params


def prepare_params(params, *, in_channels, patch_size, embedding_dim):
    """One-time prep: logmap0 of the constant conv weight, weight transposes,
    QKV concatenation, and stacking per-layer weights along a leading layer axis."""
    C, P, E = in_channels, patch_size, embedding_dim
    # logmap0 over dim=-1 (kernel width P) of the conv weight, done once (not per forward)
    w_e = _logmap0_rows(params["conv_w"].reshape(-1, P)).reshape(E, C, P, P)
    conv_wmat = w_e.reshape(E, C * P * P).T                               # (C*P*P, E)

    layers = params["layers"]
    stack = lambda f: jnp.stack([f(lp) for lp in layers])
    return {
        "conv_wmat": conv_wmat,
        "conv_b": params["conv_b"].reshape(1, E),
        "pos": params["pos"][0],                                          # (S, E)
        "wqkv": stack(lambda lp: jnp.concatenate([lp["wq"], lp["wk"], lp["wv"]], axis=0).T),
        "bqkv": stack(lambda lp: jnp.concatenate([lp["bq"], lp["bk"], lp["bv"]]).reshape(1, -1)),
        "wo": stack(lambda lp: lp["wo"].T),
        "bo": stack(lambda lp: lp["bo"].reshape(1, -1)),
        "w1": stack(lambda lp: lp["w1"].T),
        "b1": stack(lambda lp: lp["b1"].reshape(1, -1)),
        "w2": stack(lambda lp: lp["w2"].T),
        "b2": stack(lambda lp: lp["b2"].reshape(1, -1)),
        "fc_wt": params["fc_w"].T,                                        # (E, classes)
        "fc_b": params["fc_b"].reshape(1, -1),
    }


# ------------------------------------- main -------------------------------------
if __name__ == "__main__":
    # small, consistent configuration
    IMG, PATCH, CIN = 32, 8, 3
    EMB, HEADS, LAYERS = 32, 4, 2
    CLASSES, BATCH = 16, 2
    NUM_PATCHES = (IMG // PATCH) ** 2

    key = jax.random.PRNGKey(0)
    kp, kx = jax.random.split(key)
    params = init_params(kp, in_channels=CIN, embedding_dim=EMB, num_layers=LAYERS,
                         patch_size=PATCH, num_patches=NUM_PATCHES, num_classes=CLASSES)
    prepared = prepare_params(params, in_channels=CIN, patch_size=PATCH,
                              embedding_dim=EMB)
    # input points kept well inside the unit ball along the last axis
    x = 0.1 * jax.random.normal(kx, (BATCH, CIN, IMG, IMG), jnp.float32)

    fwd = jax.jit(functools.partial(net_forward, patch_size=PATCH, embedding_dim=EMB,
                                    num_heads=HEADS, num_layers=LAYERS,
                                    num_classes=CLASSES))
    out = jax.block_until_ready(fwd(prepared, x))
    assert out.shape == (BATCH, CLASSES)
    print("KERNEL_OK")
</pallas_src>

<mosaic_0001>
module attributes {stable_mosaic.version = 11 : i64} {
  func.func @_logmap0_kernel(%arg0: memref<768x8xf32, #tpu.memory_space<vmem>>, %arg1: memref<768x8xf32, #tpu.memory_space<vmem>>) attributes {dimension_semantics = [], scalar_prefetch = 0 : i64, scratch_operands = 0 : i64, tpu.core_type = #tpu.core_type<tc>} {
    %c0 = arith.constant 0 : index
    %c0_0 = arith.constant 0 : index
    %0 = vector.load %arg0[%c0, %c0_0] : memref<768x8xf32, #tpu.memory_space<vmem>>, vector<768x8xf32>
    %1 = arith.mulf %0, %0 : vector<768x8xf32>
    %cst = arith.constant dense<0.000000e+00> : vector<768xf32>
    %2 = vector.multi_reduction <add>, %1, %cst [1] : vector<768x8xf32> to vector<768xf32>
    %3 = vector.shape_cast %2 : vector<768xf32> to vector<768x1xf32>
    %4 = math.sqrt %3 : vector<768x1xf32>
    %cst_1 = arith.constant 1.000000e-15 : f32
    %5 = vector.broadcast %cst_1 : f32 to vector<768x1xf32>
    %6 = arith.maximumf %4, %5 : vector<768x1xf32>
    %7 = vector.broadcast %6 : vector<768x1xf32> to vector<768x8xf32>
    %8 = arith.divf %0, %7 : vector<768x8xf32>
    %cst_2 = arith.constant -0.99999988 : f32
    %cst_3 = arith.constant 0.99999988 : f32
    %9 = vector.broadcast %cst_2 : f32 to vector<768x1xf32>
    %10 = arith.maximumf %9, %6 : vector<768x1xf32>
    %11 = vector.broadcast %cst_3 : f32 to vector<768x1xf32>
    %12 = arith.minimumf %11, %10 : vector<768x1xf32>
    %13 = math.log1p %12 : vector<768x1xf32>
    %cst_4 = arith.constant 0.000000e+00 : f32
    %14 = vector.broadcast %cst_4 : f32 to vector<768x1xf32>
    %15 = arith.subf %14, %12 : vector<768x1xf32>
    %16 = math.log1p %15 : vector<768x1xf32>
    %17 = arith.subf %13, %16 : vector<768x1xf32>
    %cst_5 = arith.constant 5.000000e-01 : f32
    %18 = vector.broadcast %cst_5 : f32 to vector<768x1xf32>
    %19 = arith.mulf %18, %17 : vector<768x1xf32>
    %20 = vector.broadcast %19 : vector<768x1xf32> to vector<768x8xf32>
    %21 = arith.mulf %8, %20 : vector<768x8xf32>
    %c0_6 = arith.constant 0 : index
    %c0_7 = arith.constant 0 : index
    %22 = vector.load %arg1[%c0_6, %c0_7] : memref<768x8xf32, #tpu.memory_space<vmem>>, vector<768x8xf32>
    tpu.vector_store %arg1[%c0_6, %c0_7], %21 {strides = array<i32>} : memref<768x8xf32, #tpu.memory_space<vmem>>, vector<768x8xf32>,
    return
  }
}

</mosaic_0001>

<bundles_post_ra>
// kernel: tpu_custom_call.1
= control target key start
LH: loop header
LB: loop body
LE: loop exit
PB: predicated region body
PF: predicated region fallthrough
CT: control target
= control target key end

     0   :  { %vm200_vm0 = vcmask 64512   ;;  %s9156_s0 = inlined_call_operand.vmem [shape: f32[768,8], index: 0, kind: input, shape index: {}]   ;;  %s9157_s1 = inlined_call_operand.vmem [shape: f32[768,8], index: 1, kind: output, shape index: {}]  }
   0x1   :  { %v4824_v0 = vld [vmem:[%s9156_s0 + $0x10] sm:$0xff]  ;;  %v4829_v1 = vld [vmem:[%s9156_s0] sm:$0xff]  ;;  %v11_v2 = vld [vmem:[%s9156_s0 + $0x18] sm:$0xff] }
   0x2   :  { %v106_v3 = vmul.f32 %v4824_v0, %v4824_v0  ;;  %v104_v4 = vmul.f32 %v4829_v1, %v4829_v1  ;;  %v107_v5 = vmul.f32 %v11_v2, %v11_v2  ;;  %v9_v6 = vld [vmem:[%s9156_s0 + $0x8] sm:$0xff]  ;;  %v12_v9 = vld [vmem:[%s9156_s0 + $0x20] sm:$0xff]  ;;  %v15_v16 = vld [vmem:[%s9156_s0 + $0x38] sm:$0xff] }
   0x3   :  { %v105_v7 = vmul.f32 %v9_v6, %v9_v6  ;;  %v13_v8 = vld [vmem:[%s9156_s0 + $0x28] sm:$0xff]  ;;  %v108_v15 = vmul.f32 %v12_v9, %v12_v9  ;;  %v14_v17 = vld [vmem:[%s9156_s0 + $0x30] sm:$0xff]  ;;  %v111_v20 = vmul.f32 %v15_v16, %v15_v16  ;;  %v16_v23 = vld [vmem:[%s9156_s0 + $0x40] sm:$0xff] }
   0x4   :  { %v207_v10 = vsel %vm200_vm0, %v106_v3, 0.0  ;;  %v201_v11 = vsel %vm200_vm0, %v104_v4, 0.0  ;;  %v210_v12 = vsel %vm200_vm0, %v107_v5, 0.0  ;;  %v109_v14 = vmul.f32 %v13_v8, %v13_v8  ;;  %v17_v22 = vld [vmem:[%s9156_s0 + $0x48] sm:$0xff]  ;;  %v19_v28 = vld [vmem:[%s9156_s0 + $0x58] sm:$0xff]  ;;  %v18_v29 = vld [vmem:[%s9156_s0 + $0x50] sm:$0xff] }
   0x5   :  { %208 = vadd.xlane.f32.xlu1 %v207_v10  ;;  %202 = vadd.xlane.f32.xlu0 %v201_v11  ;;  %v204_v13 = vsel %vm200_vm0, %v105_v7, 0.0  ;;  %v213_v19 = vsel %vm200_vm0, %v108_v15, 0.0  ;;  %v110_v21 = vmul.f32 %v14_v17, %v14_v17  ;;  %v222_v24 = vsel %vm200_vm0, %v111_v20, 0.0  ;;  %v21_v34 = vld [vmem:[%s9156_s0 + $0x68] sm:$0xff]  ;;  %v20_v35 = vld [vmem:[%s9156_s0 + $0x60] sm:$0xff]  ;;  %v23_v40 = vld [vmem:[%s9156_s0 + $0x78] sm:$0xff] }
   0x6   :  { %v216_v18 = vsel %vm200_vm0, %v109_v14, 0.0  ;;  %v113_v26 = vmul.f32 %v17_v22, %v17_v22  ;;  %v112_v27 = vmul.f32 %v16_v23, %v16_v23  ;;  %v115_v32 = vmul.f32 %v19_v28, %v19_v28  ;;  %v22_v41 = vld [vmem:[%s9156_s0 + $0x70] sm:$0xff]  ;;  %v25_v46 = vld [vmem:[%s9156_s0 + $0x88] sm:$0xff]  ;;  %v24_v47 = vld [vmem:[%s9156_s0 + $0x80] sm:$0xff] }
   0x7   :  { %v219_v25 = vsel %vm200_vm0, %v110_v21, 0.0  ;;  %v114_v33 = vmul.f32 %v18_v29, %v18_v29  ;;  %v117_v38 = vmul.f32 %v21_v34, %v21_v34  ;;  %v116_v39 = vmul.f32 %v20_v35, %v20_v35  ;;  %v27_v52 = vld [vmem:[%s9156_s0 + $0x98] sm:$0xff]  ;;  %v26_v53 = vld [vmem:[%s9156_s0 + $0x90] sm:$0xff]  ;;  %v29_v58 = vld [vmem:[%s9156_s0 + $0xa8] sm:$0xff] }
   0x8   :  { %v228_v30 = vsel %vm200_vm0, %v113_v26, 0.0  ;;  %v225_v31 = vsel %vm200_vm0, %v112_v27, 0.0  ;;  %v234_v36 = vsel %vm200_vm0, %v115_v32, 0.0  ;;  %v119_v44 = vmul.f32 %v23_v40, %v23_v40  ;;  %v28_v59 = vld [vmem:[%s9156_s0 + $0xa0] sm:$0xff]  ;;  %v31_v2 = vld [vmem:[%s9156_s0 + $0xb8] sm:$0xff]  ;;  %v30_v3 = vld [vmem:[%s9156_s0 + $0xb0] sm:$0xff] }
   0x9   :  { %211 = vadd.xlane.f32.xlu1 %v210_v12  ;;  %205 = vadd.xlane.f32.xlu0 %v204_v13  ;;  %v231_v37 = vsel %vm200_vm0, %v114_v33, 0.0  ;;  %v240_v42 = vsel %vm200_vm0, %v117_v38, 0.0  ;;  %v237_v43 = vsel %vm200_vm0, %v116_v39, 0.0  ;;  %v118_v45 = vmul.f32 %v22_v41, %v22_v41  ;;  %v33_v8 = vld [vmem:[%s9156_s0 + $0xc8] sm:$0xff]  ;;  %v32_v9 = vld [vmem:[%s9156_s0 + $0xc0] sm:$0xff]  ;;  %v35_v14 = vld [vmem:[%s9156_s0 + $0xd8] sm:$0xff] }
   0xa   :  { %v246_v48 = vsel %vm200_vm0, %v119_v44, 0.0  ;;  %v121_v50 = vmul.f32 %v25_v46, %v25_v46  ;;  %v120_v51 = vmul.f32 %v24_v47, %v24_v47  ;;  %v123_v56 = vmul.f32 %v27_v52, %v27_v52  ;;  %v34_v15 = vld [vmem:[%s9156_s0 + $0xd0] sm:$0xff]  ;;  %v37_v20 = vld [vmem:[%s9156_s0 + $0xe8] sm:$0xff]  ;;  %v36_v21 = vld [vmem:[%s9156_s0 + $0xe0] sm:$0xff] }
   0xb   :  { %v243_v49 = vsel %vm200_vm0, %v118_v45, 0.0  ;;  %v122_v57 = vmul.f32 %v26_v53, %v26_v53  ;;  %v125_v62 = vmul.f32 %v29_v58, %v29_v58  ;;  %v124_v63 = vmul.f32 %v28_v59, %v28_v59  ;;  %v39_v26 = vld [vmem:[%s9156_s0 + $0xf8] sm:$0xff]  ;;  %v38_v27 = vld [vmem:[%s9156_s0 + $0xf0] sm:$0xff]  ;;  %v41_v32 = vld [vmem:[%s9156_s0 + $0x108] sm:$0xff] }
   0xc   :  { %v252_v54 = vsel %vm200_vm0, %v121_v50, 0.0  ;;  %v249_v55 = vsel %vm200_vm0, %v120_v51, 0.0  ;;  %v258_v60 = vsel %vm200_vm0, %v123_v56, 0.0  ;;  %v127_v6 = vmul.f32 %v31_v2, %v31_v2  ;;  %v40_v33 = vld [vmem:[%s9156_s0 + $0x100] sm:$0xff]  ;;  %v43_v38 = vld [vmem:[%s9156_s0 + $0x118] sm:$0xff]  ;;  %v42_v39 = vld [vmem:[%s9156_s0 + $0x110] sm:$0xff] }
   0xd   :  { %217 = vadd.xlane.f32.xlu1 %v216_v18  ;;  %214 = vadd.xlane.f32.xlu0 %v213_v19  ;;  %v255_v61 = vsel %vm200_vm0, %v122_v57, 0.0  ;;  %v264_v4 = vsel %vm200_vm0, %v125_v62, 0.0  ;;  %v261_v5 = vsel %vm200_vm0, %v124_v63, 0.0  ;;  %v126_v7 = vmul.f32 %v30_v3, %v30_v3  ;;  %v45_v44 = vld [vmem:[%s9156_s0 + $0x128] sm:$0xff]  ;;  %v44_v45 = vld [vmem:[%s9156_s0 + $0x120] sm:$0xff]  ;;  %v47_v50 = vld [vmem:[%s9156_s0 + $0x138] sm:$0xff] }
   0xe   :  { %v270_v10 = vsel %vm200_vm0, %v127_v6, 0.0  ;;  %v129_v12 = vmul.f32 %v33_v8, %v33_v8  ;;  %v128_v13 = vmul.f32 %v32_v9, %v32_v9  ;;  %v131_v18 = vmul.f32 %v35_v14, %v35_v14  ;;  %v46_v51 = vld [vmem:[%s9156_s0 + $0x130] sm:$0xff]  ;;  %v49_v56 = vld [vmem:[%s9156_s0 + $0x148] sm:$0xff]  ;;  %v48_v57 = vld [vmem:[%s9156_s0 + $0x140] sm:$0xff] }
   0xf   :  { %v267_v11 = vsel %vm200_vm0, %v126_v7, 0.0  ;;  %v130_v19 = vmul.f32 %v34_v15, %v34_v15  ;;  %v51_v62 = vld [vmem:[%s9156_s0 + $0x158] sm:$0xff]  ;;  %v50_v63 = vld [vmem:[%s9156_s0 + $0x150] sm:$0xff]  ;;  %v53_v6 = vld [vmem:[%s9156_s0 + $0x168] sm:$0xff] }
  0x10   :  { %v276_v16 = vsel %vm200_vm0, %v129_v12, 0.0  ;;  %v273_v17 = vsel %vm200_vm0, %v128_v13, 0.0  ;;  %v282_v22 = vsel %vm200_vm0, %v131_v18, 0.0  ;;  %v52_v7 = vld [vmem:[%s9156_s0 + $0x160] sm:$0xff]  ;;  %v55_v12 = vld [vmem:[%s9156_s0 + $0x178] sm:$0xff]  ;;  %v54_v13 = vld [vmem:[%s9156_s0 + $0x170] sm:$0xff] }
  0x11   :  { %223 = vadd.xlane.f32.xlu1 %v222_v24  ;;  %220 = vadd.xlane.f32.xlu0 %v219_v25  ;;  %v279_v23 = vsel %vm200_vm0, %v130_v19, 0.0  ;;  %v133_v24 = vmul.f32 %v37_v20, %v37_v20  ;;  %v132_v25 = vmul.f32 %v36_v21, %v36_v21  ;;  %v57_v18 = vld [vmem:[%s9156_s0 + $0x188] sm:$0xff]  ;;  %v56_v19 = vld [vmem:[%s9156_s0 + $0x180] sm:$0xff] }
  0x13   :  { %v288_v28 = vsel %vm200_vm0, %v133_v24, 0.0  ;;  %v285_v29 = vsel %vm200_vm0, %v132_v25, 0.0  ;;  %v59_v24 = vld [vmem:[%s9156_s0 + $0x198] sm:$0xff]  ;;  %v58_v25 = vld [vmem:[%s9156_s0 + $0x190] sm:$0xff] }
  0x15   :  { %229 = vadd.xlane.f32.xlu1 %v228_v30  ;;  %226 = vadd.xlane.f32.xlu0 %v225_v31  ;;  %v135_v30 = vmul.f32 %v39_v26, %v39_v26  ;;  %v134_v31 = vmul.f32 %v38_v27, %v38_v27 }
  0x17   :  { %v294_v34 = vsel %vm200_vm0, %v135_v30, 0.0  ;;  %v291_v35 = vsel %vm200_vm0, %v134_v31, 0.0  ;;  %v61_v30 = vld [vmem:[%s9156_s0 + $0x1a8] sm:$0xff]  ;;  %v60_v31 = vld [vmem:[%s9156_s0 + $0x1a0] sm:$0xff] }
  0x19   :  { %235 = vadd.xlane.f32.xlu1 %v234_v36  ;;  %232 = vadd.xlane.f32.xlu0 %v231_v37  ;;  %v137_v36 = vmul.f32 %v41_v32, %v41_v32  ;;  %v136_v37 = vmul.f32 %v40_v33, %v40_v33 }
  0x1b   :  { %v300_v40 = vsel %vm200_vm0, %v137_v36, 0.0  ;;  %v297_v41 = vsel %vm200_vm0, %v136_v37, 0.0  ;;  %v63_v36 = vld [vmem:[%s9156_s0 + $0x1b8] sm:$0xff]  ;;  %v62_v37 = vld [vmem:[%s9156_s0 + $0x1b0] sm:$0xff] }
  0x1d   :  { %241 = vadd.xlane.f32.xlu1 %v240_v42  ;;  %238 = vadd.xlane.f32.xlu0 %v237_v43  ;;  %v139_v42 = vmul.f32 %v43_v38, %v43_v38  ;;  %v138_v43 = vmul.f32 %v42_v39, %v42_v39 }
  0x1f   :  { %v306_v46 = vsel %vm200_vm0, %v139_v42, 0.0  ;;  %v303_v47 = vsel %vm200_vm0, %v138_v43, 0.0  ;;  %v65_v42 = vld [vmem:[%s9156_s0 + $0x1c8] sm:$0xff]  ;;  %v64_v43 = vld [vmem:[%s9156_s0 + $0x1c0] sm:$0xff] }
  0x21   :  { %247 = vadd.xlane.f32.xlu1 %v246_v48  ;;  %244 = vadd.xlane.f32.xlu0 %v243_v49  ;;  %v141_v48 = vmul.f32 %v45_v44, %v45_v44  ;;  %v140_v49 = vmul.f32 %v44_v45, %v44_v45 }
  0x23   :  { %v312_v52 = vsel %vm200_vm0, %v141_v48, 0.0  ;;  %v309_v53 = vsel %vm200_vm0, %v140_v49, 0.0  ;;  %v67_v48 = vld [vmem:[%s9156_s0 + $0x1d8] sm:$0xff]  ;;  %v66_v49 = vld [vmem:[%s9156_s0 + $0x1d0] sm:$0xff] }
  0x25   :  { %253 = vadd.xlane.f32.xlu1 %v252_v54  ;;  %250 = vadd.xlane.f32.xlu0 %v249_v55  ;;  %v143_v54 = vmul.f32 %v47_v50, %v47_v50  ;;  %v142_v55 = vmul.f32 %v46_v51, %v46_v51 }
  0x27   :  { %v318_v58 = vsel %vm200_vm0, %v143_v54, 0.0  ;;  %v315_v59 = vsel %vm200_vm0, %v142_v55, 0.0  ;;  %v69_v54 = vld [vmem:[%s9156_s0 + $0x1e8] sm:$0xff]  ;;  %v68_v55 = vld [vmem:[%s9156_s0 + $0x1e0] sm:$0xff] }
  0x29   :  { %259 = vadd.xlane.f32.xlu1 %v258_v60  ;;  %256 = vadd.xlane.f32.xlu0 %v255_v61  ;;  %v145_v60 = vmul.f32 %v49_v56, %v49_v56  ;;  %v144_v61 = vmul.f32 %v48_v57, %v48_v57 }
  0x2b   :  { %v324_v2 = vsel %vm200_vm0, %v145_v60, 0.0  ;;  %v321_v3 = vsel %vm200_vm0, %v144_v61, 0.0  ;;  %v71_v60 = vld [vmem:[%s9156_s0 + $0x1f8] sm:$0xff]  ;;  %v70_v61 = vld [vmem:[%s9156_s0 + $0x1f0] sm:$0xff] }
  0x2d   :  { %265 = vadd.xlane.f32.xlu1 %v264_v4  ;;  %262 = vadd.xlane.f32.xlu0 %v261_v5  ;;  %v147_v4 = vmul.f32 %v51_v62, %v51_v62  ;;  %v146_v5 = vmul.f32 %v50_v63, %v50_v63 }
  0x2f   :  { %v330_v8 = vsel %vm200_vm0, %v147_v4, 0.0  ;;  %v327_v9 = vsel %vm200_vm0, %v146_v5, 0.0  ;;  %v73_v4 = vld [vmem:[%s9156_s0 + $0x208] sm:$0xff]  ;;  %v72_v5 = vld [vmem:[%s9156_s0 + $0x200] sm:$0xff] }
  0x31   :  { %271 = vadd.xlane.f32.xlu1 %v270_v10  ;;  %268 = vadd.xlane.f32.xlu0 %v267_v11  ;;  %v149_v10 = vmul.f32 %v53_v6, %v53_v6  ;;  %v148_v11 = vmul.f32 %v52_v7, %v52_v7 }
  0x33   :  { %v336_v14 = vsel %vm200_vm0, %v149_v10, 0.0  ;;  %v333_v15 = vsel %vm200_vm0, %v148_v11, 0.0  ;;  %v75_v10 = vld [vmem:[%s9156_s0 + $0x218] sm:$0xff]  ;;  %v74_v11 = vld [vmem:[%s9156_s0 + $0x210] sm:$0xff] }
  0x35   :  { %277 = vadd.xlane.f32.xlu1 %v276_v16  ;;  %274 = vadd.xlane.f32.xlu0 %v273_v17  ;;  %v151_v16 = vmul.f32 %v55_v12, %v55_v12  ;;  %v150_v17 = vmul.f32 %v54_v13, %v54_v13 }
  0x37   :  { %v342_v20 = vsel %vm200_vm0, %v151_v16, 0.0  ;;  %v339_v21 = vsel %vm200_vm0, %v150_v17, 0.0  ;;  %v77_v16 = vld [vmem:[%s9156_s0 + $0x228] sm:$0xff]  ;;  %v76_v17 = vld [vmem:[%s9156_s0 + $0x220] sm:$0xff] }
  0x39   :  { %283 = vadd.xlane.f32.xlu1 %v282_v22  ;;  %280 = vadd.xlane.f32.xlu0 %v279_v23  ;;  %v153_v22 = vmul.f32 %v57_v18, %v57_v18  ;;  %v152_v23 = vmul.f32 %v56_v19, %v56_v19 }
  0x3b   :  { %v348_v26 = vsel %vm200_vm0, %v153_v22, 0.0  ;;  %v345_v27 = vsel %vm200_vm0, %v152_v23, 0.0  ;;  %v79_v22 = vld [vmem:[%s9156_s0 + $0x238] sm:$0xff]  ;;  %v78_v23 = vld [vmem:[%s9156_s0 + $0x230] sm:$0xff] }
  0x3d   :  { %289 = vadd.xlane.f32.xlu1 %v288_v28  ;;  %286 = vadd.xlane.f32.xlu0 %v285_v29  ;;  %v155_v28 = vmul.f32 %v59_v24, %v59_v24  ;;  %v154_v29 = vmul.f32 %v58_v25, %v58_v25 }
  0x3f   :  { %v354_v32 = vsel %vm200_vm0, %v155_v28, 0.0  ;;  %v351_v33 = vsel %vm200_vm0, %v154_v29, 0.0  ;;  %v81_v28 = vld [vmem:[%s9156_s0 + $0x248] sm:$0xff]  ;;  %v80_v29 = vld [vmem:[%s9156_s0 + $0x240] sm:$0xff] }
  0x41   :  { %295 = vadd.xlane.f32.xlu1 %v294_v34  ;;  %292 = vadd.xlane.f32.xlu0 %v291_v35  ;;  %v157_v34 = vmul.f32 %v61_v30, %v61_v30  ;;  %v156_v35 = vmul.f32 %v60_v31, %v60_v31 }
  0x43   :  { %v360_v38 = vsel %vm200_vm0, %v157_v34, 0.0  ;;  %v357_v39 = vsel %vm200_vm0, %v156_v35, 0.0  ;;  %v83_v34 = vld [vmem:[%s9156_s0 + $0x258] sm:$0xff]  ;;  %v82_v35 = vld [vmem:[%s9156_s0 + $0x250] sm:$0xff] }
  0x45   :  { %301 = vadd.xlane.f32.xlu1 %v300_v40  ;;  %298 = vadd.xlane.f32.xlu0 %v297_v41  ;;  %v159_v40 = vmul.f32 %v63_v36, %v63_v36  ;;  %v158_v41 = vmul.f32 %v62_v37, %v62_v37 }
  0x47   :  { %v366_v44 = vsel %vm200_vm0, %v159_v40, 0.0  ;;  %v363_v45 = vsel %vm200_vm0, %v158_v41, 0.0  ;;  %v179_v40 = vmul.f32 %v83_v34, %v83_v34  ;;  %v178_v41 = vmul.f32 %v82_v35, %v82_v35 }
  0x49   :  { %307 = vadd.xlane.f32.xlu1 %v306_v46  ;;  %304 = vadd.xlane.f32.xlu0 %v303_v47  ;;  %v161_v46 = vmul.f32 %v65_v42, %v65_v42  ;;  %v160_v47 = vmul.f32 %v64_v43, %v64_v43  ;;  %v85_v42 = vld [vmem:[%s9156_s0 + $0x268] sm:$0xff]  ;;  %v84_v43 = vld [vmem:[%s9156_s0 + $0x260] sm:$0xff] }
  0x4b   :  { %v372_v50 = vsel %vm200_vm0, %v161_v46, 0.0  ;;  %v369_v51 = vsel %vm200_vm0, %v160_v47, 0.0  ;;  %v86_v46 = vld [vmem:[%s9156_s0 + $0x270] sm:$0xff]  ;;  %v89_v47 = vld [vmem:[%s9156_s0 + $0x288] sm:$0xff] }
  0x4d   :  { %313 = vadd.xlane.f32.xlu1 %v312_v52  ;;  %310 = vadd.xlane.f32.xlu0 %v309_v53  ;;  %v163_v52 = vmul.f32 %v67_v48, %v67_v48  ;;  %v162_v53 = vmul.f32 %v66_v49, %v66_v49  ;;  %v88_v48 = vld [vmem:[%s9156_s0 + $0x280] sm:$0xff] }
  0x4f   :  { %v378_v56 = vsel %vm200_vm0, %v163_v52, 0.0  ;;  %v375_v57 = vsel %vm200_vm0, %v162_v53, 0.0  ;;  %v423_v52 = vsel %vm200_vm0, %v178_v41, 0.0  ;;  %v180_v53 = vmul.f32 %v84_v43, %v84_v43 }
  0x51   :  { %319 = vadd.xlane.f32.xlu1 %v318_v58  ;;  %316 = vadd.xlane.f32.xlu0 %v315_v59  ;;  %v165_v58 = vmul.f32 %v69_v54, %v69_v54  ;;  %v164_v59 = vmul.f32 %v68_v55, %v68_v55  ;;  %v91_v54 = vld [vmem:[%s9156_s0 + $0x298] sm:$0xff]  ;;  %v90_v55 = vld [vmem:[%s9156_s0 + $0x290] sm:$0xff] }
  0x53   :  { %v384_v62 = vsel %vm200_vm0, %v165_v58, 0.0  ;;  %v381_v63 = vsel %vm200_vm0, %v164_v59, 0.0  ;;  %v92_v58 = vld [vmem:[%s9156_s0 + $0x2a0] sm:$0xff]  ;;  %v95_v59 = vld [vmem:[%s9156_s0 + $0x2b8] sm:$0xff] }
  0x55   :  { %325 = vadd.xlane.f32.xlu1 %v324_v2  ;;  %322 = vadd.xlane.f32.xlu0 %v321_v3  ;;  %v167_v2 = vmul.f32 %v71_v60, %v71_v60  ;;  %v166_v3 = vmul.f32 %v70_v61, %v70_v61  ;;  %v94_v60 = vld [vmem:[%s9156_s0 + $0x2b0] sm:$0xff]  ;;  %v182_v61 = vmul.f32 %v86_v46, %v86_v46 }
  0x57   :  { %v390_v6 = vsel %vm200_vm0, %v167_v2, 0.0  ;;  %v387_v7 = vsel %vm200_vm0, %v166_v3, 0.0  ;;  %v187_v3 = vmul.f32 %v91_v54, %v91_v54 }
  0x59   :  { %331 = vadd.xlane.f32.xlu1 %v330_v8  ;;  %328 = vadd.xlane.f32.xlu0 %v327_v9  ;;  %v169_v8 = vmul.f32 %v73_v4, %v73_v4  ;;  %v168_v9 = vmul.f32 %v72_v5, %v72_v5  ;;  %v186_v4 = vmul.f32 %v90_v55, %v90_v55 }
  0x5b   :  { %v396_v12 = vsel %vm200_vm0, %v169_v8, 0.0  ;;  %v393_v13 = vsel %vm200_vm0, %v168_v9, 0.0  ;;  %v191_v8 = vmul.f32 %v95_v59, %v95_v59  ;;  %v190_v9 = vmul.f32 %v94_v60, %v94_v60 }
  0x5d   :  { %337 = vadd.xlane.f32.xlu1 %v336_v14  ;;  %334 = vadd.xlane.f32.xlu0 %v333_v15  ;;  %v171_v14 = vmul.f32 %v75_v10, %v75_v10  ;;  %v170_v15 = vmul.f32 %v74_v11, %v74_v11  ;;  %v435_v11 = vsel %vm200_vm0, %v182_v61, 0.0 }
  0x5f   :  { %v402_v18 = vsel %vm200_vm0, %v171_v14, 0.0  ;;  %v399_v19 = vsel %vm200_vm0, %v170_v15, 0.0  ;;  %v5188_v15 = vsel %vm200_vm0, %v187_v3, 0.0 }
  0x61   :  { %343 = vadd.xlane.f32.xlu1 %v342_v20  ;;  %340 = vadd.xlane.f32.xlu0 %v339_v21  ;;  %v173_v20 = vmul.f32 %v77_v16, %v77_v16  ;;  %v172_v21 = vmul.f32 %v76_v17, %v76_v17  ;;  %v5191_v16 = vsel %vm200_vm0, %v186_v4, 0.0 }
  0x63   :  { %v408_v24 = vsel %vm200_vm0, %v173_v20, 0.0  ;;  %v405_v25 = vsel %vm200_vm0, %v172_v21, 0.0  ;;  %v5201_v21 = vsel %vm200_vm0, %v191_v8, 0.0 }
  0x65   :  { %349 = vadd.xlane.f32.xlu1 %v348_v26  ;;  %346 = vadd.xlane.f32.xlu0 %v345_v27  ;;  %v175_v26 = vmul.f32 %v79_v22, %v79_v22  ;;  %v174_v27 = vmul.f32 %v78_v23, %v78_v23  ;;  %v5204_v22 = vsel %vm200_vm0, %v190_v9, 0.0 }
  0x67   :  { %v414_v30 = vsel %vm200_vm0, %v175_v26, 0.0  ;;  %v411_v31 = vsel %vm200_vm0, %v174_v27, 0.0 }
  0x69   :  { %355 = vadd.xlane.f32.xlu1 %v354_v32  ;;  %352 = vadd.xlane.f32.xlu0 %v351_v33  ;;  %v177_v32 = vmul.f32 %v81_v28, %v81_v28  ;;  %v176_v33 = vmul.f32 %v80_v29, %v80_v29 }
  0x6d   :  { %361 = vadd.xlane.f32.xlu1 %v360_v38  ;;  %358 = vadd.xlane.f32.xlu0 %v357_v39  ;;  %v420_v38 = vsel %vm200_vm0, %v177_v32, 0.0  ;;  %v417_v39 = vsel %vm200_vm0, %v176_v33, 0.0  ;;  %v96_v32 = vld [vmem:[%s9156_s0 + $0x2c0] sm:$0xff] }
  0x6e   :  { %v192_v43 = vmul.f32 %v96_v32, %v96_v32 }
  0x71   :  { %367 = vadd.xlane.f32.xlu1 %v366_v44  ;;  %364 = vadd.xlane.f32.xlu0 %v363_v45  ;;  %v87_v44 = vld [vmem:[%s9156_s0 + $0x278] sm:$0xff]  ;;  %v181_v45 = vmul.f32 %v85_v42, %v85_v42 }
  0x73   :  { %v432_v2 = vsel %vm200_vm0, %v181_v45, 0.0 }
  0x75   :  { %373 = vadd.xlane.f32.xlu1 %v372_v50  ;;  %370 = vadd.xlane.f32.xlu0 %v369_v51  ;;  %v426_v51 = vsel %vm200_vm0, %v179_v40, 0.0 }
  0x79   :  { %379 = vadd.xlane.f32.xlu1 %v378_v56  ;;  %376 = vadd.xlane.f32.xlu0 %v375_v57  ;;  %v93_v56 = vld [vmem:[%s9156_s0 + $0x2a8] sm:$0xff]  ;;  %v183_v57 = vmul.f32 %v87_v44, %v87_v44 }
  0x7a   :  { %v189_v5 = vmul.f32 %v93_v56, %v93_v56 }
  0x7b   :  { %v438_v10 = vsel %vm200_vm0, %v183_v57, 0.0 }
  0x7c   :  { %v5194_v17 = vsel %vm200_vm0, %v189_v5, 0.0 }
  0x7d   :  { %385 = vadd.xlane.f32.xlu1 %v384_v62  ;;  %382 = vadd.xlane.f32.xlu0 %v381_v63  ;;  %v185_v62 = vmul.f32 %v89_v47, %v89_v47  ;;  %v184_v63 = vmul.f32 %v88_v48, %v88_v48 }
  0x7f   :  { %v441_v14 = vsel %vm200_vm0, %v184_v63, 0.0 }
  0x81   :  { %391 = vadd.xlane.f32.xlu1 %v390_v6  ;;  %388 = vadd.xlane.f32.xlu0 %v387_v7  ;;  %v429_v6 = vsel %vm200_vm0, %v180_v53, 0.0  ;;  %v188_v7 = vmul.f32 %v92_v58, %v92_v58 }
  0x83   :  { %v5198_v20 = vsel %vm200_vm0, %v188_v7, 0.0 }
  0x85   :  { %397 = vadd.xlane.f32.xlu1 %v396_v12  ;;  %394 = vadd.xlane.f32.xlu0 %v393_v13  ;;  %v444_v12 = vsel %vm200_vm0, %v185_v62, 0.0 }
  0x89   :  { %403 = vadd.xlane.f32.xlu1 %v402_v18  ;;  %400 = vadd.xlane.f32.xlu0 %v399_v19 }
  0x8d   :  { %409 = vadd.xlane.f32.xlu1 %v408_v24  ;;  %406 = vadd.xlane.f32.xlu0 %v405_v25 }
  0x91   :  { %415 = vadd.xlane.f32.xlu1 %v414_v30  ;;  %412 = vadd.xlane.f32.xlu0 %v411_v31  ;;  %v97_v31 = vld [vmem:[%s9156_s0 + $0x2c8] sm:$0xff] }
  0x92   :  { %v5129_v36 = vpop.xlane.xlu1 %208  ;;  %v5131_v37 = vpop.xlane.xlu0 %202  ;;  %v193_v42 = vmul.f32 %v97_v31, %v97_v31 }
  0x93   :  { %3949 = vrsqrt.f32 %v5129_v36  ;;  %vm505_vm1 = vcmp.eq.f32.partialorder %v5129_v36, inf  ;;  %vm507_vm2 = vcmp.eq.f32.partialorder %v5129_v36, 0.0  ;;  %v508_v23 = vand.u32 2147483648, %v5129_v36 }
  0x94   :  { %3951 = vrsqrt.f32 %v5131_v37  ;;  %vm491_vm3 = vcmp.eq.f32.partialorder %v5131_v37, inf  ;;  %vm493_vm4 = vcmp.eq.f32.partialorder %v5131_v37, 0.0  ;;  %v494_v26 = vand.u32 2147483648, %v5131_v37 }
  0x95   :  { %421 = vadd.xlane.f32.xlu1 %v420_v38  ;;  %418 = vadd.xlane.f32.xlu0 %v417_v39  ;;  %v5249_v58 = vsel %vm200_vm0, %v193_v42, 0.0 }
  0x96   :  { %v5155_v49 = vpop.xlane.xlu1 %211  ;;  %v5157_v50 = vpop.xlane.xlu0 %205 }
  0x97   :  { %3953 = vrsqrt.f32 %v5155_v49  ;;  %vm512_vm5 = vcmp.eq.f32.partialorder %v5155_v49, inf  ;;  %vm514_vm6 = vcmp.eq.f32.partialorder %v5155_v49, 0.0  ;;  %vm498_vm7 = vcmp.eq.f32.partialorder %v5157_v50, inf }
  0x98   :  { %3955 = vrsqrt.f32 %v5157_v50  ;;  %vm500_vm8 = vcmp.eq.f32.partialorder %v5157_v50, 0.0  ;;  %v501_v40 = vand.u32 2147483648, %v5157_v50 }
  0x99   :  { %427 = vadd.xlane.f32.xlu1 %v426_v51  ;;  %424 = vadd.xlane.f32.xlu0 %v423_v52 }
  0x9a   :  { %v5214_v27 = vpop.xlane.xlu1 %217  ;;  %v5227_v38 = vpop.xlane.xlu0 %214 }
  0x9b   :  { %3957 = vrsqrt.f32 %v5214_v27  ;;  %v529_v46 = vand.u32 2147483648, %v5214_v27  ;;  %v522_v57 = vand.u32 2147483648, %v5227_v38  ;;  %vm526_vm10 = vcmp.eq.f32.partialorder %v5214_v27, inf }
  0x9c   :  { %3959 = vrsqrt.f32 %v5227_v38  ;;  %vm528_vm13 = vcmp.eq.f32.partialorder %v5214_v27, 0.0  ;;  %vm519_vm15 = vcmp.eq.f32.partialorder %v5227_v38, inf }
  0x9d   :  { %v3950_v13 = vpop.eup %3949  ;;  %433 = vadd.xlane.f32.xlu1 %v432_v2  ;;  %430 = vadd.xlane.f32.xlu0 %v429_v6  ;;  %v5261_v2 = vsel %vm200_vm0, %v192_v43, 0.0 }
  0x9e   :  { %v3952_v18 = vpop.eup %3951  ;;  %v504_v19 = vmul.f32 %v3950_v13, %v5129_v36  ;;  %v5241_v52 = vpop.xlane.xlu1 %223 }
  0x9f   :  { %v490_v24 = vmul.f32 %v3952_v18, %v5131_v37  ;;  %v5265_v5 = vpop.xlane.xlu0 %220  ;;  %v543_v13 = vand.u32 2147483648, %v5241_v52 }
  0xa0   :  { %v506_v25 = vsel %vm505_vm1, %v5129_v36, %v504_v19  ;;  %vm521_vm1 = vcmp.eq.f32.partialorder %v5227_v38, 0.0 }
  0xa1   :  { %v3954_v28 = vpop.eup %3953  ;;  %v509_v29 = vsel %vm507_vm2, %v508_v23, %v506_v25  ;;  %v492_v30 = vsel %vm491_vm3, %v5131_v37, %v490_v24  ;;  %439 = vadd.xlane.f32.xlu1 %v438_v10  ;;  %436 = vadd.xlane.f32.xlu0 %v435_v11  ;;  %v515_v37 = vand.u32 2147483648, %v5155_v49  ;;  %vm540_vm2 = vcmp.eq.f32.partialorder %v5241_v52, inf }
  0xa2   :  { %v3956_v33 = vpop.eup %3955  ;;  %v1163_v34 = vmax.f32 %v509_v29, 1e-15  ;;  %v495_v35 = vsel %vm493_vm4, %v494_v26, %v492_v30  ;;  %v511_v36 = vmul.f32 %v3954_v28, %v5155_v49  ;;  %v5269_v9 = vpop.xlane.xlu1 %229 }
  0xa3   :  { %v1161_v39 = vmax.f32 %v495_v35, 1e-15  ;;  %v497_v45 = vmul.f32 %v3956_v33, %v5157_v50 }
  0xa4   :  { %v3855_v41 = vclamps-f32 %v1163_v34, 0.9999999  ;;  %3961 = vrcp.f32 %v1163_v34  ;;  %v513_v51 = vsel %vm512_vm5, %v5155_v49, %v511_v36  ;;  %vm542_vm5 = vcmp.eq.f32.partialorder %v5241_v52, 0.0 }
  0xa5   :  { %v5233_v44 = vclamps-f32 %v1161_v39, 0.9999999  ;;  %445 = vadd.xlane.f32.xlu1 %v444_v12  ;;  %442 = vadd.xlane.f32.xlu0 %v441_v14  ;;  %3963 = vrcp.f32 %v1161_v39  ;;  %v516_v60 = vsel %vm514_vm6, %v515_v37, %v513_v51  ;;  %v499_v61 = vsel %vm498_vm7, %v5157_v50, %v497_v45  ;;  %v3958_v14 = vpop.eup %3957 }
  0xa6   :  { %v1659_v47 = vadd.f32 1.0, %v3855_v41  ;;  %v2507_v48 = vsub.f32 0.0, %v3855_v41  ;;  %v1662_v53 = vmul.f32 -0.5, %v3855_v41  ;;  %v1665_v4 = vand.u32 2147483647, %v3855_v41  ;;  %v3960_v50 = vpop.eup %3959 }
  0xa7   :  { %v1641_v54 = vadd.f32 1.0, %v5233_v44  ;;  %v5245_v55 = vsub.f32 0.0, %v5233_v44  ;;  %v1644_v59 = vmul.f32 -0.5, %v5233_v44  ;;  %v1647_v49 = vand.u32 2147483647, %v5233_v44 }
  0xa8   :  { %3965 = vlog2.f32 %v1659_v47  ;;  %v2619_v56 = vadd.f32 1.0, %v2507_v48  ;;  %v2622_v62 = vmul.f32 -0.5, %v2507_v48  ;;  %v1663_v3 = vadd.f32 1.0, %v1662_v53 }
  0xa9   :  { %3967 = vlog2.f32 %v1641_v54  ;;  %451 = vadd.xlane.f32.xlu1 %v5188_v15  ;;  %448 = vadd.xlane.f32.xlu0 %v5191_v16  ;;  %v2601_v63 = vadd.f32 1.0, %v5245_v55  ;;  %v2625_v6 = vand.u32 2147483647, %v2507_v48  ;;  %v1164_v7 = vmax.f32 %v516_v60, 1e-15 }
  0xaa   :  { %3969 = vlog2.f32 %v2619_v56  ;;  %v502_v8 = vsel %vm500_vm8, %v501_v40, %v499_v61  ;;  %v1645_v10 = vadd.f32 1.0, %v1644_v59  ;;  %v2604_v11 = vmul.f32 -0.5, %v5245_v55 }
  0xab   :  { %3971 = vrsqrt.f32 %v5241_v52  ;;  %v1162_v12 = vmax.f32 %v502_v8, 1e-15  ;;  %v2623_v15 = vadd.f32 1.0, %v2622_v62  ;;  %v2607_v16 = vand.u32 2147483647, %v5245_v55 }
  0xac   :  { %3973 = vlog2.f32 %v2601_v63  ;;  %v5276_v18 = vclamps-f32 %v1164_v7, 0.9999999  ;;  %vm5279_vm9 = vcmp.lt.f32.partialorder %v1665_v4, 0.0004427343  ;;  %v1664_v24 = vmul.f32 %v3855_v41, %v1663_v3 }
  0xad   :  { %457 = vadd.xlane.f32.xlu1 %v5194_v17  ;;  %454 = vadd.xlane.f32.xlu0 %v5198_v20  ;;  %3975 = vrsqrt.f32 %v5265_v5  ;;  %v5283_v23 = vclamps-f32 %v1162_v12, 0.9999999  ;;  %v536_v17 = vand.u32 2147483648, %v5265_v5  ;;  %vm5288_vm11 = vcmp.lt.f32.partialorder %v2625_v6, 0.0004427343 }
  0xae   :  { %3977 = vrsqrt.f32 %v5269_v9  ;;  %v3962_v20 = vpop.eup %3961  ;;  %vm5292_vm12 = vcmp.lt.f32.partialorder %v1647_v49, 0.0004427343  ;;  %v1668_v28 = vadd.f32 1.0, %v5276_v18  ;;  %v1646_v30 = vmul.f32 %v5233_v44, %v1645_v10 }
  0xaf   :  { %v3964_v29 = vpop.eup %3963  ;;  %v2605_v31 = vadd.f32 1.0, %v2604_v11  ;;  %v5300_v32 = vsub.f32 0.0, %v5276_v18  ;;  %v1650_v33 = vadd.f32 1.0, %v5283_v23  ;;  %v2624_v35 = vmul.f32 %v2623_v15, %v2507_v48 }
  0xb0   :  { %vm5305_vm14 = vcmp.lt.f32.partialorder %v2607_v16, 0.0004427343  ;;  %3979 = vlog2.f32 %v1668_v28  ;;  %v525_v37 = vmul.f32 %v3958_v14, %v5214_v27  ;;  %v1262_v42 = vmul.f32 %v3962_v20, %v4824_v0 }
  0xb1   :  { %463 = vadd.xlane.f32.xlu1 %v5201_v21  ;;  %460 = vadd.xlane.f32.xlu0 %v5204_v22  ;;  %3981 = vrcp.f32 %v1164_v7  ;;  %v2628_v41 = vadd.f32 1.0, %v5300_v32  ;;  %v5313_v21 = vsub.f32 0.0, %v5283_v23  ;;  %v1671_v43 = vmul.f32 -0.5, %v5276_v18 }
  0xb2   :  { %v3966_v34 = vpop.eup %3965  ;;  %3983 = vlog2.f32 %v1650_v33  ;;  %v518_v44 = vmul.f32 %v3960_v50, %v5227_v38  ;;  %v2606_v51 = vmul.f32 %v2605_v31, %v5245_v55  ;;  %v1258_v54 = vmul.f32 %v3964_v29, %v4829_v1 }
  0xb3   :  { %v3968_v39 = vpop.eup %3967  ;;  %v1661_v40 = vmul.f32 0.6931472, %v3966_v34  ;;  %3985 = vlog2.f32 %v2628_v41  ;;  %v1674_v0 = vand.u32 2147483647, %v5276_v18  ;;  %v1653_v56 = vmul.f32 -0.5, %v5283_v23 }
  0xb4   :  { %v3970_v22 = vpop.eup %3969  ;;  %v1643_v48 = vmul.f32 0.6931472, %v3968_v39  ;;  %3987 = vrcp.f32 %v1162_v12  ;;  %v2610_v61 = vadd.f32 1.0, %v5313_v21  ;;  %v1672_v63 = vadd.f32 1.0, %v1671_v43 }
  0xb5   :  { %v5319_v45 = vpop.eup %3971  ;;  %v2621_v47 = vmul.f32 0.6931472, %v3970_v22  ;;  %469 = vadd.xlane.f32.xlu1 %v5249_v58  ;;  %466 = vadd.xlane.f32.xlu0 %v5261_v2  ;;  %v1667_v59 = vsel %vm5279_vm9, %v1664_v24, %v1661_v40  ;;  %v2631_v1 = vmul.f32 -0.5, %v5300_v32  ;;  %v527_v2 = vsel %vm526_vm10, %v5214_v27, %v525_v37 }
  0xb6   :  { %v3974_v53 = vpop.eup %3973  ;;  %v1649_v4 = vsel %vm5292_vm12, %v1646_v30, %v1643_v48  ;;  %3989 = vlog2.f32 %v2610_v61  ;;  %v530_v6 = vsel %vm528_vm13, %v529_v46, %v527_v2  ;;  %v2634_v10 = vand.u32 2147483647, %v5300_v32 }
  0xb7   :  { %v2627_v60 = vsel %vm5288_vm11, %v2624_v35, %v2621_v47  ;;  %v2603_v55 = vmul.f32 0.6931472, %v3974_v53  ;;  %v5332_v58 = vpop.eup %3975  ;;  %v1654_v11 = vadd.f32 1.0, %v1653_v56  ;;  %v1656_v12 = vand.u32 2147483647, %v5283_v23 }
  0xb8   :  { %v3467_v62 = vsub.f32 %v1667_v59, %v2627_v60  ;;  %v5338_v3 = vpop.eup %3977  ;;  %v2613_v14 = vmul.f32 -0.5, %v5313_v21  ;;  %v1166_v15 = vmax.f32 %v530_v6, 1e-15  ;;  %v520_v16 = vsel %vm519_vm15, %v5227_v38, %v518_v44 }
  0xb9   :  { %v2609_v49 = vsel %vm5305_vm14, %v2606_v51, %v2603_v55  ;;  %v2632_v46 = vadd.f32 1.0, %v2631_v1  ;;  %v523_v20 = vsel %vm521_vm1, %v522_v57, %v520_v16  ;;  %v1673_v25 = vmul.f32 %v5276_v18, %v1672_v63 }
  0xba   :  { %v3563_v7 = vmul.f32 0.5, %v3467_v62  ;;  %v3465_v8 = vsub.f32 %v1649_v4, %v2609_v49  ;;  %v3980_v50 = vpop.eup %3979  ;;  %vm5360_vm3 = vcmp.lt.f32.partialorder %v1674_v0, 0.0004427343  ;;  %v5364_v28 = vclamps-f32 %v1166_v15, 0.9999999 }
  0xbb   :  { %v3982_v24 = vpop.eup %3981  ;;  %v1165_v29 = vmax.f32 %v523_v20, 1e-15  ;;  %v1670_v33 = vmul.f32 0.6931472, %v3980_v50  ;;  %vm5370_vm4 = vcmp.lt.f32.partialorder %v2634_v10, 0.0004427343  ;;  %v1655_v57 = vmul.f32 %v5283_v23, %v1654_v11 }
  0xbc   :  { %v3659_v19 = vmul.f32 %v3563_v7, %v1262_v42  ;;  %v3561_v27 = vmul.f32 0.5, %v3465_v8  ;;  %v3984_v30 = vpop.eup %3983  ;;  %vm5376_vm6 = vcmp.lt.f32.partialorder %v1656_v12, 0.0004427343  ;;  %v2614_v35 = vadd.f32 1.0, %v2613_v14  ;;  %v4717_v42 = vld [vmem:[%s9156_s0 + $0x18] sm:$0xff] }
  0xbd   :  { %v3986_v18 = vpop.eup %3985  ;;  %v2616_v36 = vand.u32 2147483647, %v5313_v21  ;;  %v1686_v37 = vadd.f32 1.0, %v5364_v28  ;;  %v2633_v23 = vmul.f32 %v2632_v46, %v5300_v32  ;;  %v5388_v41 = vsub.f32 0.0, %v5364_v28 }
  0xbe   :  { %3755 = vst.msk [vmem:[%s9157_s1 + $0x10] sm:$0xff] %vm200_vm0, %v3659_v19  ;;  %v3657_v31 = vmul.f32 %v3561_v27, %v1258_v54  ;;  %v3988_v39 = vpop.eup %3987  ;;  %v2630_v40 = vmul.f32 0.6931472, %v3986_v18  ;;  %v539_v22 = vmul.f32 %v5319_v45, %v5241_v52  ;;  %vm533_vm7 = vcmp.eq.f32.partialorder %v5265_v5, inf  ;;  %v5441_v19 = vpop.xlane.xlu0 %226 }
  0xbf   :  { %v1264_v43 = vmul.f32 %v4717_v42, %v3982_v24  ;;  %v1652_v44 = vmul.f32 0.6931472, %v3984_v30  ;;  %3991 = vlog2.f32 %v1686_v37  ;;  %v5396_v47 = vclamps-f32 %v1165_v29, 0.9999999 }
  0xc0   :  { %3753 = vst.msk [vmem:[%s9157_s1] sm:$0xff] %vm200_vm0, %v3657_v31  ;;  %vm535_vm8 = vcmp.eq.f32.partialorder %v5265_v5, 0.0  ;;  %v1676_v32 = vsel %vm5360_vm3, %v1673_v25, %v1670_v33  ;;  %v2636_v48 = vsel %vm5370_vm4, %v2633_v23, %v2630_v40  ;;  %3993 = vrcp.f32 %v1166_v15  ;;  %v3990_v51 = vpop.eup %3989 }
  0xc1   :  { %v2646_v45 = vadd.f32 1.0, %v5388_v41  ;;  %v3468_v53 = vsub.f32 %v1676_v32, %v2636_v48  ;;  %v2615_v54 = vmul.f32 %v2614_v35, %v5313_v21  ;;  %vm2617_vm9 = vcmp.lt.f32.partialorder %v2616_v36, 0.0004427343 }
  0xc2   :  { %v1677_v0 = vadd.f32 1.0, %v5396_v47  ;;  %v2612_v56 = vmul.f32 0.6931472, %v3990_v51  ;;  %v1689_v59 = vmul.f32 -0.5, %v5364_v28  ;;  %v541_v60 = vsel %vm540_vm2, %v5241_v52, %v539_v22 }
  0xc3   :  { %3995 = vlog2.f32 %v2646_v45  ;;  %v3564_v55 = vmul.f32 0.5, %v3468_v53  ;;  %v1658_v61 = vsel %vm5376_vm6, %v1655_v57, %v1652_v44  ;;  %v532_v62 = vmul.f32 %v5332_v58, %v5265_v5  ;;  %v4718_v58 = vld [vmem:[%s9156_s0 + $0x8] sm:$0xff] }
  0xc4   :  { %3997 = vrcp.f32 %v1165_v29  ;;  %v2618_v21 = vsel %vm2617_vm9, %v2615_v54, %v2612_v56  ;;  %v2649_v63 = vmul.f32 -0.5, %v5388_v41  ;;  %v5416_v1 = vsub.f32 0.0, %v5396_v47 }
  0xc5   :  { %3999 = vlog2.f32 %v1677_v0  ;;  %v3660_v2 = vmul.f32 %v3564_v55, %v1264_v43  ;;  %v3466_v4 = vsub.f32 %v1658_v61, %v2618_v21  ;;  %v1692_v49 = vand.u32 2147483647, %v5364_v28 }
  0xc6   :  { %v544_v6 = vsel %vm542_vm5, %v543_v13, %v541_v60  ;;  %v1260_v7 = vmul.f32 %v4718_v58, %v3988_v39  ;;  %v1690_v8 = vadd.f32 1.0, %v1689_v59  ;;  %v1680_v10 = vmul.f32 -0.5, %v5396_v47 }
  0xc7   :  { %v2637_v11 = vadd.f32 1.0, %v5416_v1  ;;  %3756 = vst.msk [vmem:[%s9157_s1 + $0x18] sm:$0xff] %vm200_vm0, %v3660_v2  ;;  %v3562_v12 = vmul.f32 0.5, %v3466_v4  ;;  %v2652_v14 = vand.u32 2147483647, %v5388_v41  ;;  %v534_v13 = vsel %vm533_vm7, %v5265_v5, %v532_v62 }
  0xc8   :  { %v1168_v52 = vmax.f32 %v544_v6, 1e-15  ;;  %v2650_v15 = vadd.f32 1.0, %v2649_v63  ;;  %v1683_v16 = vand.u32 2147483647, %v5396_v47  ;;  %v537_v50 = vsel %vm535_vm8, %v536_v17, %v534_v13 }
  0xc9   :  { %4001 = vlog2.f32 %v2637_v11  ;;  %v3992_v27 = vpop.eup %3991  ;;  %v3658_v46 = vmul.f32 %v3562_v12, %v1260_v7  ;;  %vm5443_vm10 = vcmp.lt.f32.partialorder %v1692_v49, 0.0004427343  ;;  %v553_v24 = vmul.f32 %v5338_v3, %v5269_v9 }
  0xca   :  { %vm554_vm11 = vcmp.eq.f32.partialorder %v5269_v9, inf  ;;  %v3994_v25 = vpop.eup %3993  ;;  %v1681_v26 = vadd.f32 1.0, %v1680_v10  ;;  %v2640_v29 = vmul.f32 -0.5, %v5416_v1  ;;  %v5451_v30 = vclamps-f32 %v1168_v52, 0.9999999 }
  0xcb   :  { %v1167_v5 = vmax.f32 %v537_v50, 1e-15  ;;  %vm556_vm12 = vcmp.eq.f32.partialorder %v5269_v9, 0.0  ;;  %3754 = vst.msk [vmem:[%s9157_s1 + $0x8] sm:$0xff] %vm200_vm0, %v3658_v46  ;;  %v1688_v17 = vmul.f32 0.6931472, %v3992_v27  ;;  %v1691_v31 = vmul.f32 %v5364_v28, %v1690_v8 }
  0xcc   :  { %vm5459_vm13 = vcmp.lt.f32.partialorder %v2652_v14, 0.0004427343  ;;  %4003 = vrsqrt.f32 %v5441_v19  ;;  %v2651_v38 = vmul.f32 %v2650_v15, %v5388_v41  ;;  %vm5465_vm14 = vcmp.lt.f32.partialorder %v1683_v16, 0.0004427343  ;;  %v4719_v28 = vld [vmem:[%s9156_s0 + $0x28] sm:$0xff] }
  0xcd   :  { %v3996_v33 = vpop.eup %3995  ;;  %v2643_v18 = vand.u32 2147483647, %v5416_v1  ;;  %v1704_v34 = vadd.f32 1.0, %v5451_v30  ;;  %v1268_v36 = vmul.f32 %v4719_v28, %v3994_v25  ;;  %v5475_v39 = vsub.f32 0.0, %v5451_v30 }
  0xce   :  { %v3998_v35 = vpop.eup %3997  ;;  %v2648_v37 = vmul.f32 0.6931472, %v3996_v33  ;;  %v5477_v40 = vclamps-f32 %v1167_v5, 0.9999999  ;;  %v1682_v41 = vmul.f32 %v5396_v47, %v1681_v26  ;;  %v2641_v22 = vadd.f32 1.0, %v2640_v29  ;;  %v4720_v47 = vld [vmem:[%s9156_s0 + $0x20] sm:$0xff] }
  0xcf   :  { %v4000_v23 = vpop.eup %3999  ;;  %4005 = vlog2.f32 %v1704_v34  ;;  %v555_v42 = vsel %vm554_vm11, %v5269_v9, %v553_v24  ;;  %v1694_v43 = vsel %vm5443_vm10, %v1691_v31, %v1688_v17  ;;  %v2664_v32 = vadd.f32 1.0, %v5475_v39 }
  0xd0   :  { %v2654_v44 = vsel %vm5459_vm13, %v2651_v38, %v2648_v37  ;;  %4007 = vrcp.f32 %v1168_v52  ;;  %v1266_v45 = vmul.f32 %v4720_v47, %v3998_v35  ;;  %v1695_v51 = vadd.f32 1.0, %v5477_v40  ;;  %v4721_v37 = vld [vmem:[%s9156_s0 + $0x38] sm:$0xff] }
  0xd1   :  { %v3470_v48 = vsub.f32 %v1694_v43, %v2654_v44  ;;  %4009 = vrcp.f32 %v1167_v5  ;;  %v1679_v53 = vmul.f32 0.6931472, %v4000_v23  ;;  %vm5492_vm15 = vcmp.lt.f32.partialorder %v2643_v18, 0.0004427343 }
  0xd2   :  { %4011 = vlog2.f32 %v2664_v32  ;;  %v557_v0 = vand.u32 2147483648, %v5269_v9  ;;  %v2642_v60 = vmul.f32 %v2641_v22, %v5416_v1  ;;  %v5499_v55 = vsub.f32 0.0, %v5477_v40  ;;  %v5510_v1 = vpop.xlane.xlu1 %235  ;;  %v5572_v32 = vpop.xlane.xlu0 %232 }
  0xd3   :  { %v4002_v56 = vpop.eup %4001  ;;  %v3566_v59 = vmul.f32 0.5, %v3470_v48  ;;  %4013 = vlog2.f32 %v1695_v51  ;;  %v1707_v62 = vmul.f32 -0.5, %v5451_v30  ;;  %v1710_v21 = vand.u32 2147483647, %v5451_v30  ;;  %v4722_v48 = vld [vmem:[%s9156_s0 + $0x30] sm:$0xff] }
  0xd4   :  { %v2639_v61 = vmul.f32 0.6931472, %v4002_v56  ;;  %v5505_v63 = vsel %vm556_vm12, %v557_v0, %v555_v42  ;;  %v2667_v4 = vmul.f32 -0.5, %v5475_v39  ;;  %v2655_v49 = vadd.f32 1.0, %v5499_v55 }
  0xd5   :  { %v3662_v2 = vmul.f32 %v3566_v59, %v1268_v36  ;;  %vm547_vm1 = vcmp.eq.f32.partialorder %v5441_v19, inf  ;;  %v1685_v58 = vsel %vm5465_vm14, %v1682_v41, %v1679_v53  ;;  %v1698_v9 = vmul.f32 -0.5, %v5477_v40 }
  0xd6   :  { %v4004_v6 = vpop.eup %4003  ;;  %v2645_v7 = vsel %vm5492_vm15, %v2642_v60, %v2639_v61  ;;  %vm549_vm2 = vcmp.eq.f32.partialorder %v5441_v19, 0.0  ;;  %4015 = vlog2.f32 %v2655_v49  ;;  %v1170_v10 = vmax.f32 %v5505_v63, 1e-15 }
  0xd7   :  { %3758 = vst.msk [vmem:[%s9157_s1 + $0x28] sm:$0xff] %vm200_vm0, %v3662_v2  ;;  %v3469_v8 = vsub.f32 %v1685_v58, %v2645_v7  ;;  %v546_v11 = vmul.f32 %v4004_v6, %v5441_v19  ;;  %v1708_v12 = vadd.f32 1.0, %v1707_v62  ;;  %vm5524_vm3 = vcmp.lt.f32.partialorder %v1710_v21, 0.0004427343 }
  0xd8   :  { %v2670_v52 = vand.u32 2147483647, %v5475_v39  ;;  %4017 = vrsqrt.f32 %v5510_v1  ;;  %v2668_v16 = vadd.f32 1.0, %v2667_v4  ;;  %v2658_v50 = vmul.f32 -0.5, %v5499_v55 }
  0xd9   :  { %v4006_v13 = vpop.eup %4005  ;;  %v3565_v15 = vmul.f32 0.5, %v3469_v8  ;;  %v5531_v27 = vclamps-f32 %v1170_v10, 0.9999999  ;;  %v1699_v20 = vadd.f32 1.0, %v1698_v9  ;;  %v1701_v24 = vand.u32 2147483647, %v5477_v40 }
  0xda   :  { %v4008_v46 = vpop.eup %4007  ;;  %v548_v25 = vsel %vm547_vm1, %v5441_v19, %v546_v11  ;;  %v550_v26 = vand.u32 2147483648, %v5441_v19  ;;  %v1706_v17 = vmul.f32 0.6931472, %v4006_v13  ;;  %v2661_v31 = vand.u32 2147483647, %v5499_v55  ;;  %v5602_v11 = vpop.xlane.xlu1 %241 }
  0xdb   :  { %v4010_v29 = vpop.eup %4009  ;;  %v3661_v5 = vmul.f32 %v3565_v15, %v1266_v45  ;;  %v1722_v3 = vadd.f32 1.0, %v5531_v27  ;;  %v1709_v38 = vmul.f32 %v5451_v30, %v1708_v12  ;;  %vm5541_vm4 = vcmp.lt.f32.partialorder %v2670_v52, 0.0004427343 }
  0xdc   :  { %v4012_v33 = vpop.eup %4011  ;;  %v5546_v18 = vsub.f32 0.0, %v5531_v27  ;;  %v551_v34 = vsel %vm549_vm2, %v550_v26, %v548_v25  ;;  %v2669_v36 = vmul.f32 %v2668_v16, %v5475_v39  ;;  %v2659_v30 = vadd.f32 1.0, %v2658_v50 }
  0xdd   :  { %v4014_v35 = vpop.eup %4013  ;;  %3757 = vst.msk [vmem:[%s9157_s1 + $0x20] sm:$0xff] %vm200_vm0, %v3661_v5  ;;  %v2666_v28 = vmul.f32 0.6931472, %v4012_v33  ;;  %4019 = vlog2.f32 %v1722_v3  ;;  %v1272_v23 = vmul.f32 %v4721_v37, %v4008_v46  ;;  %v1700_v41 = vmul.f32 %v5477_v40, %v1699_v20 }
  0xde   :  { %vm5559_vm5 = vcmp.lt.f32.partialorder %v1701_v24, 0.0004427343  ;;  %v2682_v22 = vadd.f32 1.0, %v5546_v18  ;;  %v1712_v42 = vsel %vm5524_vm3, %v1709_v38, %v1706_v17  ;;  %vm5568_vm6 = vcmp.lt.f32.partialorder %v2661_v31, 0.0004427343  ;;  %v5608_v24 = vpop.xlane.xlu0 %238 }
  0xdf   :  { %v2672_v39 = vsel %vm5541_vm4, %v2669_v36, %v2666_v28  ;;  %v1169_v44 = vmax.f32 %v551_v34, 1e-15  ;;  %v1270_v47 = vmul.f32 %v4722_v48, %v4010_v29  ;;  %v1697_v45 = vmul.f32 0.6931472, %v4014_v35 }
  0xe0   :  { %v3472_v40 = vsub.f32 %v1712_v42, %v2672_v39  ;;  %4021 = vlog2.f32 %v2682_v22  ;;  %v4016_v51 = vpop.eup %4015  ;;  %v2660_v53 = vmul.f32 %v2659_v30, %v5499_v55  ;;  %v1725_v54 = vmul.f32 -0.5, %v5531_v27 }
  0xe1   :  { %4023 = vrcp.f32 %v1170_v10  ;;  %v5579_v0 = vclamps-f32 %v1169_v44, 0.9999999  ;;  %v2657_v60 = vmul.f32 0.6931472, %v4016_v51  ;;  %v2685_v61 = vmul.f32 -0.5, %v5546_v18 }
  0xe2   :  { %v4018_v56 = vpop.eup %4017  ;;  %v3568_v59 = vmul.f32 0.5, %v3472_v40  ;;  %4025 = vrsqrt.f32 %v5572_v32  ;;  %v1728_v62 = vand.u32 2147483647, %v5531_v27  ;;  %vm568_vm7 = vcmp.eq.f32.partialorder %v5510_v1, inf }
  0xe3   :  { %v1713_v21 = vadd.f32 1.0, %v5579_v0  ;;  %v5586_v63 = vsub.f32 0.0, %v5579_v0  ;;  %v1703_v2 = vsel %vm5559_vm5, %v1700_v41, %v1697_v45  ;;  %v2663_v4 = vsel %vm5568_vm6, %v2660_v53, %v2657_v60 }
  0xe4   :  { %v3664_v55 = vmul.f32 %v3568_v59, %v1272_v23  ;;  %v567_v49 = vmul.f32 %v4018_v56, %v5510_v1  ;;  %v3471_v6 = vsub.f32 %v1703_v2, %v2663_v4  ;;  %vm570_vm8 = vcmp.eq.f32.partialorder %v5510_v1, 0.0 }
  0xe5   :  { %4027 = vlog2.f32 %v1713_v21  ;;  %v571_v58 = vand.u32 2147483648, %v5510_v1  ;;  %v1726_v7 = vadd.f32 1.0, %v1725_v54  ;;  %v2686_v9 = vadd.f32 1.0, %v2685_v61  ;;  %v5658_v61 = vpop.xlane.xlu1 %247 }
  0xe6   :  { %3760 = vst.msk [vmem:[%s9157_s1 + $0x38] sm:$0xff] %vm200_vm0, %v3664_v55  ;;  %v2673_v8 = vadd.f32 1.0, %v5586_v63  ;;  %v569_v10 = vsel %vm568_vm7, %v5510_v1, %v567_v49  ;;  %v3567_v14 = vmul.f32 0.5, %v3471_v6  ;;  %4029 = vrcp.f32 %v1169_v44  ;;  %v5675_v49 = vpop.xlane.xlu0 %244 }
  0xe7   :  { %v4020_v12 = vpop.eup %4019  ;;  %v1716_v52 = vmul.f32 -0.5, %v5579_v0  ;;  %v572_v13 = vsel %vm570_vm8, %v571_v58, %v569_v10  ;;  %v2688_v15 = vand.u32 2147483647, %v5546_v18  ;;  %v2676_v16 = vmul.f32 -0.5, %v5586_v63 }
  0xe8   :  { %4031 = vlog2.f32 %v2673_v8  ;;  %v3663_v50 = vmul.f32 %v3567_v14, %v1270_v47  ;;  %v1724_v46 = vmul.f32 0.6931472, %v4020_v12  ;;  %v1172_v20 = vmax.f32 %v572_v13, 1e-15 }
  0xe9   :  { %4033 = vrsqrt.f32 %v5602_v11  ;;  %v1727_v25 = vmul.f32 %v5531_v27, %v1726_v7  ;;  %vm5611_vm9 = vcmp.lt.f32.partialorder %v1728_v62, 0.0004427343  ;;  %v1719_v29 = vand.u32 2147483647, %v5579_v0  ;;  %v4724_v62 = vld [vmem:[%s9156_s0 + $0x40] sm:$0xff] }
  0xea   :  { %v4022_v1 = vpop.eup %4021  ;;  %3759 = vst.msk [vmem:[%s9157_s1 + $0x30] sm:$0xff] %vm200_vm0, %v3663_v50  ;;  %v2687_v31 = vmul.f32 %v2686_v9, %v5546_v18  ;;  %v1717_v3 = vadd.f32 1.0, %v1716_v52  ;;  %v5621_v33 = vclamps-f32 %v1172_v20, 0.9999999  ;;  %vm2689_vm10 = vcmp.lt.f32.partialorder %v2688_v15, 0.0004427343 }
  0xeb   :  { %v4024_v5 = vpop.eup %4023  ;;  %v2684_v17 = vmul.f32 0.6931472, %v4022_v1  ;;  %v2679_v27 = vand.u32 2147483647, %v5586_v63  ;;  %vm561_vm11 = vcmp.eq.f32.partialorder %v5572_v32, inf  ;;  %4035 = vrsqrt.f32 %v5608_v24  ;;  %v4723_v18 = vld [vmem:[%s9156_s0 + $0x48] sm:$0xff] }
  0xec   :  { %v4026_v38 = vpop.eup %4025  ;;  %v1730_v57 = vsel %vm5611_vm9, %v1727_v25, %v1724_v46  ;;  %v2677_v35 = vadd.f32 1.0, %v2676_v16  ;;  %v1740_v28 = vadd.f32 1.0, %v5621_v33  ;;  %v1276_v36 = vmul.f32 %v4723_v18, %v4024_v5 }
  0xed   :  { %v2690_v34 = vsel %vm2689_vm10, %v2687_v31, %v2684_v17  ;;  %v5633_v37 = vsub.f32 0.0, %v5621_v33  ;;  %v560_v23 = vmul.f32 %v4026_v38, %v5572_v32  ;;  %v1718_v19 = vmul.f32 %v5579_v0, %v1717_v3 }
  0xee   :  { %v3474_v30 = vsub.f32 %v1730_v57, %v2690_v34  ;;  %vm5637_vm12 = vcmp.lt.f32.partialorder %v1719_v29, 0.0004427343  ;;  %4037 = vlog2.f32 %v1740_v28  ;;  %vm563_vm13 = vcmp.eq.f32.partialorder %v5572_v32, 0.0 }
  0xef   :  { %v4028_v41 = vpop.eup %4027  ;;  %vm5642_vm14 = vcmp.lt.f32.partialorder %v2679_v27, 0.0004427343  ;;  %v2700_v43 = vadd.f32 1.0, %v5633_v37  ;;  %v564_v44 = vand.u32 2147483648, %v5572_v32  ;;  %v2678_v47 = vmul.f32 %v2677_v35, %v5586_v63 }
  0xf0   :  { %v3570_v42 = vmul.f32 0.5, %v3474_v30  ;;  %v4030_v40 = vpop.eup %4029  ;;  %v1715_v48 = vmul.f32 0.6931472, %v4028_v41  ;;  %4039 = vrcp.f32 %v1172_v20  ;;  %v562_v45 = vsel %vm561_vm11, %v5572_v32, %v560_v23 }
  0xf1   :  { %4041 = vlog2.f32 %v2700_v43  ;;  %vm582_vm15 = vcmp.eq.f32.partialorder %v5602_v11, inf  ;;  %vm584_vm1 = vcmp.eq.f32.partialorder %v5602_v11, 0.0  ;;  %v1743_v56 = vmul.f32 -0.5, %v5621_v33 }
  0xf2   :  { %v4032_v51 = vpop.eup %4031  ;;  %v3666_v53 = vmul.f32 %v3570_v42, %v1276_v36  ;;  %v565_v59 = vsel %vm563_vm13, %v564_v44, %v562_v45  ;;  %v585_v60 = vand.u32 2147483648, %v5602_v11  ;;  %v1274_v21 = vmul.f32 %v4724_v62, %v4030_v40 }
  0xf3   :  { %v4034_v54 = vpop.eup %4033  ;;  %v2675_v0 = vmul.f32 0.6931472, %v4032_v51  ;;  %v2703_v63 = vmul.f32 -0.5, %v5633_v37  ;;  %v1171_v55 = vmax.f32 %v565_v59, 1e-15  ;;  %v1721_v2 = vsel %vm5637_vm12, %v1718_v19, %v1715_v48 }
  0xf4   :  { %3762 = vst.msk [vmem:[%s9157_s1 + $0x48] sm:$0xff] %vm200_vm0, %v3666_v53  ;;  %v581_v32 = vmul.f32 %v4034_v54, %v5602_v11  ;;  %vm575_vm2 = vcmp.eq.f32.partialorder %v5608_v24, inf  ;;  %vm577_vm3 = vcmp.eq.f32.partialorder %v5608_v24, 0.0  ;;  %v1746_v7 = vand.u32 2147483647, %v5621_v33 }
  0xf5   :  { %v2681_v4 = vsel %vm5642_vm14, %v2678_v47, %v2675_v0  ;;  %v4036_v6 = vpop.eup %4035  ;;  %v5678_v9 = vclamps-f32 %v1171_v55, 0.9999999  ;;  %4043 = vrsqrt.f32 %v5658_v61  ;;  %v1744_v8 = vadd.f32 1.0, %v1743_v56 }
  0xf6   :  { %v3473_v58 = vsub.f32 %v1721_v2, %v2681_v4  ;;  %v2706_v10 = vand.u32 2147483647, %v5633_v37  ;;  %v583_v12 = vsel %vm582_vm15, %v5602_v11, %v581_v32  ;;  %v574_v14 = vmul.f32 %v4036_v6, %v5608_v24 }
  0xf7   :  { %v2704_v13 = vadd.f32 1.0, %v2703_v63  ;;  %v1731_v15 = vadd.f32 1.0, %v5678_v9  ;;  %4045 = vrsqrt.f32 %v5675_v49  ;;  %v2515_v50 = vsub.f32 0.0, %v5678_v9 }
  0xf8   :  { %v3569_v52 = vmul.f32 0.5, %v3473_v58  ;;  %v4038_v16 = vpop.eup %4037  ;;  %4047 = vrcp.f32 %v1171_v55  ;;  %v586_v46 = vsel %vm584_vm1, %v585_v60, %v583_v12  ;;  %v576_v20 = vsel %vm575_vm2, %v5608_v24, %v574_v14  ;;  %v4726_v58 = vld [vmem:[%s9156_s0 + $0x50] sm:$0xff] }
  0xf9   :  { %vm5694_vm4 = vcmp.lt.f32.partialorder %v1746_v7, 0.0004427343  ;;  %4049 = vlog2.f32 %v1731_v15  ;;  %v578_v26 = vand.u32 2147483648, %v5608_v24  ;;  %v1742_v5 = vmul.f32 0.6931472, %v4038_v16 }
  0xfa   :  { %v3665_v1 = vmul.f32 %v3569_v52, %v1274_v21  ;;  %v4040_v29 = vpop.eup %4039  ;;  %v1745_v17 = vmul.f32 %v5621_v33, %v1744_v8  ;;  %vm5700_vm5 = vcmp.lt.f32.partialorder %v2706_v10, 0.0004427343  ;;  %v2691_v11 = vadd.f32 1.0, %v2515_v50  ;;  %v5712_v33 = vpop.xlane.xlu1 %253 }
  0xfb   :  { %v4042_v3 = vpop.eup %4041  ;;  %v2705_v38 = vmul.f32 %v2704_v13, %v5633_v37  ;;  %v1734_v27 = vmul.f32 -0.5, %v5678_v9  ;;  %v1174_v57 = vmax.f32 %v586_v46, 1e-15  ;;  %v579_v34 = vsel %vm577_vm3, %v578_v26, %v576_v20  ;;  %v4725_v37 = vld [vmem:[%s9156_s0 + $0x58] sm:$0xff] }
  0xfc   :  { %3761 = vst.msk [vmem:[%s9157_s1 + $0x40] sm:$0xff] %vm200_vm0, %v3665_v1  ;;  %v2702_v35 = vmul.f32 0.6931472, %v4042_v3  ;;  %4051 = vlog2.f32 %v2691_v11  ;;  %v2694_v28 = vmul.f32 -0.5, %v2515_v50  ;;  %v599_v18 = vand.u32 2147483648, %v5658_v61 }
  0xfd   :  { %v1737_v36 = vand.u32 2147483647, %v5678_v9  ;;  %v5716_v30 = vclamps-f32 %v1174_v57, 0.9999999  ;;  %v1173_v23 = vmax.f32 %v579_v34, 1e-15  ;;  %v1280_v24 = vmul.f32 %v4725_v37, %v4040_v29 }
  0xfe   :  { %vm596_vm6 = vcmp.eq.f32.partialorder %v5658_v61, inf  ;;  %v1748_v41 = vsel %vm5694_vm4, %v1745_v17, %v1742_v5  ;;  %v2708_v19 = vsel %vm5700_vm5, %v2705_v38, %v2702_v35  ;;  %4053 = vrsqrt.f32 %v5712_v33 }
  0xff   :  { %v4044_v22 = vpop.eup %4043  ;;  %v3476_v42 = vsub.f32 %v1748_v41, %v2708_v19  ;;  %v1735_v39 = vadd.f32 1.0, %v1734_v27  ;;  %v2697_v43 = vand.u32 2147483647, %v2515_v50  ;;  %v1758_v44 = vadd.f32 1.0, %v5716_v30 }
 0x100   :  { %vm598_vm7 = vcmp.eq.f32.partialorder %v5658_v61, 0.0  ;;  %vm589_vm8 = vcmp.eq.f32.partialorder %v5675_v49, inf  ;;  %v2695_v40 = vadd.f32 1.0, %v2694_v28  ;;  %4055 = vrcp.f32 %v1174_v57 }
 0x101   :  { %v5731_v48 = vsub.f32 0.0, %v5716_v30  ;;  %v5733_v47 = vclamps-f32 %v1173_v23, 0.9999999  ;;  %v4046_v45 = vpop.eup %4045  ;;  %v3572_v51 = vmul.f32 0.5, %v3476_v42  ;;  %vm5735_vm9 = vcmp.lt.f32.partialorder %v1737_v36, 0.0004427343 }
 0x102   :  { %4057 = vlog2.f32 %v1758_v44  ;;  %vm591_vm10 = vcmp.eq.f32.partialorder %v5675_v49, 0.0  ;;  %v592_v54 = vand.u32 2147483648, %v5675_v49  ;;  %v4048_v0 = vpop.eup %4047  ;;  %v1761_v56 = vmul.f32 -0.5, %v5716_v30 }
 0x103   :  { %v2718_v59 = vadd.f32 1.0, %v5731_v48  ;;  %v1749_v60 = vadd.f32 1.0, %v5733_v47  ;;  %v595_v62 = vmul.f32 %v4044_v22, %v5658_v61  ;;  %v4050_v21 = vpop.eup %4049  ;;  %v3668_v63 = vmul.f32 %v3572_v51, %v1280_v24 }
 0x104   :  { %v1736_v55 = vmul.f32 %v5678_v9, %v1735_v39  ;;  %vm5746_vm11 = vcmp.lt.f32.partialorder %v2697_v43, 0.0004427343  ;;  %4059 = vrcp.f32 %v1173_v23  ;;  %v2696_v2 = vmul.f32 %v2695_v40, %v2515_v50 }
 0x105   :  { %v1764_v4 = vand.u32 2147483647, %v5716_v30  ;;  %4061 = vlog2.f32 %v2718_v59  ;;  %v613_v6 = vand.u32 2147483648, %v5712_v33  ;;  %3764 = vst.msk [vmem:[%s9157_s1 + $0x58] sm:$0xff] %vm200_vm0, %v3668_v63  ;;  %v1278_v7 = vmul.f32 %v4726_v58, %v4048_v0 }
 0x106   :  { %v1733_v9 = vmul.f32 0.6931472, %v4050_v21  ;;  %4063 = vlog2.f32 %v1749_v60  ;;  %v2517_v8 = vsub.f32 0.0, %v5733_v47  ;;  %v4052_v10 = vpop.eup %4051  ;;  %v1762_v12 = vadd.f32 1.0, %v1761_v56 }
 0x107   :  { %v2721_v14 = vmul.f32 -0.5, %v5731_v48  ;;  %v597_v52 = vsel %vm596_vm6, %v5658_v61, %v595_v62  ;;  %v588_v13 = vmul.f32 %v4046_v45, %v5675_v49  ;;  %v2693_v15 = vmul.f32 0.6931472, %v4052_v10 }
 0x108   :  { %v2724_v16 = vand.u32 2147483647, %v5731_v48  ;;  %v1752_v50 = vmul.f32 -0.5, %v5733_v47  ;;  %v2709_v46 = vadd.f32 1.0, %v2517_v8  ;;  %v4054_v20 = vpop.eup %4053  ;;  %v1755_v1 = vand.u32 2147483647, %v5733_v47 }
 0x109   :  { %v2712_v25 = vmul.f32 -0.5, %v2517_v8  ;;  %v600_v26 = vsel %vm598_vm7, %v599_v18, %v597_v52  ;;  %v590_v29 = vsel %vm589_vm8, %v5675_v49, %v588_v13  ;;  %v1739_v5 = vsel %vm5735_vm9, %v1736_v55, %v1733_v9 }
 0x10a   :  { %v2699_v17 = vsel %vm5746_vm11, %v2696_v2, %v2693_v15  ;;  %4065 = vlog2.f32 %v2709_v46  ;;  %v1176_v31 = vmax.f32 %v600_v26, 1e-15  ;;  %vm610_vm12 = vcmp.eq.f32.partialorder %v5712_v33, inf  ;;  %v4056_v11 = vpop.eup %4055  ;;  %v5826_v2 = vpop.xlane.xlu0 %250 }
 0x10b   :  { %v3475_v3 = vsub.f32 %v1739_v5, %v2699_v17  ;;  %v1763_v38 = vmul.f32 %v5716_v30, %v1762_v12  ;;  %vm5779_vm13 = vcmp.lt.f32.partialorder %v1764_v4, 0.0004427343  ;;  %v593_v27 = vsel %vm591_vm10, %v592_v54, %v590_v29  ;;  %v4727_v54 = vld [vmem:[%s9156_s0 + $0x68] sm:$0xff]  ;;  %v5850_v29 = vpop.xlane.xlu1 %259  ;;  %v4728_v17 = vld [vmem:[%s9156_s0 + $0x60] sm:$0xff] }
 0x10c   :  { %v4058_v57 = vpop.eup %4057  ;;  %v2722_v34 = vadd.f32 1.0, %v2721_v14  ;;  %vm5785_vm14 = vcmp.lt.f32.partialorder %v2724_v16, 0.0004427343  ;;  %v1753_v28 = vadd.f32 1.0, %v1752_v50  ;;  %v5789_v18 = vclamps-f32 %v1176_v31, 0.9999999 }
 0x10d   :  { %v3571_v36 = vmul.f32 0.5, %v3475_v3  ;;  %v2713_v23 = vadd.f32 1.0, %v2712_v25  ;;  %v2715_v37 = vand.u32 2147483647, %v2517_v8  ;;  %v1175_v30 = vmax.f32 %v593_v27, 1e-15 }
 0x10e   :  { %vm612_vm15 = vcmp.eq.f32.partialorder %v5712_v33, 0.0  ;;  %v4060_v24 = vpop.eup %4059  ;;  %v1760_v41 = vmul.f32 0.6931472, %v4058_v57  ;;  %vm5792_vm1 = vcmp.lt.f32.partialorder %v1755_v1, 0.0004427343  ;;  %v1776_v19 = vadd.f32 1.0, %v5789_v18 }
 0x10f   :  { %v5798_v22 = vsub.f32 0.0, %v5789_v18  ;;  %v4062_v42 = vpop.eup %4061  ;;  %v3667_v39 = vmul.f32 %v3571_v36, %v1278_v7  ;;  %4067 = vrcp.f32 %v1176_v31  ;;  %v5800_v43 = vclamps-f32 %v1175_v30, 0.9999999 }
 0x110   :  { %v609_v44 = vmul.f32 %v4054_v20, %v5712_v33  ;;  %v4064_v40 = vpop.eup %4063  ;;  %v2720_v45 = vmul.f32 0.6931472, %v4062_v42  ;;  %v2723_v51 = vmul.f32 %v2722_v34, %v5731_v48  ;;  %v1754_v53 = vmul.f32 %v5733_v47, %v1753_v28  ;;  %v5867_v34 = vpop.xlane.xlu0 %256 }
 0x111   :  { %4069 = vlog2.f32 %v1776_v19  ;;  %3763 = vst.msk [vmem:[%s9157_s1 + $0x50] sm:$0xff] %vm200_vm0, %v3667_v39  ;;  %v1284_v0 = vmul.f32 %v4727_v54, %v4056_v11  ;;  %v2714_v56 = vmul.f32 %v2713_v23, %v2517_v8  ;;  %vm5812_vm2 = vcmp.lt.f32.partialorder %v2715_v37, 0.0004427343 }
 0x112   :  { %v2736_v48 = vadd.f32 1.0, %v5798_v22  ;;  %v1766_v47 = vsel %vm5779_vm13, %v1763_v38, %v1760_v41  ;;  %v2726_v60 = vsel %vm5785_vm14, %v2723_v51, %v2720_v45  ;;  %v1779_v62 = vmul.f32 -0.5, %v5789_v18 }
 0x113   :  { %v1767_v21 = vadd.f32 1.0, %v5800_v43  ;;  %v3478_v63 = vsub.f32 %v1766_v47, %v2726_v60  ;;  %v1751_v55 = vmul.f32 0.6931472, %v4064_v40  ;;  %v611_v32 = vsel %vm610_vm12, %v5712_v33, %v609_v44 }
 0x114   :  { %4071 = vlog2.f32 %v2736_v48  ;;  %v4066_v4 = vpop.eup %4065  ;;  %v1782_v58 = vand.u32 2147483647, %v5789_v18  ;;  %v2739_v7 = vmul.f32 -0.5, %v5798_v22  ;;  %v1770_v9 = vmul.f32 -0.5, %v5800_v43  ;;  %v99_v48 = vld [vmem:[%s9156_s0 + $0x2d8] sm:$0xff]  ;;  %v5945_v61 = vpop.xlane.xlu0 %262 }
 0x115   :  { %4073 = vrcp.f32 %v1175_v30  ;;  %v3574_v8 = vmul.f32 0.5, %v3478_v63  ;;  %v2711_v10 = vmul.f32 0.6931472, %v4066_v4  ;;  %v5832_v12 = vsub.f32 0.0, %v5800_v43  ;;  %v5912_v63 = vpop.xlane.xlu1 %265 }
 0x116   :  { %4075 = vlog2.f32 %v1767_v21  ;;  %v1780_v14 = vadd.f32 1.0, %v1779_v62  ;;  %v2742_v52 = vand.u32 2147483647, %v5798_v22  ;;  %v614_v13 = vsel %vm612_vm15, %v613_v6, %v611_v32  ;;  %v98_v21 = vld [vmem:[%s9156_s0 + $0x2d0] sm:$0xff] }
 0x117   :  { %4077 = vrsqrt.f32 %v5826_v2  ;;  %v3670_v15 = vmul.f32 %v3574_v8, %v1284_v0  ;;  %v1757_v16 = vsel %vm5792_vm1, %v1754_v53, %v1751_v55  ;;  %v2717_v50 = vsel %vm5812_vm2, %v2714_v56, %v2711_v10  ;;  %v4730_v0 = vld [vmem:[%s9156_s0 + $0x70] sm:$0xff] }
 0x118   :  { %v2727_v46 = vadd.f32 1.0, %v5832_v12  ;;  %v3477_v20 = vsub.f32 %v1757_v16, %v2717_v50  ;;  %v2740_v1 = vadd.f32 1.0, %v2739_v7  ;;  %v1178_v25 = vmax.f32 %v614_v13, 1e-15 }
 0x119   :  { %v4068_v26 = vpop.eup %4067  ;;  %3766 = vst.msk [vmem:[%s9157_s1 + $0x68] sm:$0xff] %vm200_vm0, %v3670_v15  ;;  %v1771_v33 = vadd.f32 1.0, %v1770_v9  ;;  %v1773_v6 = vand.u32 2147483647, %v5800_v43  ;;  %v1282_v31 = vmul.f32 %v4728_v17, %v4060_v24  ;;  %vm5855_vm3 = vcmp.lt.f32.partialorder %v1782_v58, 0.0004427343 }
 0x11a   :  { %4079 = vlog2.f32 %v2727_v46  ;;  %v3573_v11 = vmul.f32 0.5, %v3477_v20  ;;  %v1781_v38 = vmul.f32 %v5789_v18, %v1780_v14  ;;  %vm5860_vm4 = vcmp.lt.f32.partialorder %v2742_v52, 0.0004427343  ;;  %v4729_v18 = vld [vmem:[%s9156_s0 + $0x78] sm:$0xff] }
 0x11b   :  { %v4070_v5 = vpop.eup %4069  ;;  %v2730_v27 = vmul.f32 -0.5, %v5832_v12  ;;  %v5865_v57 = vclamps-f32 %v1178_v25, 0.9999999  ;;  %v2741_v36 = vmul.f32 %v2740_v1, %v5798_v22  ;;  %4081 = vrsqrt.f32 %v5850_v29 }
 0x11c   :  { %v3669_v35 = vmul.f32 %v3573_v11, %v1282_v31  ;;  %v1778_v28 = vmul.f32 0.6931472, %v4070_v5  ;;  %v1288_v37 = vmul.f32 %v4729_v18, %v4068_v26  ;;  %v1772_v30 = vmul.f32 %v5800_v43, %v1771_v33 }
 0x11d   :  { %vm5875_vm5 = vcmp.lt.f32.partialorder %v1773_v6, 0.0004427343  ;;  %v1794_v41 = vadd.f32 1.0, %v5865_v57  ;;  %v2733_v22 = vand.u32 2147483647, %v5832_v12  ;;  %v5886_v42 = vsub.f32 0.0, %v5865_v57 }
 0x11e   :  { %v4072_v23 = vpop.eup %4071  ;;  %3765 = vst.msk [vmem:[%s9157_s1 + $0x60] sm:$0xff] %vm200_vm0, %v3669_v35  ;;  %4083 = vrsqrt.f32 %v5867_v34  ;;  %v2731_v43 = vadd.f32 1.0, %v2730_v27  ;;  %vm603_vm6 = vcmp.eq.f32.partialorder %v5826_v2, inf  ;;  %vm605_vm7 = vcmp.eq.f32.partialorder %v5826_v2, 0.0 }
 0x11f   :  { %v4074_v49 = vpop.eup %4073  ;;  %v2738_v19 = vmul.f32 0.6931472, %v4072_v23  ;;  %4085 = vlog2.f32 %v1794_v41  ;;  %v1784_v40 = vsel %vm5855_vm3, %v1781_v38, %v1778_v28  ;;  %v2754_v51 = vadd.f32 1.0, %v5886_v42 }
 0x120   :  { %v4076_v39 = vpop.eup %4075  ;;  %v606_v53 = vand.u32 2147483648, %v5826_v2  ;;  %v1286_v56 = vmul.f32 %v4730_v0, %v4074_v49  ;;  %4087 = vrcp.f32 %v1178_v25  ;;  %vm5904_vm8 = vcmp.lt.f32.partialorder %v2733_v22, 0.0004427343 }
 0x121   :  { %v4078_v44 = vpop.eup %4077  ;;  %v2744_v45 = vsel %vm5860_vm4, %v2741_v36, %v2738_v19  ;;  %v1769_v47 = vmul.f32 0.6931472, %v4076_v39  ;;  %v1797_v62 = vmul.f32 -0.5, %v5865_v57  ;;  %4089 = vlog2.f32 %v2754_v51  ;;  %v4731_v51 = vld [vmem:[%s9156_s0 + $0x88] sm:$0xff] }
 0x122   :  { %v3480_v54 = vsub.f32 %v1784_v40, %v2744_v45  ;;  %v602_v59 = vmul.f32 %v4078_v44, %v5826_v2  ;;  %v2732_v4 = vmul.f32 %v2731_v43, %v5832_v12  ;;  %v1800_v58 = vand.u32 2147483647, %v5865_v57 }
 0x123   :  { %v2757_v8 = vmul.f32 -0.5, %v5886_v42  ;;  %v195_v14 = vmul.f32 %v99_v48, %v99_v48  ;;  %v194_v15 = vmul.f32 %v98_v21, %v98_v21  ;;  %4091 = vrsqrt.f32 %v5912_v63 }
 0x124   :  { %v4080_v55 = vpop.eup %4079  ;;  %v3576_v32 = vmul.f32 0.5, %v3480_v54  ;;  %v604_v7 = vsel %vm603_vm6, %v5826_v2, %v602_v59  ;;  %v1775_v12 = vsel %vm5875_vm5, %v1772_v30, %v1769_v47  ;;  %v1798_v46 = vadd.f32 1.0, %v1797_v62 }
 0x125   :  { %v2729_v9 = vmul.f32 0.6931472, %v4080_v55  ;;  %v607_v10 = vsel %vm605_vm7, %v606_v53, %v604_v7  ;;  %v4082_v16 = vpop.eup %4081  ;;  %v474_v20 = vsel %vm200_vm0, %v195_v14, 0.0  ;;  %vm624_vm9 = vcmp.eq.f32.partialorder %v5850_v29, inf }
 0x126   :  { %v3672_v52 = vmul.f32 %v3576_v32, %v1288_v37  ;;  %v1177_v13 = vmax.f32 %v607_v10, 1e-15  ;;  %v623_v25 = vmul.f32 %v4082_v16, %v5850_v29  ;;  %475 = vadd.xlane.f32.xlu1 %v474_v20  ;;  %v2758_v33 = vadd.f32 1.0, %v2757_v8  ;;  %v101_v16 = vld [vmem:[%s9156_s0 + $0x2e8] sm:$0xff] }
 0x127   :  { %v2735_v50 = vsel %vm5904_vm8, %v2732_v4, %v2729_v9  ;;  %vm626_vm10 = vcmp.eq.f32.partialorder %v5850_v29, 0.0  ;;  %v627_v6 = vand.u32 2147483648, %v5850_v29  ;;  %v471_v5 = vsel %vm200_vm0, %v194_v15, 0.0 }
 0x128   :  { %3768 = vst.msk [vmem:[%s9157_s1 + $0x78] sm:$0xff] %vm200_vm0, %v3672_v52  ;;  %v3479_v2 = vsub.f32 %v1775_v12, %v2735_v50  ;;  %v5932_v1 = vclamps-f32 %v1177_v13, 0.9999999  ;;  %v4084_v26 = vpop.eup %4083  ;;  %vm5939_vm11 = vcmp.lt.f32.partialorder %v1800_v58, 0.0004427343  ;;  %472 = vadd.xlane.f32.xlu0 %v471_v5  ;;  %v1799_v27 = vmul.f32 %v5865_v57, %v1798_v46 }
 0x129   :  { %v4086_v17 = vpop.eup %4085  ;;  %v2760_v3 = vand.u32 2147483647, %v5886_v42  ;;  %v625_v28 = vsel %vm624_vm9, %v5850_v29, %v623_v25  ;;  %v616_v36 = vmul.f32 %v4084_v26, %v5867_v34  ;;  %vm617_vm12 = vcmp.eq.f32.partialorder %v5867_v34, inf }
 0x12a   :  { %v3575_v31 = vmul.f32 0.5, %v3479_v2  ;;  %v1785_v38 = vadd.f32 1.0, %v5932_v1  ;;  %v5949_v35 = vsub.f32 0.0, %v5932_v1  ;;  %v4088_v23 = vpop.eup %4087  ;;  %v1796_v37 = vmul.f32 0.6931472, %v4086_v17 }
 0x12b   :  { %v4090_v30 = vpop.eup %4089  ;;  %v2759_v24 = vmul.f32 %v2758_v33, %v5886_v42  ;;  %v620_v41 = vand.u32 2147483648, %v5867_v34  ;;  %v1788_v19 = vmul.f32 -0.5, %v5932_v1  ;;  %v628_v22 = vsel %vm626_vm10, %v627_v6, %v625_v28 }
 0x12c   :  { %v3671_v18 = vmul.f32 %v3575_v31, %v1286_v56  ;;  %4093 = vlog2.f32 %v1785_v38  ;;  %v2745_v57 = vadd.f32 1.0, %v5949_v35  ;;  %v2756_v49 = vmul.f32 0.6931472, %v4090_v30 }
 0x12d   :  { %4095 = vrsqrt.f32 %v5945_v61  ;;  %v618_v39 = vsel %vm617_vm12, %v5867_v34, %v616_v36  ;;  %vm2761_vm13 = vcmp.lt.f32.partialorder %v2760_v3, 0.0004427343  ;;  %v1180_v42 = vmax.f32 %v628_v22, 1e-15  ;;  %v4092_v43 = vpop.eup %4091 }
 0x12e   :  { %3767 = vst.msk [vmem:[%s9157_s1 + $0x70] sm:$0xff] %vm200_vm0, %v3671_v18  ;;  %4097 = vlog2.f32 %v2745_v57  ;;  %vm619_vm14 = vcmp.eq.f32.partialorder %v5867_v34, 0.0  ;;  %v1802_v44 = vsel %vm5939_vm11, %v1799_v27, %v1796_v37  ;;  %v2762_v40 = vsel %vm2761_vm13, %v2759_v24, %v2756_v49  ;;  %v4732_v57 = vld [vmem:[%s9156_s0 + $0x80] sm:$0xff] }
 0x12f   :  { %v5971_v45 = vsel %vm619_vm14, %v620_v41, %v618_v39  ;;  %v1292_v29 = vmul.f32 %v4731_v51, %v4088_v23  ;;  %v3482_v53 = vsub.f32 %v1802_v44, %v2762_v40  ;;  %v2748_v54 = vmul.f32 -0.5, %v5949_v35  ;;  %v100_v44 = vld [vmem:[%s9156_s0 + $0x2e0] sm:$0xff] }
 0x130   :  { %v5977_v0 = vclamps-f32 %v1180_v42, 0.9999999  ;;  %4099 = vrcp.f32 %v1177_v13  ;;  %v1789_v56 = vadd.f32 1.0, %v1788_v19  ;;  %v1791_v34 = vand.u32 2147483647, %v5932_v1 }
 0x131   :  { %v1179_v59 = vmax.f32 %v5971_v45, 1e-15  ;;  %v3578_v48 = vmul.f32 0.5, %v3482_v53  ;;  %v2751_v47 = vand.u32 2147483647, %v5949_v35  ;;  %v637_v62 = vmul.f32 %v4092_v43, %v5912_v63 }
 0x132   :  { %v1812_v60 = vadd.f32 1.0, %v5977_v0  ;;  %v5985_v21 = vsub.f32 0.0, %v5977_v0  ;;  %vm638_vm15 = vcmp.eq.f32.partialorder %v5912_v63, inf  ;;  %v2749_v4 = vadd.f32 1.0, %v2748_v54 }
 0x133   :  { %v5987_v55 = vclamps-f32 %v1179_v59, 0.9999999  ;;  %v3674_v32 = vmul.f32 %v3578_v48, %v1292_v29  ;;  %vm640_vm1 = vcmp.eq.f32.partialorder %v5912_v63, 0.0  ;;  %v1790_v7 = vmul.f32 %v5932_v1, %v1789_v56 }
 0x134   :  { %4101 = vlog2.f32 %v1812_v60  ;;  %vm5992_vm2 = vcmp.lt.f32.partialorder %v1791_v34, 0.0004427343  ;;  %v2772_v8 = vadd.f32 1.0, %v5985_v21  ;;  %v641_v10 = vand.u32 2147483648, %v5912_v63 }
 0x135   :  { %3770 = vst.msk [vmem:[%s9157_s1 + $0x88] sm:$0xff] %vm200_vm0, %v3674_v32  ;;  %vm6002_vm3 = vcmp.lt.f32.partialorder %v2751_v47, 0.0004427343  ;;  %4103 = vrcp.f32 %v1180_v42  ;;  %v1803_v13 = vadd.f32 1.0, %v5987_v55  ;;  %v639_v15 = vsel %vm638_vm15, %v5912_v63, %v637_v62 }
 0x136   :  { %v4094_v58 = vpop.eup %4093  ;;  %4105 = vlog2.f32 %v2772_v8  ;;  %vm631_vm4 = vcmp.eq.f32.partialorder %v5945_v61, inf  ;;  %vm633_vm5 = vcmp.eq.f32.partialorder %v5945_v61, 0.0  ;;  %v2750_v46 = vmul.f32 %v2749_v4, %v5949_v35 }
 0x137   :  { %v4096_v14 = vpop.eup %4095  ;;  %v1787_v12 = vmul.f32 0.6931472, %v4094_v58  ;;  %v1815_v20 = vmul.f32 -0.5, %v5977_v0  ;;  %4107 = vlog2.f32 %v1803_v13  ;;  %v6016_v2 = vsub.f32 0.0, %v5987_v55  ;;  %v4733_v58 = vld [vmem:[%s9156_s0 + $0x98] sm:$0xff] }
 0x138   :  { %v4098_v50 = vpop.eup %4097  ;;  %v2775_v25 = vmul.f32 -0.5, %v5985_v21  ;;  %v642_v26 = vsel %vm640_vm1, %v641_v10, %v639_v15  ;;  %v197_v33 = vmul.f32 %v101_v16, %v101_v16  ;;  %v1818_v6 = vand.u32 2147483647, %v5977_v0 }
 0x139   :  { %v2747_v1 = vmul.f32 0.6931472, %v4098_v50  ;;  %v1806_v5 = vmul.f32 -0.5, %v5987_v55  ;;  %v2763_v17 = vadd.f32 1.0, %v6016_v2  ;;  %v634_v31 = vand.u32 2147483648, %v5945_v61  ;;  %v6084_v50 = vpop.xlane.xlu1 %271 }
 0x13a   :  { %v4100_v11 = vpop.eup %4099  ;;  %v1793_v3 = vsel %vm5992_vm2, %v1790_v7, %v1787_v12  ;;  %v1182_v27 = vmax.f32 %v642_v26, 1e-15  ;;  %v630_v63 = vmul.f32 %v4096_v14, %v5945_v61  ;;  %v1816_v28 = vadd.f32 1.0, %v1815_v20 }
 0x13b   :  { %v2753_v38 = vsel %vm6002_vm3, %v2750_v46, %v2747_v1  ;;  %v2778_v36 = vand.u32 2147483647, %v5985_v21  ;;  %4109 = vlog2.f32 %v2763_v17  ;;  %v2776_v23 = vadd.f32 1.0, %v2775_v25  ;;  %v6087_v25 = vpop.xlane.xlu0 %268 }
 0x13c   :  { %v3481_v35 = vsub.f32 %v1793_v3, %v2753_v38  ;;  %v6031_v18 = vclamps-f32 %v1182_v27, 0.9999999  ;;  %v632_v37 = vsel %vm631_vm4, %v5945_v61, %v630_v63  ;;  %v480_v30 = vsel %vm200_vm0, %v197_v33, 0.0  ;;  %v103_v3 = vld [vmem:[%s9156_s0 + $0x2f8] sm:$0xff]  ;;  %v102_v63 = vld [vmem:[%s9156_s0 + $0x2f0] sm:$0xff] }
 0x13d   :  { %v1290_v41 = vmul.f32 %v4732_v57, %v4100_v11  ;;  %v2766_v19 = vmul.f32 -0.5, %v6016_v2  ;;  %v635_v22 = vsel %vm633_vm5, %v634_v31, %v632_v37  ;;  %481 = vadd.xlane.f32.xlu1 %v480_v30  ;;  %vm6043_vm6 = vcmp.lt.f32.partialorder %v1818_v6, 0.0004427343  ;;  %v6107_v37 = vpop.xlane.xlu1 %277 }
 0x13e   :  { %v4102_v24 = vpop.eup %4101  ;;  %v3577_v49 = vmul.f32 0.5, %v3481_v35  ;;  %4111 = vrcp.f32 %v1179_v59  ;;  %v1807_v42 = vadd.f32 1.0, %v1806_v5  ;;  %v1830_v43 = vadd.f32 1.0, %v6031_v18  ;;  %v4734_v35 = vld [vmem:[%s9156_s0 + $0x90] sm:$0xff] }
 0x13f   :  { %v4104_v40 = vpop.eup %4103  ;;  %v1814_v51 = vmul.f32 0.6931472, %v4102_v24  ;;  %v6052_v29 = vsub.f32 0.0, %v6031_v18  ;;  %v1181_v61 = vmax.f32 %v635_v22, 1e-15  ;;  %v1817_v54 = vmul.f32 %v5977_v0, %v1816_v28 }
 0x140   :  { %v3673_v45 = vmul.f32 %v3577_v49, %v1290_v41  ;;  %v4106_v53 = vpop.eup %4105  ;;  %v2777_v56 = vmul.f32 %v2776_v23, %v5985_v21  ;;  %vm6056_vm7 = vcmp.lt.f32.partialorder %v2778_v36, 0.0004427343  ;;  %4113 = vlog2.f32 %v1830_v43  ;;  %v6111_v49 = vpop.xlane.xlu0 %274 }
 0x141   :  { %v4108_v59 = vpop.eup %4107  ;;  %v2774_v48 = vmul.f32 0.6931472, %v4106_v53  ;;  %v2767_v47 = vadd.f32 1.0, %v2766_v19  ;;  %v2790_v60 = vadd.f32 1.0, %v6052_v29  ;;  %v196_v62 = vmul.f32 %v100_v44, %v100_v44 }
 0x142   :  { %3769 = vst.msk [vmem:[%s9157_s1 + $0x80] sm:$0xff] %vm200_vm0, %v3673_v45  ;;  %v1808_v0 = vmul.f32 %v5987_v55, %v1807_v42  ;;  %v1809_v21 = vand.u32 2147483647, %v5987_v55  ;;  %v2769_v32 = vand.u32 2147483647, %v6016_v2  ;;  %v1296_v7 = vmul.f32 %v4733_v58, %v4104_v40 }
 0x143   :  { %v6068_v4 = vclamps-f32 %v1181_v61, 0.9999999  ;;  %v1820_v9 = vsel %vm6043_vm6, %v1817_v54, %v1814_v51  ;;  %v2780_v8 = vsel %vm6056_vm7, %v2777_v56, %v2774_v48  ;;  %4115 = vlog2.f32 %v2790_v60 }
 0x144   :  { %v3484_v10 = vsub.f32 %v1820_v9, %v2780_v8  ;;  %v1805_v14 = vmul.f32 0.6931472, %v4108_v59  ;;  %4117 = vrcp.f32 %v1182_v27  ;;  %v2768_v13 = vmul.f32 %v2767_v47, %v6016_v2 }
 0x145   :  { %v1821_v55 = vadd.f32 1.0, %v6068_v4  ;;  %v4110_v52 = vpop.eup %4109  ;;  %v1833_v15 = vmul.f32 -0.5, %v6031_v18  ;;  %v6081_v16 = vsub.f32 0.0, %v6068_v4  ;;  %v477_v12 = vsel %vm200_vm0, %v196_v62, 0.0 }
 0x146   :  { %v3580_v46 = vmul.f32 0.5, %v3484_v10  ;;  %v2765_v20 = vmul.f32 0.6931472, %v4110_v52  ;;  %v2793_v1 = vmul.f32 -0.5, %v6052_v29  ;;  %478 = vadd.xlane.f32.xlu0 %v477_v12  ;;  %vm1810_vm8 = vcmp.lt.f32.partialorder %v1809_v21, 0.0004427343 }
 0x147   :  { %4119 = vlog2.f32 %v1821_v55  ;;  %vm2770_vm9 = vcmp.lt.f32.partialorder %v2769_v32, 0.0004427343  ;;  %v2781_v2 = vadd.f32 1.0, %v6081_v16  ;;  %v1811_v6 = vsel %vm1810_vm8, %v1808_v0, %v1805_v14  ;;  %v4735_v0 = vld [vmem:[%s9156_s0 + $0xa8] sm:$0xff] }
 0x148   :  { %v4112_v26 = vpop.eup %4111  ;;  %v3676_v33 = vmul.f32 %v3580_v46, %v1296_v7  ;;  %v2771_v5 = vsel %vm2770_vm9, %v2768_v13, %v2765_v20  ;;  %4121 = vrcp.f32 %v1181_v61  ;;  %v1834_v31 = vadd.f32 1.0, %v1833_v15 }
 0x149   :  { %v3483_v17 = vsub.f32 %v1811_v6, %v2771_v5  ;;  %v1836_v11 = vand.u32 2147483647, %v6031_v18  ;;  %4123 = vlog2.f32 %v2781_v2  ;;  %v2794_v27 = vadd.f32 1.0, %v2793_v1  ;;  %v4736_v2 = vld [vmem:[%s9156_s0 + $0xa0] sm:$0xff]  ;;  %v6159_v5 = vpop.xlane.xlu1 %283 }
 0x14a   :  { %v4114_v38 = vpop.eup %4113  ;;  %3772 = vst.msk [vmem:[%s9157_s1 + $0x98] sm:$0xff] %vm200_vm0, %v3676_v33  ;;  %4125 = vrsqrt.f32 %v6084_v50  ;;  %v1294_v28 = vmul.f32 %v4734_v35, %v4112_v26  ;;  %v2796_v23 = vand.u32 2147483647, %v6052_v29  ;;  %v1824_v24 = vmul.f32 -0.5, %v6068_v4 }
 0x14b   :  { %v3579_v36 = vmul.f32 0.5, %v3483_v17  ;;  %4127 = vrsqrt.f32 %v6087_v25  ;;  %v1832_v30 = vmul.f32 0.6931472, %v4114_v38  ;;  %v2784_v57 = vmul.f32 -0.5, %v6081_v16  ;;  %v6162_v38 = vpop.xlane.xlu0 %280 }
 0x14c   :  { %v199_v41 = vmul.f32 %v103_v3, %v103_v3  ;;  %v1835_v39 = vmul.f32 %v6031_v18, %v1834_v31  ;;  %vm6114_vm10 = vcmp.lt.f32.partialorder %v1836_v11, 0.0004427343  ;;  %v198_v43 = vmul.f32 %v102_v63, %v102_v63 }
 0x14d   :  { %v4116_v19 = vpop.eup %4115  ;;  %v3675_v22 = vmul.f32 %v3579_v36, %v1294_v28  ;;  %v2795_v45 = vmul.f32 %v2794_v27, %v6052_v29  ;;  %4129 = vrsqrt.f32 %v6107_v37  ;;  %vm2797_vm11 = vcmp.lt.f32.partialorder %v2796_v23, 0.0004427343 }
 0x14e   :  { %v4118_v44 = vpop.eup %4117  ;;  %v2792_v40 = vmul.f32 0.6931472, %v4116_v19  ;;  %v486_v51 = vsel %vm200_vm0, %v199_v41, 0.0  ;;  %v1827_v18 = vand.u32 2147483647, %v6068_v4  ;;  %v483_v61 = vsel %vm200_vm0, %v198_v43, 0.0 }
 0x14f   :  { %3771 = vst.msk [vmem:[%s9157_s1 + $0x90] sm:$0xff] %vm200_vm0, %v3675_v22  ;;  %487 = vadd.xlane.f32.xlu1 %v486_v51  ;;  %4131 = vrsqrt.f32 %v6111_v49  ;;  %v1838_v29 = vsel %vm6114_vm10, %v1835_v39, %v1832_v30  ;;  %v1825_v56 = vadd.f32 1.0, %v1824_v24  ;;  %v2785_v34 = vadd.f32 1.0, %v2784_v57  ;;  %484 = vadd.xlane.f32.xlu0 %v483_v61  ;;  %v6189_v51 = vpop.xlane.xlu1 %289 }
 0x150   :  { %v2798_v54 = vsel %vm2797_vm11, %v2795_v45, %v2792_v40  ;;  %v2787_v48 = vand.u32 2147483647, %v6081_v16  ;;  %v1300_v21 = vmul.f32 %v4735_v0, %v4118_v44  ;;  %vm6134_vm12 = vcmp.lt.f32.partialorder %v1827_v18, 0.0004427343 }
 0x151   :  { %v4120_v53 = vpop.eup %4119  ;;  %v3486_v59 = vsub.f32 %v1838_v29, %v2798_v54  ;;  %v1826_v9 = vmul.f32 %v6068_v4, %v1825_v56  ;;  %v2786_v10 = vmul.f32 %v2785_v34, %v6081_v16  ;;  %vm652_vm13 = vcmp.eq.f32.partialorder %v6084_v50, inf  ;;  %v6195_v34 = vpop.xlane.xlu0 %286 }
 0x152   :  { %v4122_v47 = vpop.eup %4121  ;;  %v1823_v60 = vmul.f32 0.6931472, %v4120_v53  ;;  %vm2788_vm14 = vcmp.lt.f32.partialorder %v2787_v48, 0.0004427343  ;;  %vm654_vm15 = vcmp.eq.f32.partialorder %v6084_v50, 0.0  ;;  %v655_v12 = vand.u32 2147483648, %v6084_v50 }
 0x153   :  { %v4124_v62 = vpop.eup %4123  ;;  %v3582_v32 = vmul.f32 0.5, %v3486_v59  ;;  %vm645_vm1 = vcmp.eq.f32.partialorder %v6087_v25, inf  ;;  %v648_v20 = vand.u32 2147483648, %v6087_v25  ;;  %v1298_v26 = vmul.f32 %v4736_v2, %v4122_v47 }
 0x154   :  { %v4126_v7 = vpop.eup %4125  ;;  %v2783_v8 = vmul.f32 0.6931472, %v4124_v62  ;;  %v1829_v13 = vsel %vm6134_vm12, %v1826_v9, %v1823_v60  ;;  %vm647_vm2 = vcmp.eq.f32.partialorder %v6087_v25, 0.0  ;;  %vm666_vm3 = vcmp.eq.f32.partialorder %v6107_v37, inf }
 0x155   :  { %v4128_v14 = vpop.eup %4127  ;;  %v3678_v55 = vmul.f32 %v3582_v32, %v1300_v21  ;;  %v651_v52 = vmul.f32 %v4126_v7, %v6084_v50  ;;  %vm668_vm4 = vcmp.eq.f32.partialorder %v6107_v37, 0.0  ;;  %4133 = vrsqrt.f32 %v6159_v5 }
 0x156   :  { %v2789_v15 = vsel %vm2788_vm14, %v2786_v10, %v2783_v8  ;;  %v644_v4 = vmul.f32 %v4128_v14, %v6087_v25  ;;  %v669_v28 = vand.u32 2147483648, %v6107_v37  ;;  %4135 = vrsqrt.f32 %v6162_v38 }
 0x157   :  { %3774 = vst.msk [vmem:[%s9157_s1 + $0xa8] sm:$0xff] %vm200_vm0, %v3678_v55  ;;  %v3485_v16 = vsub.f32 %v1829_v13, %v2789_v15  ;;  %v653_v46 = vsel %vm652_vm13, %v6084_v50, %v651_v52  ;;  %v4130_v1 = vpop.eup %4129  ;;  %vm659_vm5 = vcmp.eq.f32.partialorder %v6111_v49, inf  ;;  %vm661_vm6 = vcmp.eq.f32.partialorder %v6111_v49, 0.0 }
 0x158   :  { %v656_v33 = vsel %vm654_vm15, %v655_v12, %v653_v46  ;;  %v646_v6 = vsel %vm645_vm1, %v6087_v25, %v644_v4  ;;  %v665_v3 = vmul.f32 %v4130_v1, %v6107_v37  ;;  %v662_v43 = vand.u32 2147483648, %v6111_v49 }
 0x159   :  { %v4132_v17 = vpop.eup %4131  ;;  %v3581_v31 = vmul.f32 0.5, %v3485_v16  ;;  %v1184_v50 = vmax.f32 %v656_v33, 1e-15  ;;  %v649_v11 = vsel %vm647_vm2, %v648_v20, %v646_v6  ;;  %v683_v29 = vand.u32 2147483648, %v6159_v5 }
 0x15a   :  { %v1183_v27 = vmax.f32 %v649_v11, 1e-15  ;;  %v658_v36 = vmul.f32 %v4132_v17, %v6111_v49  ;;  %v667_v24 = vsel %vm666_vm3, %v6107_v37, %v665_v3  ;;  %v676_v47 = vand.u32 2147483648, %v6162_v38 }
 0x15b   :  { %v3677_v63 = vmul.f32 %v3581_v31, %v1298_v26  ;;  %v3876_v35 = vclamps-f32 %v1184_v50, 0.9999999  ;;  %4137 = vrcp.f32 %v1184_v50  ;;  %v670_v39 = vsel %vm668_vm4, %v669_v28, %v667_v24  ;;  %v4737_v50 = vld [vmem:[%s9156_s0 + $0xb8] sm:$0xff] }
 0x15c   :  { %v6167_v25 = vclamps-f32 %v1183_v27, 0.9999999  ;;  %4139 = vrcp.f32 %v1183_v27  ;;  %v660_v42 = vsel %vm659_vm5, %v6111_v49, %v658_v36  ;;  %v1186_v54 = vmax.f32 %v670_v39, 1e-15  ;;  %v4738_v36 = vld [vmem:[%s9156_s0 + $0xb0] sm:$0xff] }
 0x15d   :  { %3773 = vst.msk [vmem:[%s9157_s1 + $0xa0] sm:$0xff] %vm200_vm0, %v3677_v63  ;;  %v1848_v23 = vadd.f32 1.0, %v3876_v35  ;;  %v2528_v30 = vsub.f32 0.0, %v3876_v35  ;;  %v1851_v57 = vmul.f32 -0.5, %v3876_v35  ;;  %v1854_v61 = vand.u32 2147483647, %v3876_v35 }
 0x15e   :  { %v1839_v41 = vadd.f32 1.0, %v6167_v25  ;;  %v6179_v19 = vsub.f32 0.0, %v6167_v25  ;;  %v1842_v40 = vmul.f32 -0.5, %v6167_v25  ;;  %v1845_v53 = vand.u32 2147483647, %v6167_v25 }
 0x15f   :  { %4141 = vlog2.f32 %v1848_v23  ;;  %v2808_v22 = vadd.f32 1.0, %v2528_v30  ;;  %v2811_v44 = vmul.f32 -0.5, %v2528_v30  ;;  %v1852_v18 = vadd.f32 1.0, %v1851_v57  ;;  %v4134_v60 = vpop.eup %4133 }
 0x160   :  { %4143 = vlog2.f32 %v1839_v41  ;;  %v2799_v45 = vadd.f32 1.0, %v6179_v19  ;;  %v2814_v37 = vand.u32 2147483647, %v2528_v30  ;;  %v663_v56 = vsel %vm661_vm6, %v662_v43, %v660_v42  ;;  %v4136_v58 = vpop.eup %4135 }
 0x161   :  { %4145 = vlog2.f32 %v2808_v22  ;;  %v2802_v59 = vmul.f32 -0.5, %v6179_v19  ;;  %v1185_v48 = vmax.f32 %v663_v56, 1e-15  ;;  %v2812_v62 = vadd.f32 1.0, %v2811_v44 }
 0x162   :  { %4147 = vlog2.f32 %v2799_v45  ;;  %v1843_v0 = vadd.f32 1.0, %v1842_v40  ;;  %v6200_v21 = vclamps-f32 %v1186_v54, 0.9999999  ;;  %v697_v32 = vand.u32 2147483648, %v6189_v51 }
 0x163   :  { %4149 = vrsqrt.f32 %v6189_v51  ;;  %vm6203_vm7 = vcmp.lt.f32.partialorder %v1854_v61, 0.0004427343  ;;  %v6207_v7 = vclamps-f32 %v1185_v48, 0.9999999  ;;  %vm680_vm8 = vcmp.eq.f32.partialorder %v6159_v5, inf }
 0x164   :  { %4151 = vrsqrt.f32 %v6195_v34  ;;  %v690_v9 = vand.u32 2147483648, %v6195_v34  ;;  %v1853_v10 = vmul.f32 %v3876_v35, %v1852_v18  ;;  %vm6212_vm9 = vcmp.lt.f32.partialorder %v2814_v37, 0.0004427343 }
 0x165   :  { %v4138_v8 = vpop.eup %4137  ;;  %vm6216_vm10 = vcmp.lt.f32.partialorder %v1845_v53, 0.0004427343  ;;  %v2805_v52 = vand.u32 2147483647, %v6179_v19  ;;  %v1866_v13 = vadd.f32 1.0, %v6200_v21  ;;  %vm682_vm11 = vcmp.eq.f32.partialorder %v6159_v5, 0.0 }
 0x166   :  { %v4140_v15 = vpop.eup %4139  ;;  %v2803_v12 = vadd.f32 1.0, %v2802_v59  ;;  %4153 = vrcp.f32 %v1186_v54  ;;  %v6224_v4 = vsub.f32 0.0, %v6200_v21  ;;  %v1857_v16 = vadd.f32 1.0, %v6207_v7 }
 0x167   :  { %v2813_v20 = vmul.f32 %v2812_v62, %v2528_v30  ;;  %v1844_v1 = vmul.f32 %v6167_v25, %v1843_v0  ;;  %4155 = vlog2.f32 %v1866_v13  ;;  %v679_v2 = vmul.f32 %v4134_v60, %v6159_v5  ;;  %v6271_v60 = vpop.xlane.xlu1 %295 }
 0x168   :  { %vm673_vm12 = vcmp.eq.f32.partialorder %v6162_v38, inf  ;;  %v2826_v6 = vadd.f32 1.0, %v6224_v4  ;;  %4157 = vrcp.f32 %v1185_v48  ;;  %v6232_v17 = vsub.f32 0.0, %v6207_v7 }
 0x169   :  { %v4142_v46 = vpop.eup %4141  ;;  %vm675_vm13 = vcmp.eq.f32.partialorder %v6162_v38, 0.0  ;;  %v1304_v11 = vmul.f32 %v4737_v50, %v4138_v8  ;;  %vm6238_vm14 = vcmp.lt.f32.partialorder %v2805_v52, 0.0004427343  ;;  %4159 = vlog2.f32 %v1857_v16 }
 0x16a   :  { %v4144_v26 = vpop.eup %4143  ;;  %v1850_v33 = vmul.f32 0.6931472, %v4142_v46  ;;  %v672_v27 = vmul.f32 %v4136_v58, %v6162_v38  ;;  %v2804_v25 = vmul.f32 %v2803_v12, %v6179_v19  ;;  %4161 = vlog2.f32 %v2826_v6 }
 0x16b   :  { %v4146_v31 = vpop.eup %4145  ;;  %v1841_v35 = vmul.f32 0.6931472, %v4144_v26  ;;  %v1302_v23 = vmul.f32 %v4738_v36, %v4140_v15  ;;  %v1869_v30 = vmul.f32 -0.5, %v6200_v21  ;;  %v2829_v24 = vmul.f32 -0.5, %v6224_v4 }
 0x16c   :  { %v2810_v63 = vmul.f32 0.6931472, %v4146_v31  ;;  %v4148_v28 = vpop.eup %4147  ;;  %v1860_v57 = vmul.f32 -0.5, %v6207_v7  ;;  %v1856_v22 = vsel %vm6203_vm7, %v1853_v10, %v1850_v33  ;;  %v2817_v42 = vadd.f32 1.0, %v6232_v17 }
 0x16d   :  { %v4150_v41 = vpop.eup %4149  ;;  %v2801_v39 = vmul.f32 0.6931472, %v4148_v28  ;;  %v1872_v44 = vand.u32 2147483647, %v6200_v21  ;;  %v1863_v40 = vand.u32 2147483647, %v6207_v7  ;;  %v681_v45 = vsel %vm680_vm8, %v6159_v5, %v679_v2 }
 0x16e   :  { %v2816_v19 = vsel %vm6212_vm9, %v2813_v20, %v2810_v63  ;;  %v6260_v18 = vpop.eup %4151  ;;  %v1847_v61 = vsel %vm6216_vm10, %v1844_v1, %v1841_v35  ;;  %4163 = vlog2.f32 %v2817_v42  ;;  %v684_v37 = vsel %vm682_vm11, %v683_v29, %v681_v45 }
 0x16f   :  { %v3488_v43 = vsub.f32 %v1856_v22, %v2816_v19  ;;  %v2807_v53 = vsel %vm6238_vm14, %v2804_v25, %v2801_v39  ;;  %v1870_v59 = vadd.f32 1.0, %v1869_v30  ;;  %v2832_v48 = vand.u32 2147483647, %v6224_v4  ;;  %v6336_v19 = vpop.xlane.xlu0 %292 }
 0x170   :  { %v3487_v56 = vsub.f32 %v1847_v61, %v2807_v53  ;;  %v4154_v62 = vpop.eup %4153  ;;  %v2830_v0 = vadd.f32 1.0, %v2829_v24  ;;  %v1861_v58 = vadd.f32 1.0, %v1860_v57  ;;  %v1188_v49 = vmax.f32 %v684_v37, 1e-15 }
 0x171   :  { %v3584_v54 = vmul.f32 0.5, %v3488_v43  ;;  %v674_v8 = vsel %vm673_vm12, %v6162_v38, %v672_v27  ;;  %vm694_vm15 = vcmp.eq.f32.partialorder %v6189_v51, inf  ;;  %v4156_v10 = vpop.eup %4155  ;;  %v2820_v14 = vmul.f32 -0.5, %v6232_v17  ;;  %v4739_v27 = vld [vmem:[%s9156_s0 + $0xc8] sm:$0xff] }
 0x172   :  { %v3583_v29 = vmul.f32 0.5, %v3487_v56  ;;  %v677_v55 = vsel %vm675_vm13, %v676_v47, %v674_v8  ;;  %v4158_v52 = vpop.eup %4157  ;;  %vm6282_vm1 = vcmp.lt.f32.partialorder %v1872_v44, 0.0004427343  ;;  %v6286_v15 = vclamps-f32 %v1188_v49, 0.9999999 }
 0x173   :  { %v3680_v5 = vmul.f32 %v3584_v54, %v1304_v11  ;;  %v1187_v12 = vmax.f32 %v677_v55, 1e-15  ;;  %4165 = vrsqrt.f32 %v6271_v60  ;;  %v4160_v16 = vpop.eup %4159  ;;  %v1868_v20 = vmul.f32 0.6931472, %v4156_v10 }
 0x174   :  { %v3679_v46 = vmul.f32 %v3583_v29, %v1302_v23  ;;  %v1871_v38 = vmul.f32 %v6200_v21, %v1870_v59  ;;  %vm6294_vm2 = vcmp.lt.f32.partialorder %v2832_v48, 0.0004427343  ;;  %vm696_vm3 = vcmp.eq.f32.partialorder %v6189_v51, 0.0  ;;  %v4162_v1 = vpop.eup %4161 }
 0x175   :  { %3776 = vst.msk [vmem:[%s9157_s1 + $0xb8] sm:$0xff] %vm200_vm0, %v3680_v5  ;;  %v2831_v2 = vmul.f32 %v2830_v0, %v6224_v4  ;;  %v1862_v26 = vmul.f32 %v6207_v7, %v1861_v58  ;;  %v2823_v33 = vand.u32 2147483647, %v6232_v17  ;;  %v1884_v6 = vadd.f32 1.0, %v6286_v15 }
 0x176   :  { %3775 = vst.msk [vmem:[%s9157_s1 + $0xb0] sm:$0xff] %vm200_vm0, %v3679_v46  ;;  %v2828_v21 = vmul.f32 0.6931472, %v4162_v1  ;;  %v2821_v31 = vadd.f32 1.0, %v2820_v14  ;;  %v6308_v50 = vsub.f32 0.0, %v6286_v15  ;;  %v693_v11 = vmul.f32 %v4150_v41, %v6189_v51 }
 0x177   :  { %vm687_vm4 = vcmp.eq.f32.partialorder %v6195_v34, inf  ;;  %v1859_v4 = vmul.f32 0.6931472, %v4160_v16  ;;  %vm6312_vm5 = vcmp.lt.f32.partialorder %v1863_v40, 0.0004427343  ;;  %4167 = vlog2.f32 %v1884_v6 }
 0x178   :  { %v6316_v3 = vclamps-f32 %v1187_v12, 0.9999999  ;;  %vm689_vm6 = vcmp.eq.f32.partialorder %v6195_v34, 0.0  ;;  %v1308_v63 = vmul.f32 %v4739_v27, %v4154_v62  ;;  %v1874_v35 = vsel %vm6282_vm1, %v1871_v38, %v1868_v20  ;;  %v4164_v36 = vpop.eup %4163 }
 0x179   :  { %v2834_v25 = vsel %vm6294_vm2, %v2831_v2, %v2828_v21  ;;  %v2844_v28 = vadd.f32 1.0, %v6308_v50  ;;  %vm6327_vm7 = vcmp.lt.f32.partialorder %v2823_v33, 0.0004427343  ;;  %4169 = vrcp.f32 %v1188_v49 }
 0x17a   :  { %v3490_v23 = vsub.f32 %v1874_v35, %v2834_v25  ;;  %v1875_v24 = vadd.f32 1.0, %v6316_v3  ;;  %v2819_v57 = vmul.f32 0.6931472, %v4164_v36  ;;  %v2822_v41 = vmul.f32 %v2821_v31, %v6232_v17 }
 0x17b   :  { %4171 = vlog2.f32 %v2844_v28  ;;  %v695_v22 = vsel %vm694_vm15, %v6189_v51, %v693_v11  ;;  %v1865_v42 = vsel %vm6312_vm5, %v1862_v26, %v1859_v4  ;;  %v1887_v43 = vmul.f32 -0.5, %v6286_v15 }
 0x17c   :  { %v3586_v39 = vmul.f32 0.5, %v3490_v23  ;;  %v686_v44 = vmul.f32 %v6260_v18, %v6195_v34  ;;  %v2825_v40 = vsel %vm6327_vm7, %v2822_v41, %v2819_v57  ;;  %v2847_v17 = vmul.f32 -0.5, %v6308_v50  ;;  %v4740_v18 = vld [vmem:[%s9156_s0 + $0xc0] sm:$0xff]  ;;  %v4741_v23 = vld [vmem:[%s9156_s0 + $0xd8] sm:$0xff] }
 0x17d   :  { %4173 = vlog2.f32 %v1875_v24  ;;  %v6347_v45 = vsub.f32 0.0, %v6316_v3  ;;  %v4166_v61 = vpop.eup %4165  ;;  %v3489_v37 = vsub.f32 %v1865_v42, %v2825_v40  ;;  %v698_v54 = vsel %vm696_vm3, %v697_v32, %v695_v22 }
 0x17e   :  { %v3682_v53 = vmul.f32 %v3586_v39, %v1308_v63  ;;  %4175 = vrsqrt.f32 %v6336_v19  ;;  %v1306_v56 = vmul.f32 %v4740_v18, %v4158_v52  ;;  %v1890_v59 = vand.u32 2147483647, %v6286_v15 }
 0x17f   :  { %4177 = vrcp.f32 %v1187_v12  ;;  %v2835_v48 = vadd.f32 1.0, %v6347_v45  ;;  %v3585_v62 = vmul.f32 0.5, %v3489_v37  ;;  %v1888_v51 = vadd.f32 1.0, %v1887_v43 }
 0x180   :  { %3778 = vst.msk [vmem:[%s9157_s1 + $0xc8] sm:$0xff] %vm200_vm0, %v3682_v53  ;;  %v1190_v32 = vmax.f32 %v698_v54, 1e-15  ;;  %v688_v0 = vsel %vm687_vm4, %v6195_v34, %v686_v44  ;;  %v2848_v58 = vadd.f32 1.0, %v2847_v17  ;;  %v1878_v49 = vmul.f32 -0.5, %v6316_v3 }
 0x181   :  { %4179 = vlog2.f32 %v2835_v48  ;;  %v6371_v8 = vsel %vm689_vm6, %v690_v9, %v688_v0  ;;  %v4168_v10 = vpop.eup %4167  ;;  %v3681_v5 = vmul.f32 %v3585_v62, %v1306_v56  ;;  %v2850_v29 = vand.u32 2147483647, %v6308_v50 }
 0x182   :  { %v1881_v14 = vand.u32 2147483647, %v6316_v3  ;;  %v707_v55 = vmul.f32 %v4166_v61, %v6271_v60  ;;  %v2838_v52 = vmul.f32 -0.5, %v6347_v45  ;;  %v6377_v13 = vclamps-f32 %v1190_v32, 0.9999999 }
 0x183   :  { %v1189_v12 = vmax.f32 %v6371_v8, 1e-15  ;;  %vm708_vm8 = vcmp.eq.f32.partialorder %v6271_v60, inf  ;;  %v4170_v16 = vpop.eup %4169  ;;  %3777 = vst.msk [vmem:[%s9157_s1 + $0xc0] sm:$0xff] %vm200_vm0, %v3681_v5  ;;  %v1886_v34 = vmul.f32 0.6931472, %v4168_v10  ;;  %v1889_v38 = vmul.f32 %v6286_v15, %v1888_v51 }
 0x184   :  { %vm6385_vm9 = vcmp.lt.f32.partialorder %v1890_v59, 0.0004427343  ;;  %vm710_vm10 = vcmp.eq.f32.partialorder %v6271_v60, 0.0  ;;  %v711_v46 = vand.u32 2147483648, %v6271_v60  ;;  %v2849_v47 = vmul.f32 %v2848_v58, %v6308_v50 }
 0x185   :  { %v4172_v20 = vpop.eup %4171  ;;  %v1879_v1 = vadd.f32 1.0, %v1878_v49  ;;  %v1902_v2 = vadd.f32 1.0, %v6377_v13  ;;  %v6395_v33 = vsub.f32 0.0, %v6377_v13  ;;  %v6397_v6 = vclamps-f32 %v1189_v12, 0.9999999 }
 0x186   :  { %v2846_v26 = vmul.f32 0.6931472, %v4172_v20  ;;  %v709_v21 = vsel %vm708_vm8, %v6271_v60, %v707_v55  ;;  %vm2851_vm11 = vcmp.lt.f32.partialorder %v2850_v29, 0.0004427343  ;;  %vm6400_vm12 = vcmp.lt.f32.partialorder %v1881_v14, 0.0004427343 }
 0x187   :  { %v4174_v31 = vpop.eup %4173  ;;  %v2839_v15 = vadd.f32 1.0, %v2838_v52  ;;  %4181 = vlog2.f32 %v1902_v2  ;;  %v1892_v4 = vsel %vm6385_vm9, %v1889_v38, %v1886_v34  ;;  %v2841_v27 = vand.u32 2147483647, %v6347_v45  ;;  %v6465_v2 = vpop.xlane.xlu1 %301 }
 0x188   :  { %v4176_v50 = vpop.eup %4175  ;;  %v2852_v7 = vsel %vm2851_vm11, %v2849_v47, %v2846_v26  ;;  %v2862_v63 = vadd.f32 1.0, %v6395_v33  ;;  %4183 = vrcp.f32 %v1190_v32  ;;  %v1893_v28 = vadd.f32 1.0, %v6397_v6 }
 0x189   :  { %v4178_v35 = vpop.eup %4177  ;;  %v3492_v25 = vsub.f32 %v1892_v4, %v2852_v7  ;;  %v6411_v36 = vsel %vm710_vm10, %v711_v46, %v709_v21  ;;  %v1312_v30 = vmul.f32 %v4741_v23, %v4170_v16  ;;  %v1877_v24 = vmul.f32 0.6931472, %v4174_v31 }
 0x18a   :  { %v1880_v57 = vmul.f32 %v6316_v3, %v1879_v1  ;;  %4185 = vlog2.f32 %v2862_v63  ;;  %v2840_v39 = vmul.f32 %v2839_v15, %v6347_v45  ;;  %v6419_v42 = vsub.f32 0.0, %v6397_v6  ;;  %v4742_v45 = vld [vmem:[%s9156_s0 + $0xd0] sm:$0xff] }
 0x18b   :  { %v4180_v41 = vpop.eup %4179  ;;  %v3588_v22 = vmul.f32 0.5, %v3492_v25  ;;  %4187 = vlog2.f32 %v1893_v28  ;;  %v1905_v43 = vmul.f32 -0.5, %v6377_v13  ;;  %v1192_v44 = vmax.f32 %v6411_v36, 1e-15 }
 0x18c   :  { %v2837_v60 = vmul.f32 0.6931472, %v4180_v41  ;;  %v700_v40 = vmul.f32 %v4176_v50, %v6336_v19  ;;  %vm2842_vm13 = vcmp.lt.f32.partialorder %v2841_v27, 0.0004427343  ;;  %v2865_v3 = vmul.f32 -0.5, %v6395_v33 }
 0x18d   :  { %v3684_v17 = vmul.f32 %v3588_v22, %v1312_v30  ;;  %v2853_v61 = vadd.f32 1.0, %v6419_v42  ;;  %v1310_v53 = vmul.f32 %v4742_v45, %v4178_v35  ;;  %v1883_v37 = vsel %vm6400_vm12, %v1880_v57, %v1877_v24  ;;  %v6486_v22 = vpop.xlane.xlu0 %298 }
 0x18e   :  { %v2843_v54 = vsel %vm2842_vm13, %v2840_v39, %v2837_v60  ;;  %vm701_vm14 = vcmp.eq.f32.partialorder %v6336_v19, inf  ;;  %v1908_v56 = vand.u32 2147483647, %v6377_v13  ;;  %v6437_v59 = vclamps-f32 %v1192_v44, 0.9999999 }
 0x18f   :  { %3780 = vst.msk [vmem:[%s9157_s1 + $0xd8] sm:$0xff] %vm200_vm0, %v3684_v17  ;;  %v3491_v18 = vsub.f32 %v1883_v37, %v2843_v54  ;;  %4189 = vlog2.f32 %v2853_v61  ;;  %v1906_v48 = vadd.f32 1.0, %v1905_v43  ;;  %v2868_v62 = vand.u32 2147483647, %v6395_v33 }
 0x190   :  { %4191 = vrcp.f32 %v1189_v12  ;;  %v702_v51 = vsel %vm701_vm14, %v6336_v19, %v700_v40  ;;  %v2866_v58 = vadd.f32 1.0, %v2865_v3  ;;  %v1920_v49 = vadd.f32 1.0, %v6437_v59 }
 0x191   :  { %v4182_v32 = vpop.eup %4181  ;;  %v3587_v0 = vmul.f32 0.5, %v3491_v18  ;;  %v704_v8 = vand.u32 2147483648, %v6336_v19  ;;  %v1896_v10 = vmul.f32 -0.5, %v6397_v6  ;;  %v2856_v5 = vmul.f32 -0.5, %v6419_v42 }
 0x192   :  { %v6446_v29 = vsub.f32 0.0, %v6437_v59  ;;  %vm703_vm15 = vcmp.eq.f32.partialorder %v6336_v19, 0.0  ;;  %v4184_v14 = vpop.eup %4183  ;;  %v1904_v52 = vmul.f32 0.6931472, %v4182_v32  ;;  %4193 = vlog2.f32 %v1920_v49 }
 0x193   :  { %v3683_v55 = vmul.f32 %v3587_v0, %v1310_v53  ;;  %v705_v12 = vsel %vm703_vm15, %v704_v8, %v702_v51  ;;  %v1907_v34 = vmul.f32 %v6377_v13, %v1906_v48  ;;  %vm6450_vm1 = vcmp.lt.f32.partialorder %v1908_v56, 0.0004427343 }
 0x194   :  { %v4186_v16 = vpop.eup %4185  ;;  %vm6454_vm2 = vcmp.lt.f32.partialorder %v2868_v62, 0.0004427343  ;;  %v2880_v20 = vadd.f32 1.0, %v6446_v29  ;;  %v2867_v47 = vmul.f32 %v2866_v58, %v6395_v33  ;;  %v1899_v13 = vand.u32 2147483647, %v6397_v6  ;;  %v4743_v33 = vld [vmem:[%s9156_s0 + $0xe8] sm:$0xff] }
 0x195   :  { %v4188_v38 = vpop.eup %4187  ;;  %3779 = vst.msk [vmem:[%s9157_s1 + $0xd0] sm:$0xff] %vm200_vm0, %v3683_v55  ;;  %v2864_v19 = vmul.f32 0.6931472, %v4186_v16  ;;  %v1191_v1 = vmax.f32 %v705_v12, 1e-15  ;;  %v1897_v26 = vadd.f32 1.0, %v1896_v10  ;;  %v1910_v11 = vsel %vm6450_vm1, %v1907_v34, %v1904_v52  ;;  %v6507_v10 = vpop.xlane.xlu0 %304 }
 0x196   :  { %v2857_v21 = vadd.f32 1.0, %v2856_v5  ;;  %v2859_v31 = vand.u32 2147483647, %v6419_v42  ;;  %4195 = vlog2.f32 %v2880_v20  ;;  %v1923_v50 = vmul.f32 -0.5, %v6437_v59 }
 0x197   :  { %v2870_v15 = vsel %vm6454_vm2, %v2867_v47, %v2864_v19  ;;  %v6473_v4 = vclamps-f32 %v1191_v1, 0.9999999  ;;  %v1316_v7 = vmul.f32 %v4743_v33, %v4184_v14  ;;  %v1895_v63 = vmul.f32 0.6931472, %v4188_v38  ;;  %v4745_v38 = vld [vmem:[%s9156_s0 + $0xf8] sm:$0xff] }
 0x198   :  { %v3494_v27 = vsub.f32 %v1910_v11, %v2870_v15  ;;  %4197 = vrsqrt.f32 %v6465_v2  ;;  %v2883_v25 = vmul.f32 -0.5, %v6446_v29  ;;  %v1898_v24 = vmul.f32 %v6397_v6, %v1897_v26  ;;  %v6490_v6 = vpop.xlane.xlu1 %307 }
 0x199   :  { %v4190_v35 = vpop.eup %4189  ;;  %4199 = vrcp.f32 %v1192_v44  ;;  %v1911_v28 = vadd.f32 1.0, %v6473_v4  ;;  %v6482_v36 = vsub.f32 0.0, %v6473_v4  ;;  %v2858_v41 = vmul.f32 %v2857_v21, %v6419_v42  ;;  %v4744_v42 = vld [vmem:[%s9156_s0 + $0xe0] sm:$0xff] }
 0x19a   :  { %v4192_v23 = vpop.eup %4191  ;;  %v3590_v30 = vmul.f32 0.5, %v3494_v27  ;;  %v2855_v57 = vmul.f32 0.6931472, %v4190_v35  ;;  %vm1900_vm3 = vcmp.lt.f32.partialorder %v1899_v13, 0.0004427343  ;;  %v1924_v39 = vadd.f32 1.0, %v1923_v50 }
 0x19b   :  { %vm2860_vm4 = vcmp.lt.f32.partialorder %v2859_v31, 0.0004427343  ;;  %4201 = vlog2.f32 %v1911_v28  ;;  %v1901_v43 = vsel %vm1900_vm3, %v1898_v24, %v1895_v63  ;;  %v2871_v40 = vadd.f32 1.0, %v6482_v36 }
 0x19c   :  { %v3686_v60 = vmul.f32 %v3590_v30, %v1316_v7  ;;  %v2861_v44 = vsel %vm2860_vm4, %v2858_v41, %v2855_v57  ;;  %v4194_v17 = vpop.eup %4193  ;;  %v2884_v61 = vadd.f32 1.0, %v2883_v25  ;;  %4203 = vrsqrt.f32 %v6486_v22  ;;  %v6520_v20 = vpop.xlane.xlu1 %313 }
 0x19d   :  { %v3493_v3 = vsub.f32 %v1901_v43, %v2861_v44  ;;  %v1314_v45 = vmul.f32 %v4744_v42, %v4192_v23  ;;  %v1926_v53 = vand.u32 2147483647, %v6437_v59  ;;  %v2886_v37 = vand.u32 2147483647, %v6446_v29 }
 0x19e   :  { %3782 = vst.msk [vmem:[%s9157_s1 + $0xe8] sm:$0xff] %vm200_vm0, %v3686_v60  ;;  %4205 = vlog2.f32 %v2871_v40  ;;  %v1922_v18 = vmul.f32 0.6931472, %v4194_v17  ;;  %v1914_v56 = vmul.f32 -0.5, %v6473_v4  ;;  %v1925_v62 = vmul.f32 %v6437_v59, %v1924_v39  ;;  %v4746_v60 = vld [vmem:[%s9156_s0 + $0xf0] sm:$0xff] }
 0x19f   :  { %v3589_v54 = vmul.f32 0.5, %v3493_v3  ;;  %4207 = vrcp.f32 %v1191_v1  ;;  %v2885_v0 = vmul.f32 %v2884_v61, %v6446_v29  ;;  %v2874_v58 = vmul.f32 -0.5, %v6482_v36 }
 0x1a0   :  { %v4196_v48 = vpop.eup %4195  ;;  %4209 = vrsqrt.f32 %v6490_v6  ;;  %vm1927_vm5 = vcmp.lt.f32.partialorder %v1926_v53, 0.0004427343  ;;  %vm2887_vm6 = vcmp.lt.f32.partialorder %v2886_v37, 0.0004427343  ;;  %v1917_v8 = vand.u32 2147483647, %v6473_v4  ;;  %v6569_v37 = vpop.xlane.xlu1 %319 }
 0x1a1   :  { %v3685_v51 = vmul.f32 %v3589_v54, %v1314_v45  ;;  %v2882_v32 = vmul.f32 0.6931472, %v4196_v48  ;;  %v1928_v59 = vsel %vm1927_vm5, %v1925_v62, %v1922_v18  ;;  %v1915_v55 = vadd.f32 1.0, %v1914_v56 }
 0x1a2   :  { %v4198_v49 = vpop.eup %4197  ;;  %v2877_v12 = vand.u32 2147483647, %v6482_v36  ;;  %vm722_vm7 = vcmp.eq.f32.partialorder %v6465_v2, inf  ;;  %v725_v16 = vand.u32 2147483648, %v6465_v2  ;;  %v2875_v9 = vadd.f32 1.0, %v2874_v58 }
 0x1a3   :  { %v4200_v5 = vpop.eup %4199  ;;  %3781 = vst.msk [vmem:[%s9157_s1 + $0xe0] sm:$0xff] %vm200_vm0, %v3685_v51  ;;  %v2888_v14 = vsel %vm2887_vm6, %v2885_v0, %v2882_v32  ;;  %v721_v29 = vmul.f32 %v4198_v49, %v6465_v2  ;;  %vm724_vm8 = vcmp.eq.f32.partialorder %v6465_v2, 0.0  ;;  %4211 = vrsqrt.f32 %v6507_v10 }
 0x1a4   :  { %v3496_v52 = vsub.f32 %v1928_v59, %v2888_v14  ;;  %v1320_v19 = vmul.f32 %v4745_v38, %v4200_v5  ;;  %vm6525_vm9 = vcmp.lt.f32.partialorder %v1917_v8, 0.0004427343  ;;  %v1916_v31 = vmul.f32 %v6473_v4, %v1915_v55  ;;  %v4748_v38 = vld [vmem:[%s9156_s0 + $0x100] sm:$0xff] }
 0x1a5   :  { %v4202_v34 = vpop.eup %4201  ;;  %v723_v46 = vsel %vm722_vm7, %v6465_v2, %v721_v29  ;;  %vm715_vm10 = vcmp.eq.f32.partialorder %v6486_v22, inf  ;;  %vm6531_vm11 = vcmp.lt.f32.partialorder %v2877_v12, 0.0004427343  ;;  %4213 = vrsqrt.f32 %v6520_v20 }
 0x1a6   :  { %v3592_v47 = vmul.f32 0.5, %v3496_v52  ;;  %v726_v1 = vsel %vm724_vm8, %v725_v16, %v723_v46  ;;  %v4204_v26 = vpop.eup %4203  ;;  %v1913_v21 = vmul.f32 0.6931472, %v4202_v34  ;;  %v2876_v63 = vmul.f32 %v2875_v9, %v6482_v36 }
 0x1a7   :  { %v1194_v2 = vmax.f32 %v726_v1, 1e-15  ;;  %v714_v33 = vmul.f32 %v4204_v26, %v6486_v22  ;;  %vm717_vm12 = vcmp.eq.f32.partialorder %v6486_v22, 0.0  ;;  %v718_v28 = vand.u32 2147483648, %v6486_v22 }
 0x1a8   :  { %v4206_v11 = vpop.eup %4205  ;;  %v3688_v15 = vmul.f32 %v3592_v47, %v1320_v19  ;;  %vm736_vm13 = vcmp.eq.f32.partialorder %v6490_v6, inf  ;;  %vm738_vm14 = vcmp.eq.f32.partialorder %v6490_v6, 0.0  ;;  %v1919_v36 = vsel %vm6525_vm9, %v1916_v31, %v1913_v21 }
 0x1a9   :  { %v4208_v7 = vpop.eup %4207  ;;  %v2873_v27 = vmul.f32 0.6931472, %v4206_v11  ;;  %v6538_v35 = vclamps-f32 %v1194_v2, 0.9999999  ;;  %v716_v25 = vsel %vm715_vm10, %v6486_v22, %v714_v33  ;;  %4215 = vrcp.f32 %v1194_v2  ;;  %v6556_v22 = vpop.xlane.xlu0 %310 }
 0x1aa   :  { %v4210_v4 = vpop.eup %4209  ;;  %3784 = vst.msk [vmem:[%s9157_s1 + $0xf8] sm:$0xff] %vm200_vm0, %v3688_v15  ;;  %v719_v41 = vsel %vm717_vm12, %v718_v28, %v716_v25  ;;  %v1318_v43 = vmul.f32 %v4746_v60, %v4208_v7  ;;  %v739_v40 = vand.u32 2147483648, %v6490_v6  ;;  %vm729_vm15 = vcmp.eq.f32.partialorder %v6507_v10, inf }
 0x1ab   :  { %v2879_v23 = vsel %vm6531_vm11, %v2876_v63, %v2873_v27  ;;  %v1938_v30 = vadd.f32 1.0, %v6538_v35  ;;  %v2538_v57 = vsub.f32 0.0, %v6538_v35  ;;  %v735_v39 = vmul.f32 %v4210_v4, %v6490_v6 }
 0x1ac   :  { %v3495_v24 = vsub.f32 %v1919_v36, %v2879_v23  ;;  %v1193_v44 = vmax.f32 %v719_v41, 1e-15  ;;  %vm731_vm1 = vcmp.eq.f32.partialorder %v6507_v10, 0.0  ;;  %v732_v53 = vand.u32 2147483648, %v6507_v10 }
 0x1ad   :  { %4217 = vlog2.f32 %v1938_v30  ;;  %v2898_v3 = vadd.f32 1.0, %v2538_v57  ;;  %v4212_v61 = vpop.eup %4211  ;;  %v737_v45 = vsel %vm736_vm13, %v6490_v6, %v735_v39  ;;  %v1941_v18 = vmul.f32 -0.5, %v6538_v35  ;;  %v6586_v5 = vpop.xlane.xlu0 %316 }
 0x1ae   :  { %v3591_v17 = vmul.f32 0.5, %v3495_v24  ;;  %v3885_v42 = vclamps-f32 %v1193_v44, 0.9999999  ;;  %4219 = vrsqrt.f32 %v6556_v22  ;;  %v2901_v56 = vmul.f32 -0.5, %v2538_v57 }
 0x1af   :  { %4221 = vlog2.f32 %v2898_v3  ;;  %vm750_vm2 = vcmp.eq.f32.partialorder %v6520_v20, inf  ;;  %v753_v51 = vand.u32 2147483648, %v6520_v20  ;;  %v746_v32 = vand.u32 2147483648, %v6556_v22  ;;  %v4214_v0 = vpop.eup %4213 }
 0x1b0   :  { %v3687_v54 = vmul.f32 %v3591_v17, %v1318_v43  ;;  %v1929_v48 = vadd.f32 1.0, %v3885_v42  ;;  %v6573_v62 = vsub.f32 0.0, %v3885_v42  ;;  %v1944_v58 = vand.u32 2147483647, %v6538_v35 }
 0x1b1   :  { %v740_v49 = vsel %vm738_vm14, %v739_v40, %v737_v45  ;;  %v728_v8 = vmul.f32 %v4212_v61, %v6507_v10  ;;  %4223 = vrsqrt.f32 %v6569_v37  ;;  %v1932_v59 = vmul.f32 -0.5, %v3885_v42 }
 0x1b2   :  { %3783 = vst.msk [vmem:[%s9157_s1 + $0xf0] sm:$0xff] %vm200_vm0, %v3687_v54  ;;  %4225 = vlog2.f32 %v1929_v48  ;;  %v2889_v14 = vadd.f32 1.0, %v6573_v62  ;;  %vm752_vm3 = vcmp.eq.f32.partialorder %v6520_v20, 0.0  ;;  %v767_v55 = vand.u32 2147483648, %v6569_v37 }
 0x1b3   :  { %v1942_v29 = vadd.f32 1.0, %v1941_v18  ;;  %v2902_v52 = vadd.f32 1.0, %v2901_v56  ;;  %v2904_v12 = vand.u32 2147483647, %v2538_v57  ;;  %v1196_v16 = vmax.f32 %v740_v49, 1e-15  ;;  %v4216_v6 = vpop.eup %4215 }
 0x1b4   :  { %4227 = vlog2.f32 %v2889_v14  ;;  %v730_v34 = vsel %vm729_vm15, %v6507_v10, %v728_v8  ;;  %v749_v9 = vmul.f32 %v4214_v0, %v6520_v20  ;;  %v760_v46 = vand.u32 2147483648, %v6586_v5 }
 0x1b5   :  { %vm6596_vm4 = vcmp.lt.f32.partialorder %v1944_v58, 0.0004427343  ;;  %v1935_v19 = vand.u32 2147483647, %v3885_v42  ;;  %v6600_v47 = vclamps-f32 %v1196_v16, 0.9999999  ;;  %4229 = vrsqrt.f32 %v6586_v5 }
 0x1b6   :  { %4231 = vrcp.f32 %v1193_v44  ;;  %v1933_v1 = vadd.f32 1.0, %v1932_v59  ;;  %v2892_v26 = vmul.f32 -0.5, %v6573_v62  ;;  %v733_v21 = vsel %vm731_vm1, %v732_v53, %v730_v34 }
 0x1b7   :  { %v4218_v13 = vpop.eup %4217  ;;  %v1943_v31 = vmul.f32 %v6538_v35, %v1942_v29  ;;  %v2903_v2 = vmul.f32 %v2902_v52, %v2538_v57  ;;  %vm6607_vm5 = vcmp.lt.f32.partialorder %v2904_v12, 0.0004427343  ;;  %v1956_v15 = vadd.f32 1.0, %v6600_v47  ;;  %v4747_v35 = vld [vmem:[%s9156_s0 + $0x108] sm:$0xff] }
 0x1b8   :  { %vm743_vm6 = vcmp.eq.f32.partialorder %v6556_v22, inf  ;;  %v4220_v50 = vpop.eup %4219  ;;  %v1940_v33 = vmul.f32 0.6931472, %v4218_v13  ;;  %v6614_v7 = vsub.f32 0.0, %v6600_v47  ;;  %v1195_v27 = vmax.f32 %v733_v21, 1e-15 }
 0x1b9   :  { %v751_v10 = vsel %vm750_vm2, %v6520_v20, %v749_v9  ;;  %v4222_v63 = vpop.eup %4221  ;;  %v1324_v4 = vmul.f32 %v4747_v35, %v4216_v6  ;;  %vm6622_vm7 = vcmp.lt.f32.partialorder %v1935_v19, 0.0004427343  ;;  %v2895_v28 = vand.u32 2147483647, %v6573_v62 }
 0x1ba   :  { %4233 = vlog2.f32 %v1956_v15  ;;  %v2900_v36 = vmul.f32 0.6931472, %v4222_v63  ;;  %v1934_v23 = vmul.f32 %v3885_v42, %v1933_v1  ;;  %v2893_v30 = vadd.f32 1.0, %v2892_v26 }
 0x1bb   :  { %v2916_v24 = vadd.f32 1.0, %v6614_v7  ;;  %vm745_vm8 = vcmp.eq.f32.partialorder %v6556_v22, 0.0  ;;  %v4224_v57 = vpop.eup %4223  ;;  %4235 = vrcp.f32 %v1196_v16  ;;  %v6629_v41 = vclamps-f32 %v1195_v27, 0.9999999 }
 0x1bc   :  { %v6633_v39 = vsel %vm752_vm3, %v753_v51, %v751_v10  ;;  %v742_v60 = vmul.f32 %v4220_v50, %v6556_v22  ;;  %v4226_v43 = vpop.eup %4225  ;;  %v1946_v44 = vsel %vm6596_vm4, %v1943_v31, %v1940_v33  ;;  %v2906_v40 = vsel %vm6607_vm5, %v2903_v2, %v2900_v36 }
 0x1bd   :  { %v1959_v17 = vmul.f32 -0.5, %v6600_v47  ;;  %4237 = vlog2.f32 %v2916_v24  ;;  %v3498_v3 = vsub.f32 %v1946_v44, %v2906_v40  ;;  %v1931_v61 = vmul.f32 0.6931472, %v4226_v43 }
 0x1be   :  { %vm6641_vm9 = vcmp.lt.f32.partialorder %v2895_v28, 0.0004427343  ;;  %v1947_v20 = vadd.f32 1.0, %v6629_v41  ;;  %v4228_v45 = vpop.eup %4227  ;;  %v2894_v53 = vmul.f32 %v2893_v30, %v6573_v62  ;;  %v6648_v54 = vsub.f32 0.0, %v6629_v41 }
 0x1bf   :  { %v1198_v18 = vmax.f32 %v6633_v39, 1e-15  ;;  %v763_v56 = vmul.f32 %v4224_v57, %v6569_v37  ;;  %v6652_v48 = vpop.eup %4229  ;;  %v3594_v51 = vmul.f32 0.5, %v3498_v3  ;;  %v2891_v0 = vmul.f32 0.6931472, %v4228_v45 }
 0x1c0   :  { %v2919_v58 = vmul.f32 -0.5, %v6614_v7  ;;  %4239 = vlog2.f32 %v1947_v20  ;;  %v4232_v49 = vpop.eup %4231  ;;  %v1960_v8 = vadd.f32 1.0, %v1959_v17  ;;  %v1962_v59 = vand.u32 2147483647, %v6600_v47 }
 0x1c1   :  { %v2907_v62 = vadd.f32 1.0, %v6648_v54  ;;  %v744_v14 = vsel %vm743_vm6, %v6556_v22, %v742_v60  ;;  %vm764_vm10 = vcmp.eq.f32.partialorder %v6569_v37, inf  ;;  %v3690_v29 = vmul.f32 %v3594_v51, %v1324_v4 }
 0x1c2   :  { %v1937_v52 = vsel %vm6622_vm7, %v1934_v23, %v1931_v61  ;;  %v2897_v12 = vsel %vm6641_vm9, %v2894_v53, %v2891_v0  ;;  %4241 = vrcp.f32 %v1195_v27  ;;  %v1950_v6 = vmul.f32 -0.5, %v6629_v41 }
 0x1c3   :  { %v3497_v16 = vsub.f32 %v1937_v52, %v2897_v12  ;;  %4243 = vlog2.f32 %v2907_v62  ;;  %v6668_v34 = vclamps-f32 %v1198_v18, 0.9999999  ;;  %3786 = vst.msk [vmem:[%s9157_s1 + $0x108] sm:$0xff] %vm200_vm0, %v3690_v29  ;;  %v1322_v19 = vmul.f32 %v4748_v38, %v4232_v49  ;;  %v6748_v52 = vpop.xlane.xlu1 %325 }
 0x1c4   :  { %v4234_v9 = vpop.eup %4233  ;;  %v2920_v13 = vadd.f32 1.0, %v2919_v58  ;;  %v2922_v1 = vand.u32 2147483647, %v6614_v7  ;;  %v6682_v26 = vsel %vm745_vm8, %v746_v32, %v744_v14  ;;  %vm766_vm11 = vcmp.eq.f32.partialorder %v6569_v37, 0.0 }
 0x1c5   :  { %v3593_v21 = vmul.f32 0.5, %v3497_v16  ;;  %vm6685_vm12 = vcmp.lt.f32.partialorder %v1962_v59, 0.0004427343  ;;  %v2910_v2 = vmul.f32 -0.5, %v6648_v54  ;;  %v1974_v11 = vadd.f32 1.0, %v6668_v34  ;;  %v4236_v15 = vpop.eup %4235 }
 0x1c6   :  { %v1958_v50 = vmul.f32 0.6931472, %v4234_v9  ;;  %v1961_v33 = vmul.f32 %v6600_v47, %v1960_v8  ;;  %v6693_v27 = vsub.f32 0.0, %v6668_v34  ;;  %v1197_v22 = vmax.f32 %v6682_v26, 1e-15  ;;  %v4749_v47 = vld [vmem:[%s9156_s0 + $0x118] sm:$0xff] }
 0x1c7   :  { %v4238_v32 = vpop.eup %4237  ;;  %v3689_v10 = vmul.f32 %v3593_v21, %v1322_v19  ;;  %v1951_v63 = vadd.f32 1.0, %v1950_v6  ;;  %v1953_v35 = vand.u32 2147483647, %v6629_v41  ;;  %4245 = vlog2.f32 %v1974_v11  ;;  %v4750_v8 = vld [vmem:[%s9156_s0 + $0x110] sm:$0xff] }
 0x1c8   :  { %v2918_v4 = vmul.f32 0.6931472, %v4238_v32  ;;  %v2921_v25 = vmul.f32 %v2920_v13, %v6614_v7  ;;  %vm2923_vm13 = vcmp.lt.f32.partialorder %v2922_v1, 0.0004427343  ;;  %v2934_v28 = vadd.f32 1.0, %v6693_v27 }
 0x1c9   :  { %3785 = vst.msk [vmem:[%s9157_s1 + $0x100] sm:$0xff] %vm200_vm0, %v3689_v10  ;;  %v1328_v36 = vmul.f32 %v4749_v47, %v4236_v15  ;;  %v2911_v23 = vadd.f32 1.0, %v2910_v2  ;;  %v2913_v30 = vand.u32 2147483647, %v6648_v54  ;;  %v6707_v24 = vclamps-f32 %v1197_v22, 0.9999999 }
 0x1ca   :  { %v4240_v57 = vpop.eup %4239  ;;  %v1964_v7 = vsel %vm6685_vm12, %v1961_v33, %v1958_v50  ;;  %v2924_v60 = vsel %vm2923_vm13, %v2921_v25, %v2918_v4  ;;  %4247 = vlog2.f32 %v2934_v28  ;;  %v765_v43 = vsel %vm764_vm10, %v6569_v37, %v763_v56 }
 0x1cb   :  { %vm757_vm14 = vcmp.eq.f32.partialorder %v6586_v5, inf  ;;  %v3500_v44 = vsub.f32 %v1964_v7, %v2924_v60  ;;  %v1952_v40 = vmul.f32 %v6629_v41, %v1951_v63  ;;  %vm6716_vm15 = vcmp.lt.f32.partialorder %v1953_v35, 0.0004427343 }
 0x1cc   :  { %v1977_v3 = vmul.f32 -0.5, %v6668_v34  ;;  %v4242_v61 = vpop.eup %4241  ;;  %v1949_v42 = vmul.f32 0.6931472, %v4240_v57  ;;  %4249 = vrcp.f32 %v1198_v18  ;;  %v1965_v20 = vadd.f32 1.0, %v6707_v24 }
 0x1cd   :  { %v6725_v45 = vsub.f32 0.0, %v6707_v24  ;;  %v4244_v53 = vpop.eup %4243  ;;  %v3596_v56 = vmul.f32 0.5, %v3500_v44  ;;  %vm6727_vm1 = vcmp.lt.f32.partialorder %v2913_v30, 0.0004427343  ;;  %v2937_v51 = vmul.f32 -0.5, %v6693_v27 }
 0x1ce   :  { %v768_v0 = vsel %vm766_vm11, %v767_v55, %v765_v43  ;;  %vm759_vm2 = vcmp.eq.f32.partialorder %v6586_v5, 0.0  ;;  %v2909_v39 = vmul.f32 0.6931472, %v4244_v53  ;;  %v2912_v18 = vmul.f32 %v2911_v23, %v6648_v54  ;;  %v4751_v23 = vld [vmem:[%s9156_s0 + $0x128] sm:$0xff] }
 0x1cf   :  { %v1980_v58 = vand.u32 2147483647, %v6668_v34  ;;  %4251 = vlog2.f32 %v1965_v20  ;;  %v3692_v49 = vmul.f32 %v3596_v56, %v1328_v36  ;;  %v1326_v59 = vmul.f32 %v4750_v8, %v4242_v61 }
 0x1d0   :  { %v1978_v62 = vadd.f32 1.0, %v1977_v3  ;;  %v2925_v14 = vadd.f32 1.0, %v6725_v45  ;;  %v1955_v37 = vsel %vm6716_vm15, %v1952_v40, %v1949_v42  ;;  %v2915_v55 = vsel %vm6727_vm1, %v2912_v18, %v2909_v39 }
 0x1d1   :  { %v2940_v54 = vand.u32 2147483647, %v6693_v27  ;;  %v1200_v29 = vmax.f32 %v768_v0, 1e-15  ;;  %v4246_v12 = vpop.eup %4245  ;;  %3788 = vst.msk [vmem:[%s9157_s1 + $0x118] sm:$0xff] %vm200_vm0, %v3692_v49  ;;  %v3499_v16 = vsub.f32 %v1955_v37, %v2915_v55  ;;  %v2938_v6 = vadd.f32 1.0, %v2937_v51 }
 0x1d2   :  { %4253 = vlog2.f32 %v2925_v14  ;;  %v756_v9 = vmul.f32 %v6652_v48, %v6586_v5  ;;  %v1968_v38 = vmul.f32 -0.5, %v6707_v24  ;;  %v2928_v19 = vmul.f32 -0.5, %v6725_v45  ;;  %v4752_v37 = vld [vmem:[%s9156_s0 + $0x120] sm:$0xff] }
 0x1d3   :  { %4255 = vrcp.f32 %v1197_v22  ;;  %v6758_v13 = vclamps-f32 %v1200_v29, 0.9999999  ;;  %v3595_v1 = vmul.f32 0.5, %v3499_v16  ;;  %v1976_v26 = vmul.f32 0.6931472, %v4246_v12 }
 0x1d4   :  { %v758_v21 = vsel %vm757_vm14, %v6586_v5, %v756_v9  ;;  %4257 = vrsqrt.f32 %v6748_v52  ;;  %v4248_v31 = vpop.eup %4247  ;;  %v1979_v2 = vmul.f32 %v6668_v34, %v1978_v62  ;;  %vm6765_vm3 = vcmp.lt.f32.partialorder %v1980_v58, 0.0004427343  ;;  %v6827_v62 = vpop.xlane.xlu1 %331 }
 0x1d5   :  { %vm6769_vm4 = vcmp.lt.f32.partialorder %v2940_v54, 0.0004427343  ;;  %v1992_v15 = vadd.f32 1.0, %v6758_v13  ;;  %v3691_v50 = vmul.f32 %v3595_v1, %v1326_v59  ;;  %v2936_v33 = vmul.f32 0.6931472, %v4248_v31 }
 0x1d6   :  { %v2939_v22 = vmul.f32 %v2938_v6, %v6693_v27  ;;  %v6776_v32 = vsub.f32 0.0, %v6758_v13  ;;  %v4250_v10 = vpop.eup %4249  ;;  %v1969_v63 = vadd.f32 1.0, %v1968_v38  ;;  %v1971_v34 = vand.u32 2147483647, %v6707_v24 }
 0x1d7   :  { %4259 = vlog2.f32 %v1992_v15  ;;  %v6783_v35 = vsel %vm759_vm2, %v760_v46, %v758_v21  ;;  %3787 = vst.msk [vmem:[%s9157_s1 + $0x110] sm:$0xff] %vm200_vm0, %v3691_v50  ;;  %v1982_v27 = vsel %vm6765_vm3, %v1979_v2, %v1976_v26  ;;  %v2929_v25 = vadd.f32 1.0, %v2928_v19  ;;  %v6795_v46 = vpop.xlane.xlu0 %322 }
 0x1d8   :  { %v2942_v4 = vsel %vm6769_vm4, %v2939_v22, %v2936_v33  ;;  %v2952_v28 = vadd.f32 1.0, %v6776_v32  ;;  %v1199_v5 = vmax.f32 %v6783_v35, 1e-15  ;;  %v1332_v30 = vmul.f32 %v4751_v23, %v4250_v10 }
 0x1d9   :  { %v4252_v47 = vpop.eup %4251  ;;  %v3502_v36 = vsub.f32 %v1982_v27, %v2942_v4  ;;  %v2931_v57 = vand.u32 2147483647, %v6725_v45  ;;  %v1995_v7 = vmul.f32 -0.5, %v6758_v13  ;;  %v1970_v17 = vmul.f32 %v6707_v24, %v1969_v63 }
 0x1da   :  { %4261 = vlog2.f32 %v2952_v28  ;;  %v1967_v43 = vmul.f32 0.6931472, %v4252_v47  ;;  %v6802_v44 = vclamps-f32 %v1199_v5, 0.9999999  ;;  %vm6805_vm5 = vcmp.lt.f32.partialorder %v1971_v34, 0.0004427343 }
 0x1db   :  { %v3598_v60 = vmul.f32 0.5, %v3502_v36  ;;  %4263 = vrcp.f32 %v1200_v29  ;;  %v2930_v61 = vmul.f32 %v2929_v25, %v6725_v45  ;;  %v2955_v56 = vmul.f32 -0.5, %v6776_v32  ;;  %v6846_v48 = vpop.xlane.xlu0 %328  ;;  %v4753_v28 = vld [vmem:[%s9156_s0 + $0x138] sm:$0xff] }
 0x1dc   :  { %v4254_v40 = vpop.eup %4253  ;;  %4265 = vrsqrt.f32 %v6795_v46  ;;  %v1983_v41 = vadd.f32 1.0, %v6802_v44  ;;  %vm2932_vm6 = vcmp.lt.f32.partialorder %v2931_v57, 0.0004427343  ;;  %v1996_v0 = vadd.f32 1.0, %v1995_v7 }
 0x1dd   :  { %v4256_v42 = vpop.eup %4255  ;;  %v3694_v20 = vmul.f32 %v3598_v60, %v1332_v30  ;;  %v2927_v53 = vmul.f32 0.6931472, %v4254_v40  ;;  %v1998_v24 = vand.u32 2147483647, %v6758_v13  ;;  %v6815_v39 = vsub.f32 0.0, %v6802_v44  ;;  %v6873_v30 = vpop.xlane.xlu1 %337 }
 0x1de   :  { %v4258_v51 = vpop.eup %4257  ;;  %v1973_v45 = vsel %vm6805_vm5, %v1970_v17, %v1967_v43  ;;  %4267 = vlog2.f32 %v1983_v41  ;;  %v2958_v8 = vand.u32 2147483647, %v6776_v32  ;;  %vm778_vm7 = vcmp.eq.f32.partialorder %v6748_v52, inf }
 0x1df   :  { %3790 = vst.msk [vmem:[%s9157_s1 + $0x128] sm:$0xff] %vm200_vm0, %v3694_v20  ;;  %v2933_v18 = vsel %vm2932_vm6, %v2930_v61, %v2927_v53  ;;  %v777_v58 = vmul.f32 %v4258_v51, %v6748_v52  ;;  %v2943_v59 = vadd.f32 1.0, %v6815_v39  ;;  %v1330_v55 = vmul.f32 %v4752_v37, %v4256_v42 }
 0x1e0   :  { %v3501_v49 = vsub.f32 %v1973_v45, %v2933_v18  ;;  %v2956_v54 = vadd.f32 1.0, %v2955_v56  ;;  %v781_v12 = vand.u32 2147483648, %v6748_v52  ;;  %v1986_v6 = vmul.f32 -0.5, %v6802_v44 }
 0x1e1   :  { %v4260_v14 = vpop.eup %4259  ;;  %v779_v29 = vsel %vm778_vm7, %v6748_v52, %v777_v58  ;;  %4269 = vlog2.f32 %v2943_v59  ;;  %vm780_vm8 = vcmp.eq.f32.partialorder %v6748_v52, 0.0  ;;  %vm6836_vm9 = vcmp.lt.f32.partialorder %v1998_v24, 0.0004427343 }
 0x1e2   :  { %v3597_v16 = vmul.f32 0.5, %v3501_v49  ;;  %v1994_v9 = vmul.f32 0.6931472, %v4260_v14  ;;  %v782_v19 = vsel %vm780_vm8, %v781_v12, %v779_v29  ;;  %4271 = vrsqrt.f32 %v6827_v62  ;;  %v4754_v29 = vld [vmem:[%s9156_s0 + $0x130] sm:$0xff] }
 0x1e3   :  { %v1997_v21 = vmul.f32 %v6758_v13, %v1996_v0  ;;  %vm6842_vm10 = vcmp.lt.f32.partialorder %v2958_v8, 0.0004427343  ;;  %v1202_v2 = vmax.f32 %v782_v19, 1e-15  ;;  %v2957_v15 = vmul.f32 %v2956_v54, %v6776_v32 }
 0x1e4   :  { %v4262_v1 = vpop.eup %4261  ;;  %v3693_v26 = vmul.f32 %v3597_v16, %v1330_v55  ;;  %4273 = vrcp.f32 %v1199_v5  ;;  %v2946_v50 = vmul.f32 -0.5, %v6815_v39  ;;  %v1987_v13 = vadd.f32 1.0, %v1986_v6 }
 0x1e5   :  { %v4264_v52 = vpop.eup %4263  ;;  %v2954_v11 = vmul.f32 0.6931472, %v4262_v1  ;;  %v1989_v22 = vand.u32 2147483647, %v6802_v44  ;;  %v6855_v10 = vclamps-f32 %v1202_v2, 0.9999999  ;;  %v2000_v63 = vsel %vm6836_vm9, %v1997_v21, %v1994_v9  ;;  %v6920_v1 = vpop.xlane.xlu0 %334 }
 0x1e6   :  { %v4266_v33 = vpop.eup %4265  ;;  %3789 = vst.msk [vmem:[%s9157_s1 + $0x120] sm:$0xff] %vm200_vm0, %v3693_v26  ;;  %4275 = vrsqrt.f32 %v6846_v48  ;;  %v2949_v27 = vand.u32 2147483647, %v6815_v39  ;;  %vm771_vm11 = vcmp.eq.f32.partialorder %v6795_v46, inf  ;;  %v1336_v47 = vmul.f32 %v4753_v28, %v4264_v52 }
 0x1e7   :  { %v2960_v32 = vsel %vm6842_vm10, %v2957_v15, %v2954_v11  ;;  %v770_v34 = vmul.f32 %v4266_v33, %v6795_v46  ;;  %v2010_v4 = vadd.f32 1.0, %v6855_v10  ;;  %v2947_v36 = vadd.f32 1.0, %v2946_v50 }
 0x1e8   :  { %v3504_v35 = vsub.f32 %v2000_v63, %v2960_v32  ;;  %v4268_v25 = vpop.eup %4267  ;;  %v6870_v5 = vsub.f32 0.0, %v6855_v10  ;;  %vm6875_vm12 = vcmp.lt.f32.partialorder %v1989_v22, 0.0004427343  ;;  %v774_v60 = vand.u32 2147483648, %v6795_v46 }
 0x1e9   :  { %v772_v23 = vsel %vm771_vm11, %v6795_v46, %v770_v34  ;;  %4277 = vlog2.f32 %v2010_v4  ;;  %v1985_v43 = vmul.f32 0.6931472, %v4268_v25  ;;  %v1988_v40 = vmul.f32 %v6802_v44, %v1987_v13 }
 0x1ea   :  { %v3600_v57 = vmul.f32 0.5, %v3504_v35  ;;  %v2970_v17 = vadd.f32 1.0, %v6870_v5  ;;  %vm773_vm13 = vcmp.eq.f32.partialorder %v6795_v46, 0.0  ;;  %vm6883_vm14 = vcmp.lt.f32.partialorder %v2949_v27, 0.0004427343 }
 0x1eb   :  { %v4270_v3 = vpop.eup %4269  ;;  %v775_v20 = vsel %vm773_vm13, %v774_v60, %v772_v23  ;;  %4279 = vrsqrt.f32 %v6873_v30  ;;  %v2948_v41 = vmul.f32 %v2947_v36, %v6815_v39  ;;  %v2013_v51 = vmul.f32 -0.5, %v6855_v10 }
 0x1ec   :  { %v3696_v61 = vmul.f32 %v3600_v57, %v1336_v47  ;;  %v4272_v53 = vpop.eup %4271  ;;  %v2945_v56 = vmul.f32 0.6931472, %v4270_v3  ;;  %4281 = vlog2.f32 %v2970_v17  ;;  %v1201_v46 = vmax.f32 %v775_v20, 1e-15  ;;  %v4755_v57 = vld [vmem:[%s9156_s0 + $0x148] sm:$0xff] }
 0x1ed   :  { %4283 = vrcp.f32 %v1202_v2  ;;  %v791_v44 = vmul.f32 %v4272_v53, %v6827_v62  ;;  %vm792_vm15 = vcmp.eq.f32.partialorder %v6827_v62, inf  ;;  %v1991_v24 = vsel %vm6875_vm12, %v1988_v40, %v1985_v43 }
 0x1ee   :  { %3792 = vst.msk [vmem:[%s9157_s1 + $0x138] sm:$0xff] %vm200_vm0, %v3696_v61  ;;  %v4274_v0 = vpop.eup %4273  ;;  %v2951_v39 = vsel %vm6883_vm14, %v2948_v41, %v2945_v56  ;;  %v2973_v45 = vmul.f32 -0.5, %v6870_v5  ;;  %v795_v18 = vand.u32 2147483648, %v6827_v62  ;;  %v6902_v49 = vclamps-f32 %v1201_v46, 0.9999999 }
 0x1ef   :  { %v3503_v58 = vsub.f32 %v1991_v24, %v2951_v39  ;;  %v793_v8 = vsel %vm792_vm15, %v6827_v62, %v791_v44  ;;  %vm794_vm1 = vcmp.eq.f32.partialorder %v6827_v62, 0.0  ;;  %v2014_v14 = vadd.f32 1.0, %v2013_v51 }
 0x1f0   :  { %v4276_v59 = vpop.eup %4275  ;;  %v2016_v37 = vand.u32 2147483647, %v6855_v10  ;;  %v2976_v55 = vand.u32 2147483647, %v6870_v5  ;;  %v6908_v54 = vsel %vm794_vm1, %v795_v18, %v793_v8  ;;  %v1334_v12 = vmul.f32 %v4754_v29, %v4274_v0 }
 0x1f1   :  { %v3599_v16 = vmul.f32 0.5, %v3503_v58  ;;  %v2001_v6 = vadd.f32 1.0, %v6902_v49  ;;  %vm785_vm2 = vcmp.eq.f32.partialorder %v6846_v48, inf  ;;  %v2974_v9 = vadd.f32 1.0, %v2973_v45 }
 0x1f2   :  { %v6916_v62 = vsub.f32 0.0, %v6902_v49  ;;  %v1204_v38 = vmax.f32 %v6908_v54, 1e-15  ;;  %v784_v19 = vmul.f32 %v4276_v59, %v6846_v48  ;;  %vm787_vm3 = vcmp.eq.f32.partialorder %v6846_v48, 0.0 }
 0x1f3   :  { %v4278_v26 = vpop.eup %4277  ;;  %v3695_v21 = vmul.f32 %v3599_v16, %v1334_v12  ;;  %4285 = vlog2.f32 %v2001_v6  ;;  %v788_v31 = vand.u32 2147483648, %v6846_v48  ;;  %v2015_v2 = vmul.f32 %v6855_v10, %v2014_v14 }
 0x1f4   :  { %vm6925_vm4 = vcmp.lt.f32.partialorder %v2016_v37, 0.0004427343  ;;  %vm6929_vm5 = vcmp.lt.f32.partialorder %v2976_v55, 0.0004427343  ;;  %v2961_v15 = vadd.f32 1.0, %v6916_v62  ;;  %v786_v22 = vsel %vm785_vm2, %v6846_v48, %v784_v19 }
 0x1f5   :  { %v4280_v50 = vpop.eup %4279  ;;  %3791 = vst.msk [vmem:[%s9157_s1 + $0x130] sm:$0xff] %vm200_vm0, %v3695_v21  ;;  %v2012_v33 = vmul.f32 0.6931472, %v4278_v26  ;;  %v6938_v13 = vclamps-f32 %v1204_v38, 0.9999999  ;;  %4287 = vrsqrt.f32 %v6920_v1  ;;  %v2975_v63 = vmul.f32 %v2974_v9, %v6870_v5 }
 0x1f6   :  { %v4282_v10 = vpop.eup %4281  ;;  %4289 = vlog2.f32 %v2961_v15  ;;  %vm806_vm6 = vcmp.eq.f32.partialorder %v6873_v30, inf  ;;  %vm808_vm7 = vcmp.eq.f32.partialorder %v6873_v30, 0.0  ;;  %v2004_v35 = vmul.f32 -0.5, %v6902_v49 }
 0x1f7   :  { %v4284_v32 = vpop.eup %4283  ;;  %v2972_v34 = vmul.f32 0.6931472, %v4282_v10  ;;  %4291 = vrcp.f32 %v1201_v46  ;;  %v2028_v27 = vadd.f32 1.0, %v6938_v13  ;;  %v6950_v4 = vsub.f32 0.0, %v6938_v13 }
 0x1f8   :  { %v789_v25 = vsel %vm787_vm3, %v788_v31, %v786_v22  ;;  %v805_v28 = vmul.f32 %v4280_v50, %v6873_v30  ;;  %v809_v47 = vand.u32 2147483648, %v6873_v30  ;;  %v2018_v36 = vsel %vm6925_vm4, %v2015_v2, %v2012_v33  ;;  %v4756_v2 = vld [vmem:[%s9156_s0 + $0x140] sm:$0xff]  ;;  %v7016_v50 = vpop.xlane.xlu1 %343 }
 0x1f9   :  { %v2978_v5 = vsel %vm6929_vm5, %v2975_v63, %v2972_v34  ;;  %v2964_v23 = vmul.f32 -0.5, %v6916_v62  ;;  %4293 = vlog2.f32 %v2028_v27  ;;  %v1340_v7 = vmul.f32 %v4755_v57, %v4284_v32 }
 0x1fa   :  { %v3506_v48 = vsub.f32 %v2018_v36, %v2978_v5  ;;  %v2007_v60 = vand.u32 2147483647, %v6902_v49  ;;  %v2988_v43 = vadd.f32 1.0, %v6950_v4  ;;  %v2005_v40 = vadd.f32 1.0, %v2004_v35 }
 0x1fb   :  { %v2967_v17 = vand.u32 2147483647, %v6916_v62  ;;  %v1203_v3 = vmax.f32 %v789_v25, 1e-15  ;;  %v807_v61 = vsel %vm806_vm6, %v6873_v30, %v805_v28  ;;  %v2031_v20 = vmul.f32 -0.5, %v6938_v13 }
 0x1fc   :  { %v3602_v42 = vmul.f32 0.5, %v3506_v48  ;;  %4295 = vlog2.f32 %v2988_v43  ;;  %v810_v53 = vsel %vm808_vm7, %v809_v47, %v807_v61  ;;  %v2965_v41 = vadd.f32 1.0, %v2964_v23  ;;  %v4757_v61 = vld [vmem:[%s9156_s0 + $0x158] sm:$0xff] }
 0x1fd   :  { %v4286_v56 = vpop.eup %4285  ;;  %v6973_v51 = vclamps-f32 %v1203_v3, 0.9999999  ;;  %v1206_v46 = vmax.f32 %v810_v53, 1e-15  ;;  %v802_v44 = vand.u32 2147483648, %v6920_v1  ;;  %4297 = vrcp.f32 %v1204_v38 }
 0x1fe   :  { %v3698_v0 = vmul.f32 %v3602_v42, %v1340_v7  ;;  %v2034_v24 = vand.u32 2147483647, %v6938_v13  ;;  %v2991_v39 = vmul.f32 -0.5, %v6950_v4  ;;  %vm799_vm8 = vcmp.eq.f32.partialorder %v6920_v1, inf }
 0x1ff   :  { %v4288_v45 = vpop.eup %4287  ;;  %v2003_v18 = vmul.f32 0.6931472, %v4286_v56  ;;  %vm6979_vm9 = vcmp.lt.f32.partialorder %v2007_v60, 0.0004427343  ;;  %v2019_v58 = vadd.f32 1.0, %v6973_v51  ;;  %v6985_v8 = vsub.f32 0.0, %v6973_v51 }
 0x200   :  { %v4290_v59 = vpop.eup %4289  ;;  %3794 = vst.msk [vmem:[%s9157_s1 + $0x148] sm:$0xff] %vm200_vm0, %v3698_v0  ;;  %v2006_v14 = vmul.f32 %v6902_v49, %v2005_v40  ;;  %vm6992_vm10 = vcmp.lt.f32.partialorder %v2967_v17, 0.0004427343  ;;  %v2032_v55 = vadd.f32 1.0, %v2031_v20  ;;  %v6996_v54 = vclamps-f32 %v1206_v46, 0.9999999  ;;  %v7046_v17 = vpop.xlane.xlu0 %340 }
 0x201   :  { %vm801_vm11 = vcmp.eq.f32.partialorder %v6920_v1, 0.0  ;;  %v4292_v29 = vpop.eup %4291  ;;  %v2963_v12 = vmul.f32 0.6931472, %v4290_v59  ;;  %v2966_v16 = vmul.f32 %v2965_v41, %v6916_v62  ;;  %v2994_v6 = vand.u32 2147483647, %v6950_v4  ;;  %v7051_v20 = vpop.xlane.xlu1 %349 }
 0x202   :  { %4299 = vlog2.f32 %v2019_v58  ;;  %vm7001_vm12 = vcmp.lt.f32.partialorder %v2034_v24, 0.0004427343  ;;  %v2992_v49 = vadd.f32 1.0, %v2991_v39  ;;  %v2979_v38 = vadd.f32 1.0, %v6985_v8 }
 0x203   :  { %v2046_v19 = vadd.f32 1.0, %v6996_v54  ;;  %v4294_v26 = vpop.eup %4293  ;;  %v2009_v21 = vsel %vm6979_vm9, %v2006_v14, %v2003_v18  ;;  %v2969_v31 = vsel %vm6992_vm10, %v2966_v16, %v2963_v12  ;;  %4301 = vrcp.f32 %v1203_v3 }
 0x204   :  { %v798_v62 = vmul.f32 %v4288_v45, %v6920_v1  ;;  %v1338_v52 = vmul.f32 %v4756_v2, %v4292_v29  ;;  %v3505_v11 = vsub.f32 %v2009_v21, %v2969_v31  ;;  %v2033_v15 = vmul.f32 %v6938_v13, %v2032_v55  ;;  %v4759_v21 = vld [vmem:[%s9156_s0 + $0x168] sm:$0xff] }
 0x205   :  { %4303 = vlog2.f32 %v2979_v38  ;;  %v2030_v33 = vmul.f32 0.6931472, %v4294_v26  ;;  %vm7018_vm13 = vcmp.lt.f32.partialorder %v2994_v6, 0.0004427343  ;;  %v2022_v10 = vmul.f32 -0.5, %v6973_v51 }
 0x206   :  { %4305 = vrcp.f32 %v1206_v46  ;;  %v4296_v63 = vpop.eup %4295  ;;  %v3601_v32 = vmul.f32 0.5, %v3505_v11  ;;  %v2993_v34 = vmul.f32 %v2992_v49, %v6950_v4  ;;  %v7025_v35 = vsub.f32 0.0, %v6996_v54  ;;  %v4758_v49 = vld [vmem:[%s9156_s0 + $0x150] sm:$0xff] }
 0x207   :  { %4307 = vlog2.f32 %v2046_v19  ;;  %v2990_v13 = vmul.f32 0.6931472, %v4296_v63  ;;  %v2982_v27 = vmul.f32 -0.5, %v6985_v8  ;;  %v800_v25 = vsel %vm799_vm8, %v6920_v1, %v798_v62  ;;  %v4298_v28 = vpop.eup %4297 }
 0x208   :  { %4309 = vrsqrt.f32 %v7016_v50  ;;  %v3697_v47 = vmul.f32 %v3601_v32, %v1338_v52  ;;  %v2025_v36 = vand.u32 2147483647, %v6973_v51  ;;  %v2049_v5 = vmul.f32 -0.5, %v6996_v54 }
 0x209   :  { %v3006_v4 = vadd.f32 1.0, %v7025_v35  ;;  %v2036_v23 = vsel %vm7001_vm12, %v2033_v15, %v2030_v33  ;;  %v2996_v57 = vsel %vm7018_vm13, %v2993_v34, %v2990_v13  ;;  %v2023_v7 = vadd.f32 1.0, %v2022_v10  ;;  %v7105_v34 = vpop.xlane.xlu0 %346 }
 0x20a   :  { %v803_v48 = vsel %vm801_vm11, %v802_v44, %v800_v25  ;;  %3793 = vst.msk [vmem:[%s9157_s1 + $0x140] sm:$0xff] %vm200_vm0, %v3697_v47  ;;  %v3508_v60 = vsub.f32 %v2036_v23, %v2996_v57  ;;  %v2985_v43 = vand.u32 2147483647, %v6985_v8  ;;  %v1344_v42 = vmul.f32 %v4757_v61, %v4298_v28 }
 0x20b   :  { %4311 = vlog2.f32 %v3006_v4  ;;  %v1205_v40 = vmax.f32 %v803_v48, 1e-15  ;;  %v2983_v1 = vadd.f32 1.0, %v2982_v27  ;;  %v2050_v56 = vadd.f32 1.0, %v2049_v5 }
 0x20c   :  { %v4300_v3 = vpop.eup %4299  ;;  %v3604_v53 = vmul.f32 0.5, %v3508_v60  ;;  %v2052_v41 = vand.u32 2147483647, %v6996_v54  ;;  %v3009_v46 = vmul.f32 -0.5, %v7025_v35  ;;  %vm7055_vm14 = vcmp.lt.f32.partialorder %v2025_v36, 0.0004427343 }
 0x20d   :  { %v4302_v44 = vpop.eup %4301  ;;  %v2021_v0 = vmul.f32 0.6931472, %v4300_v3  ;;  %v7059_v39 = vclamps-f32 %v1205_v40, 0.9999999  ;;  %4313 = vrsqrt.f32 %v7046_v17  ;;  %v2024_v30 = vmul.f32 %v6973_v51, %v2023_v7 }
 0x20e   :  { %v3700_v18 = vmul.f32 %v3604_v53, %v1344_v42  ;;  %vm7063_vm15 = vcmp.lt.f32.partialorder %v2985_v43, 0.0004427343  ;;  %4315 = vrsqrt.f32 %v7051_v20  ;;  %v2984_v37 = vmul.f32 %v2983_v1, %v6985_v8  ;;  %v7126_v43 = vpop.xlane.xlu1 %355 }
 0x20f   :  { %v4304_v45 = vpop.eup %4303  ;;  %v3012_v55 = vand.u32 2147483647, %v7025_v35  ;;  %v2037_v29 = vadd.f32 1.0, %v7059_v39  ;;  %v2051_v51 = vmul.f32 %v6996_v54, %v2050_v56  ;;  %vm7076_vm1 = vcmp.lt.f32.partialorder %v2052_v41, 0.0004427343 }
 0x210   :  { %v4306_v59 = vpop.eup %4305  ;;  %v2981_v14 = vmul.f32 0.6931472, %v4304_v45  ;;  %3796 = vst.msk [vmem:[%s9157_s1 + $0x158] sm:$0xff] %vm200_vm0, %v3700_v18  ;;  %v3010_v6 = vadd.f32 1.0, %v3009_v46  ;;  %v7081_v9 = vsub.f32 0.0, %v7059_v39  ;;  %v1342_v38 = vmul.f32 %v4758_v49, %v4302_v44  ;;  %v4760_v49 = vld [vmem:[%s9156_s0 + $0x160] sm:$0xff] }
 0x211   :  { %v4308_v12 = vpop.eup %4307  ;;  %v2027_v19 = vsel %vm7055_vm14, %v2024_v30, %v2021_v0  ;;  %4317 = vlog2.f32 %v2037_v29  ;;  %v1348_v31 = vmul.f32 %v4759_v21, %v4306_v59  ;;  %vm820_vm2 = vcmp.eq.f32.partialorder %v7016_v50, inf }
 0x212   :  { %v4310_v8 = vpop.eup %4309  ;;  %v2987_v54 = vsel %vm7063_vm15, %v2984_v37, %v2981_v14  ;;  %v2997_v62 = vadd.f32 1.0, %v7081_v9  ;;  %v2048_v2 = vmul.f32 0.6931472, %v4308_v12  ;;  %vm7095_vm3 = vcmp.lt.f32.partialorder %v3012_v55, 0.0004427343 }
 0x213   :  { %v3507_v26 = vsub.f32 %v2027_v19, %v2987_v54  ;;  %v819_v11 = vmul.f32 %v4310_v8, %v7016_v50  ;;  %vm822_vm4 = vcmp.eq.f32.partialorder %v7016_v50, 0.0  ;;  %v3011_v22 = vmul.f32 %v3010_v6, %v7025_v35 }
 0x214   :  { %4319 = vlog2.f32 %v2997_v62  ;;  %v823_v10 = vand.u32 2147483648, %v7016_v50  ;;  %vm813_vm5 = vcmp.eq.f32.partialorder %v7046_v17, inf  ;;  %v2040_v27 = vmul.f32 -0.5, %v7059_v39 }
 0x215   :  { %v4312_v15 = vpop.eup %4311  ;;  %v3603_v33 = vmul.f32 0.5, %v3507_v26  ;;  %4321 = vrcp.f32 %v1205_v40  ;;  %v821_v32 = vsel %vm820_vm2, %v7016_v50, %v819_v11  ;;  %v3000_v25 = vmul.f32 -0.5, %v7081_v9  ;;  %v7168_v26 = vpop.xlane.xlu0 %352 }
 0x216   :  { %v3008_v63 = vmul.f32 0.6931472, %v4312_v15  ;;  %v824_v28 = vsel %vm822_vm4, %v823_v10, %v821_v32  ;;  %v2054_v35 = vsel %vm7076_vm1, %v2051_v51, %v2048_v2  ;;  %vm815_vm6 = vcmp.eq.f32.partialorder %v7046_v17, 0.0 }
 0x217   :  { %v3699_v13 = vmul.f32 %v3603_v33, %v1342_v38  ;;  %v4314_v47 = vpop.eup %4313  ;;  %v1208_v5 = vmax.f32 %v824_v28, 1e-15  ;;  %v816_v57 = vand.u32 2147483648, %v7046_v17  ;;  %4323 = vrsqrt.f32 %v7105_v34 }
 0x218   :  { %v3014_v36 = vsel %vm7095_vm3, %v3011_v22, %v3008_v63  ;;  %v4316_v50 = vpop.eup %4315  ;;  %v812_v23 = vmul.f32 %v4314_v47, %v7046_v17  ;;  %v2043_v7 = vand.u32 2147483647, %v7059_v39  ;;  %vm834_vm7 = vcmp.eq.f32.partialorder %v7051_v20, inf }
 0x219   :  { %3795 = vst.msk [vmem:[%s9157_s1 + $0x150] sm:$0xff] %vm200_vm0, %v3699_v13  ;;  %v3510_v4 = vsub.f32 %v2054_v35, %v3014_v36  ;;  %v7122_v48 = vclamps-f32 %v1208_v5, 0.9999999  ;;  %v833_v60 = vmul.f32 %v4316_v50, %v7051_v20  ;;  %v2041_v3 = vadd.f32 1.0, %v2040_v27 }
 0x21a   :  { %v3001_v61 = vadd.f32 1.0, %v3000_v25  ;;  %v814_v42 = vsel %vm813_vm5, %v7046_v17, %v812_v23  ;;  %v3003_v53 = vand.u32 2147483647, %v7081_v9  ;;  %vm836_vm8 = vcmp.eq.f32.partialorder %v7051_v20, 0.0 }
 0x21b   :  { %v3606_v40 = vmul.f32 0.5, %v3510_v4  ;;  %v4318_v1 = vpop.eup %4317  ;;  %v2064_v56 = vadd.f32 1.0, %v7122_v48  ;;  %v7134_v41 = vsub.f32 0.0, %v7122_v48  ;;  %v817_v44 = vsel %vm815_vm6, %v816_v57, %v814_v42 }
 0x21c   :  { %v835_v0 = vsel %vm834_vm7, %v7051_v20, %v833_v60  ;;  %4325 = vrsqrt.f32 %v7126_v43  ;;  %v2039_v24 = vmul.f32 0.6931472, %v4318_v1  ;;  %v837_v18 = vand.u32 2147483648, %v7051_v20 }
 0x21d   :  { %v3702_v46 = vmul.f32 %v3606_v40, %v1348_v31  ;;  %4327 = vlog2.f32 %v2064_v56  ;;  %v3024_v45 = vadd.f32 1.0, %v7134_v41  ;;  %v2042_v58 = vmul.f32 %v7059_v39, %v2041_v3 }
 0x21e   :  { %v4320_v30 = vpop.eup %4319  ;;  %vm7148_vm9 = vcmp.lt.f32.partialorder %v2043_v7, 0.0004427343  ;;  %v3002_v59 = vmul.f32 %v3001_v61, %v7081_v9  ;;  %v1207_v14 = vmax.f32 %v817_v44, 1e-15  ;;  %v2067_v29 = vmul.f32 -0.5, %v7122_v48 }
 0x21f   :  { %3798 = vst.msk [vmem:[%s9157_s1 + $0x168] sm:$0xff] %vm200_vm0, %v3702_v46  ;;  %v4322_v37 = vpop.eup %4321  ;;  %v2999_v55 = vmul.f32 0.6931472, %v4320_v30  ;;  %4329 = vlog2.f32 %v3024_v45  ;;  %v838_v12 = vsel %vm836_vm8, %v837_v18, %v835_v0  ;;  %vm3004_vm10 = vcmp.lt.f32.partialorder %v3003_v53, 0.0004427343  ;;  %v4761_v46 = vld [vmem:[%s9156_s0 + $0x178] sm:$0xff] }
 0x220   :  { %4331 = vrcp.f32 %v1208_v5  ;;  %v7156_v51 = vclamps-f32 %v1207_v14, 0.9999999  ;;  %vm827_vm11 = vcmp.eq.f32.partialorder %v7105_v34, inf  ;;  %v2045_v39 = vsel %vm7148_vm9, %v2042_v58, %v2039_v24 }
 0x221   :  { %v3005_v16 = vsel %vm3004_vm10, %v3002_v59, %v2999_v55  ;;  %v3027_v6 = vmul.f32 -0.5, %v7134_v41  ;;  %v1210_v9 = vmax.f32 %v838_v12, 1e-15  ;;  %v4324_v8 = vpop.eup %4323  ;;  %v1346_v20 = vmul.f32 %v4760_v49, %v4322_v37 }
 0x222   :  { %v3509_v38 = vsub.f32 %v2045_v39, %v3005_v16  ;;  %v2055_v19 = vadd.f32 1.0, %v7156_v51  ;;  %vm829_vm12 = vcmp.eq.f32.partialorder %v7105_v34, 0.0  ;;  %v830_v54 = vand.u32 2147483648, %v7105_v34 }
 0x223   :  { %v2068_v21 = vadd.f32 1.0, %v2067_v29  ;;  %v2070_v31 = vand.u32 2147483647, %v7122_v48  ;;  %v7172_v62 = vsub.f32 0.0, %v7156_v51  ;;  %v7174_v2 = vclamps-f32 %v1210_v9, 0.9999999 }
 0x224   :  { %v3605_v52 = vmul.f32 0.5, %v3509_v38  ;;  %v3030_v11 = vand.u32 2147483647, %v7134_v41  ;;  %4333 = vlog2.f32 %v2055_v19  ;;  %vm848_vm13 = vcmp.eq.f32.partialorder %v7126_v43, inf }
 0x225   :  { %v3028_v15 = vadd.f32 1.0, %v3027_v6  ;;  %v3015_v33 = vadd.f32 1.0, %v7172_v62  ;;  %v826_v22 = vmul.f32 %v4324_v8, %v7105_v34  ;;  %4335 = vrsqrt.f32 %v7168_v26 }
 0x226   :  { %v4326_v10 = vpop.eup %4325  ;;  %v3701_v63 = vmul.f32 %v3605_v52, %v1346_v20  ;;  %4337 = vrcp.f32 %v1207_v14  ;;  %v2082_v32 = vadd.f32 1.0, %v7174_v2  ;;  %vm850_vm14 = vcmp.eq.f32.partialorder %v7126_v43, 0.0 }
 0x227   :  { %v4328_v13 = vpop.eup %4327  ;;  %v2069_v27 = vmul.f32 %v7122_v48, %v2068_v21  ;;  %vm7184_vm15 = vcmp.lt.f32.partialorder %v2070_v31, 0.0004427343  ;;  %4339 = vlog2.f32 %v3015_v33  ;;  %v851_v28 = vand.u32 2147483648, %v7126_v43 }
 0x228   :  { %3797 = vst.msk [vmem:[%s9157_s1 + $0x160] sm:$0xff] %vm200_vm0, %v3701_v63  ;;  %v2066_v47 = vmul.f32 0.6931472, %v4328_v13  ;;  %vm7193_vm1 = vcmp.lt.f32.partialorder %v3030_v11, 0.0004427343  ;;  %4341 = vlog2.f32 %v2082_v32  ;;  %v7198_v36 = vsub.f32 0.0, %v7174_v2 }
 0x229   :  { %v4330_v5 = vpop.eup %4329  ;;  %v3029_v50 = vmul.f32 %v3028_v15, %v7134_v41  ;;  %v2058_v4 = vmul.f32 -0.5, %v7156_v51  ;;  %v828_v23 = vsel %vm827_vm11, %v7105_v34, %v826_v22  ;;  %v847_v57 = vmul.f32 %v4326_v10, %v7126_v43  ;;  %v4762_v10 = vld [vmem:[%s9156_s0 + $0x170] sm:$0xff] }
 0x22a   :  { %v4332_v7 = vpop.eup %4331  ;;  %v3026_v48 = vmul.f32 0.6931472, %v4330_v5  ;;  %v2061_v60 = vand.u32 2147483647, %v7156_v51  ;;  %v3018_v40 = vmul.f32 -0.5, %v7172_v62  ;;  %v3042_v3 = vadd.f32 1.0, %v7198_v36 }
 0x22b   :  { %v2072_v61 = vsel %vm7184_vm15, %v2069_v27, %v2066_v47  ;;  %4343 = vrcp.f32 %v1210_v9  ;;  %v2085_v42 = vmul.f32 -0.5, %v7174_v2  ;;  %v831_v1 = vsel %vm829_vm12, %v830_v54, %v828_v23  ;;  %v7262_v47 = vpop.xlane.xlu1 %361 }
 0x22c   :  { %v3032_v53 = vsel %vm7193_vm1, %v3029_v50, %v3026_v48  ;;  %4345 = vlog2.f32 %v3042_v3  ;;  %v1209_v56 = vmax.f32 %v831_v1, 1e-15  ;;  %v849_v41 = vsel %vm848_vm13, %v7126_v43, %v847_v57 }
 0x22d   :  { %v1352_v44 = vmul.f32 %v4761_v46, %v4332_v7  ;;  %v3512_v0 = vsub.f32 %v2072_v61, %v3032_v53  ;;  %v2059_v24 = vadd.f32 1.0, %v2058_v4  ;;  %v852_v34 = vsel %vm850_vm14, %v851_v28, %v849_v41 }
 0x22e   :  { %v4334_v45 = vpop.eup %4333  ;;  %v3019_v18 = vadd.f32 1.0, %v3018_v40  ;;  %v3045_v30 = vmul.f32 -0.5, %v7198_v36  ;;  %v7225_v58 = vclamps-f32 %v1209_v56, 0.9999999  ;;  %v1212_v17 = vmax.f32 %v852_v34, 1e-15 }
 0x22f   :  { %v4336_v59 = vpop.eup %4335  ;;  %v3608_v14 = vmul.f32 0.5, %v3512_v0  ;;  %v3021_v37 = vand.u32 2147483647, %v7172_v62  ;;  %v2086_v55 = vadd.f32 1.0, %v2085_v42  ;;  %v2088_v29 = vand.u32 2147483647, %v7174_v2 }
 0x230   :  { %v4338_v12 = vpop.eup %4337  ;;  %v2057_v39 = vmul.f32 0.6931472, %v4334_v45  ;;  %v2073_v16 = vadd.f32 1.0, %v7225_v58  ;;  %v7231_v43 = vsub.f32 0.0, %v7225_v58  ;;  %v2060_v8 = vmul.f32 %v7156_v51, %v2059_v24  ;;  %v4763_v40 = vld [vmem:[%s9156_s0 + $0x188] sm:$0xff]  ;;  %v7288_v24 = vpop.xlane.xlu1 %367 }
 0x231   :  { %v4340_v6 = vpop.eup %4339  ;;  %v3704_v9 = vmul.f32 %v3608_v14, %v1352_v44  ;;  %vm7234_vm2 = vcmp.lt.f32.partialorder %v2061_v60, 0.0004427343  ;;  %v7238_v20 = vclamps-f32 %v1212_v17, 0.9999999  ;;  %vm841_vm3 = vcmp.eq.f32.partialorder %v7168_v26, inf }
 0x232   :  { %v4342_v38 = vpop.eup %4341  ;;  %v3017_v19 = vmul.f32 0.6931472, %v4340_v6  ;;  %v3020_v54 = vmul.f32 %v3019_v18, %v7172_v62  ;;  %v3046_v21 = vadd.f32 1.0, %v3045_v30  ;;  %4347 = vlog2.f32 %v2073_v16 }
 0x233   :  { %3800 = vst.msk [vmem:[%s9157_s1 + $0x178] sm:$0xff] %vm200_vm0, %v3704_v9  ;;  %vm3022_vm4 = vcmp.lt.f32.partialorder %v3021_v37, 0.0004427343  ;;  %v2087_v51 = vmul.f32 %v7174_v2, %v2086_v55  ;;  %vm7247_vm5 = vcmp.lt.f32.partialorder %v2088_v29, 0.0004427343  ;;  %v3033_v52 = vadd.f32 1.0, %v7231_v43 }
 0x234   :  { %v2063_v11 = vsel %vm7234_vm2, %v2060_v8, %v2057_v39  ;;  %v3023_v62 = vsel %vm3022_vm4, %v3020_v54, %v3017_v19  ;;  %v3048_v15 = vand.u32 2147483647, %v7198_v36  ;;  %v2100_v33 = vadd.f32 1.0, %v7238_v20 }
 0x235   :  { %v4344_v22 = vpop.eup %4343  ;;  %v1350_v2 = vmul.f32 %v4762_v10, %v4338_v12  ;;  %v3511_v63 = vsub.f32 %v2063_v11, %v3023_v62  ;;  %v2084_v32 = vmul.f32 0.6931472, %v4342_v38  ;;  %4349 = vlog2.f32 %v3033_v52 }
 0x236   :  { %v4346_v13 = vpop.eup %4345  ;;  %v3047_v27 = vmul.f32 %v3046_v21, %v7198_v36  ;;  %4351 = vrcp.f32 %v1209_v56  ;;  %v2076_v25 = vmul.f32 -0.5, %v7225_v58  ;;  %v840_v28 = vmul.f32 %v4336_v59, %v7168_v26  ;;  %v7269_v36 = vpop.xlane.xlu0 %358 }
 0x237   :  { %v3607_v35 = vmul.f32 0.5, %v3511_v63  ;;  %v3044_v5 = vmul.f32 0.6931472, %v4346_v13  ;;  %4353 = vlog2.f32 %v2100_v33  ;;  %v7265_v50 = vsub.f32 0.0, %v7238_v20  ;;  %v4765_v33 = vld [vmem:[%s9156_s0 + $0x198] sm:$0xff] }
 0x238   :  { %vm3049_vm6 = vcmp.lt.f32.partialorder %v3048_v15, 0.0004427343  ;;  %v3036_v4 = vmul.f32 -0.5, %v7231_v43  ;;  %4355 = vrcp.f32 %v1212_v17  ;;  %v2103_v23 = vmul.f32 -0.5, %v7238_v20 }
 0x239   :  { %v3703_v57 = vmul.f32 %v3607_v35, %v1350_v2  ;;  %v2090_v7 = vsel %vm7247_vm5, %v2087_v51, %v2084_v32  ;;  %v3050_v48 = vsel %vm3049_vm6, %v3047_v27, %v3044_v5  ;;  %v3060_v60 = vadd.f32 1.0, %v7265_v50 }
 0x23a   :  { %v1356_v3 = vmul.f32 %v4763_v40, %v4344_v22  ;;  %v3514_v61 = vsub.f32 %v2090_v7, %v3050_v48  ;;  %v842_v42 = vsel %vm841_vm3, %v7168_v26, %v840_v28  ;;  %v2077_v1 = vadd.f32 1.0, %v2076_v25  ;;  %v7293_v14 = vpop.xlane.xlu0 %364 }
 0x23b   :  { %3799 = vst.msk [vmem:[%s9157_s1 + $0x170] sm:$0xff] %vm200_vm0, %v3703_v57  ;;  %v2079_v53 = vand.u32 2147483647, %v7225_v58  ;;  %4357 = vlog2.f32 %v3060_v60  ;;  %v844_v56 = vand.u32 2147483648, %v7168_v26  ;;  %v3037_v44 = vadd.f32 1.0, %v3036_v4 }
 0x23c   :  { %v4348_v41 = vpop.eup %4347  ;;  %v3610_v46 = vmul.f32 0.5, %v3514_v61  ;;  %v3039_v0 = vand.u32 2147483647, %v7231_v43  ;;  %vm843_vm7 = vcmp.eq.f32.partialorder %v7168_v26, 0.0  ;;  %v2104_v34 = vadd.f32 1.0, %v2103_v23 }
 0x23d   :  { %v3063_v45 = vmul.f32 -0.5, %v7265_v50  ;;  %v845_v18 = vsel %vm843_vm7, %v844_v56, %v842_v42  ;;  %4359 = vrsqrt.f32 %v7262_v47  ;;  %v2075_v17 = vmul.f32 0.6931472, %v4348_v41  ;;  %v7358_v56 = vpop.xlane.xlu1 %373 }
 0x23e   :  { %v3706_v30 = vmul.f32 %v3610_v46, %v1356_v3  ;;  %v1211_v59 = vmax.f32 %v845_v18, 1e-15  ;;  %4361 = vrsqrt.f32 %v7269_v36  ;;  %vm7295_vm8 = vcmp.lt.f32.partialorder %v2079_v53, 0.0004427343 }
 0x23f   :  { %v4350_v37 = vpop.eup %4349  ;;  %v2106_v26 = vand.u32 2147483647, %v7238_v20  ;;  %4363 = vrsqrt.f32 %v7288_v24  ;;  %v2078_v12 = vmul.f32 %v7225_v58, %v2077_v1  ;;  %v3038_v16 = vmul.f32 %v3037_v44, %v7231_v43  ;;  %v4764_v43 = vld [vmem:[%s9156_s0 + $0x180] sm:$0xff] }
 0x240   :  { %v4352_v29 = vpop.eup %4351  ;;  %3802 = vst.msk [vmem:[%s9157_s1 + $0x188] sm:$0xff] %vm200_vm0, %v3706_v30  ;;  %v3035_v39 = vmul.f32 0.6931472, %v4350_v37  ;;  %v7307_v6 = vclamps-f32 %v1211_v59, 0.9999999  ;;  %v2105_v8 = vmul.f32 %v7238_v20, %v2104_v34  ;;  %4365 = vrsqrt.f32 %v7293_v14 }
 0x241   :  { %v4354_v9 = vpop.eup %4353  ;;  %vm3040_vm9 = vcmp.lt.f32.partialorder %v3039_v0, 0.0004427343  ;;  %v3066_v49 = vand.u32 2147483647, %v7265_v50  ;;  %v2081_v19 = vsel %vm7295_vm8, %v2078_v12, %v2075_v17  ;;  %v3064_v21 = vadd.f32 1.0, %v3063_v45 }
 0x242   :  { %v4356_v38 = vpop.eup %4355  ;;  %v3041_v54 = vsel %vm3040_vm9, %v3038_v16, %v3035_v39  ;;  %v2091_v58 = vadd.f32 1.0, %v7307_v6  ;;  %v1354_v51 = vmul.f32 %v4764_v43, %v4352_v29  ;;  %vm7318_vm10 = vcmp.lt.f32.partialorder %v2106_v26, 0.0004427343 }
 0x243   :  { %v3513_v31 = vsub.f32 %v2081_v19, %v3041_v54  ;;  %v7323_v52 = vsub.f32 0.0, %v7307_v6  ;;  %v2102_v11 = vmul.f32 0.6931472, %v4354_v9  ;;  %vm862_vm11 = vcmp.eq.f32.partialorder %v7262_v47, inf }
 0x244   :  { %4367 = vlog2.f32 %v2091_v58  ;;  %vm864_vm12 = vcmp.eq.f32.partialorder %v7262_v47, 0.0  ;;  %v1360_v22 = vmul.f32 %v4765_v33, %v4356_v38  ;;  %v865_v2 = vand.u32 2147483648, %v7262_v47 }
 0x245   :  { %v4358_v62 = vpop.eup %4357  ;;  %v3609_v15 = vmul.f32 0.5, %v3513_v31  ;;  %v3051_v10 = vadd.f32 1.0, %v7323_v52  ;;  %v3065_v32 = vmul.f32 %v3064_v21, %v7265_v50  ;;  %vm3067_vm13 = vcmp.lt.f32.partialorder %v3066_v49, 0.0004427343 }
 0x246   :  { %v3062_v63 = vmul.f32 0.6931472, %v4358_v62  ;;  %vm855_vm14 = vcmp.eq.f32.partialorder %v7269_v36, inf  ;;  %vm857_vm15 = vcmp.eq.f32.partialorder %v7269_v36, 0.0  ;;  %v858_v25 = vand.u32 2147483648, %v7269_v36 }
 0x247   :  { %v4360_v13 = vpop.eup %4359  ;;  %v3705_v27 = vmul.f32 %v3609_v15, %v1354_v51  ;;  %4369 = vlog2.f32 %v3051_v10  ;;  %v2108_v35 = vsel %vm7318_vm10, %v2105_v8, %v2102_v11  ;;  %v2094_v57 = vmul.f32 -0.5, %v7307_v6 }
 0x248   :  { %v4362_v28 = vpop.eup %4361  ;;  %v3068_v5 = vsel %vm3067_vm13, %v3065_v32, %v3062_v63  ;;  %4371 = vrcp.f32 %v1211_v59  ;;  %v861_v4 = vmul.f32 %v4360_v13, %v7262_v47  ;;  %v3054_v7 = vmul.f32 -0.5, %v7323_v52 }
 0x249   :  { %v4364_v23 = vpop.eup %4363  ;;  %3801 = vst.msk [vmem:[%s9157_s1 + $0x180] sm:$0xff] %vm200_vm0, %v3705_v27  ;;  %v3516_v50 = vsub.f32 %v2108_v35, %v3068_v5  ;;  %v854_v48 = vmul.f32 %v4362_v28, %v7269_v36  ;;  %vm876_vm1 = vcmp.eq.f32.partialorder %v7288_v24, inf  ;;  %vm878_vm2 = vcmp.eq.f32.partialorder %v7288_v24, 0.0 }
 0x24a   :  { %v863_v60 = vsel %vm862_vm11, %v7262_v47, %v861_v4  ;;  %v875_v40 = vmul.f32 %v4364_v23, %v7288_v24  ;;  %v4366_v3 = vpop.eup %4365  ;;  %v2097_v42 = vand.u32 2147483647, %v7307_v6  ;;  %v879_v0 = vand.u32 2147483648, %v7288_v24  ;;  %v7364_v47 = vpop.xlane.xlu0 %370 }
 0x24b   :  { %v3612_v61 = vmul.f32 0.5, %v3516_v50  ;;  %v866_v1 = vsel %vm864_vm12, %v865_v2, %v863_v60  ;;  %v856_v53 = vsel %vm855_vm14, %v7269_v36, %v854_v48  ;;  %v2095_v45 = vadd.f32 1.0, %v2094_v57 }
 0x24c   :  { %v1214_v41 = vmax.f32 %v866_v1, 1e-15  ;;  %v859_v46 = vsel %vm857_vm15, %v858_v25, %v856_v53  ;;  %v877_v44 = vsel %vm876_vm1, %v7288_v24, %v875_v40  ;;  %v3055_v18 = vadd.f32 1.0, %v3054_v7 }
 0x24d   :  { %v3708_v34 = vmul.f32 %v3612_v61, %v1360_v22  ;;  %v1213_v30 = vmax.f32 %v859_v46, 1e-15  ;;  %v868_v37 = vmul.f32 %v4366_v3, %v7293_v14  ;;  %vm869_vm3 = vcmp.eq.f32.partialorder %v7293_v14, inf  ;;  %v4766_v22 = vld [vmem:[%s9156_s0 + $0x190] sm:$0xff] }
 0x24e   :  { %v4368_v17 = vpop.eup %4367  ;;  %v7366_v59 = vclamps-f32 %v1214_v41, 0.9999999  ;;  %4373 = vrsqrt.f32 %v7358_v56  ;;  %vm7375_vm4 = vcmp.lt.f32.partialorder %v2097_v42, 0.0004427343  ;;  %v3057_v55 = vand.u32 2147483647, %v7323_v52 }
 0x24f   :  { %3804 = vst.msk [vmem:[%s9157_s1 + $0x198] sm:$0xff] %vm200_vm0, %v3708_v34  ;;  %v7380_v26 = vclamps-f32 %v1213_v30, 0.9999999  ;;  %v7384_v29 = vsel %vm878_vm2, %v879_v0, %v877_v44  ;;  %v2093_v12 = vmul.f32 0.6931472, %v4368_v17  ;;  %4375 = vrsqrt.f32 %v7364_v47 }
 0x250   :  { %v2118_v39 = vadd.f32 1.0, %v7366_v59  ;;  %v7388_v16 = vsub.f32 0.0, %v7366_v59  ;;  %v2096_v8 = vmul.f32 %v7307_v6, %v2095_v45  ;;  %v3056_v49 = vmul.f32 %v3055_v18, %v7323_v52 }
 0x251   :  { %v4370_v9 = vpop.eup %4369  ;;  %4377 = vrcp.f32 %v1214_v41  ;;  %v2109_v38 = vadd.f32 1.0, %v7380_v26  ;;  %v1216_v54 = vmax.f32 %v7384_v29, 1e-15  ;;  %v870_v21 = vsel %vm869_vm3, %v7293_v14, %v868_v37 }
 0x252   :  { %v4372_v19 = vpop.eup %4371  ;;  %v3053_v24 = vmul.f32 0.6931472, %v4370_v9  ;;  %4379 = vlog2.f32 %v2118_v39  ;;  %vm3058_vm5 = vcmp.lt.f32.partialorder %v3057_v55, 0.0004427343  ;;  %v3078_v58 = vadd.f32 1.0, %v7388_v16 }
 0x253   :  { %4381 = vrcp.f32 %v1213_v30  ;;  %v872_v6 = vand.u32 2147483648, %v7293_v14  ;;  %v2099_v43 = vsel %vm7375_vm4, %v2096_v8, %v2093_v12  ;;  %vm871_vm6 = vcmp.eq.f32.partialorder %v7293_v14, 0.0 }
 0x254   :  { %v3059_v51 = vsel %vm3058_vm5, %v3056_v49, %v3053_v24  ;;  %4383 = vlog2.f32 %v2109_v38  ;;  %v2121_v20 = vmul.f32 -0.5, %v7366_v59  ;;  %v3081_v11 = vmul.f32 -0.5, %v7388_v16 }
 0x255   :  { %v3515_v31 = vsub.f32 %v2099_v43, %v3059_v51  ;;  %4385 = vlog2.f32 %v3078_v58  ;;  %v7404_v52 = vsel %vm871_vm6, %v872_v6, %v870_v21  ;;  %v2112_v62 = vmul.f32 -0.5, %v7380_v26  ;;  %v4768_v21 = vld [vmem:[%s9156_s0 + $0x1a0] sm:$0xff] }
 0x256   :  { %v7409_v15 = vsub.f32 0.0, %v7380_v26  ;;  %v7411_v33 = vclamps-f32 %v1216_v54, 0.9999999  ;;  %v1358_v14 = vmul.f32 %v4766_v22, %v4372_v19  ;;  %v2124_v63 = vand.u32 2147483647, %v7366_v59 }
 0x257   :  { %v3611_v10 = vmul.f32 0.5, %v3515_v31  ;;  %v1215_v27 = vmax.f32 %v7404_v52, 1e-15  ;;  %v2122_v28 = vadd.f32 1.0, %v2121_v20  ;;  %v3084_v35 = vand.u32 2147483647, %v7388_v16 }
 0x258   :  { %v4374_v2 = vpop.eup %4373  ;;  %v3069_v32 = vadd.f32 1.0, %v7409_v15  ;;  %v2136_v13 = vadd.f32 1.0, %v7411_v33  ;;  %v2115_v5 = vand.u32 2147483647, %v7380_v26  ;;  %v3082_v23 = vadd.f32 1.0, %v3081_v11 }
 0x259   :  { %v3707_v25 = vmul.f32 %v3611_v10, %v1358_v14  ;;  %v4376_v4 = vpop.eup %4375  ;;  %v2113_v50 = vadd.f32 1.0, %v2112_v62  ;;  %vm890_vm7 = vcmp.eq.f32.partialorder %v7358_v56, inf  ;;  %v7428_v7 = vsub.f32 0.0, %v7411_v33 }
 0x25a   :  { %4387 = vlog2.f32 %v3069_v32  ;;  %v889_v48 = vmul.f32 %v4374_v2, %v7358_v56  ;;  %vm892_vm8 = vcmp.eq.f32.partialorder %v7358_v56, 0.0  ;;  %vm7432_vm9 = vcmp.lt.f32.partialorder %v2124_v63, 0.0004427343 }
 0x25b   :  { %v4378_v57 = vpop.eup %4377  ;;  %3803 = vst.msk [vmem:[%s9157_s1 + $0x190] sm:$0xff] %vm200_vm0, %v3707_v25  ;;  %4389 = vlog2.f32 %v2136_v13  ;;  %v3072_v3 = vmul.f32 -0.5, %v7409_v15  ;;  %v7439_v61 = vclamps-f32 %v1215_v27, 0.9999999  ;;  %v893_v42 = vand.u32 2147483648, %v7358_v56 }
 0x25c   :  { %v4380_v60 = vpop.eup %4379  ;;  %v2123_v41 = vmul.f32 %v7366_v59, %v2122_v28  ;;  %vm7443_vm10 = vcmp.lt.f32.partialorder %v3084_v35, 0.0004427343  ;;  %vm7447_vm11 = vcmp.lt.f32.partialorder %v2115_v5, 0.0004427343  ;;  %v3096_v0 = vadd.f32 1.0, %v7428_v7  ;;  %v4767_v59 = vld [vmem:[%s9156_s0 + $0x1a8] sm:$0xff] }
 0x25d   :  { %v4382_v1 = vpop.eup %4381  ;;  %v2120_v53 = vmul.f32 0.6931472, %v4380_v60  ;;  %vm883_vm12 = vcmp.eq.f32.partialorder %v7364_v47, inf  ;;  %v3083_v45 = vmul.f32 %v3082_v23, %v7388_v16  ;;  %v2114_v18 = vmul.f32 %v7380_v26, %v2113_v50 }
 0x25e   :  { %v4384_v34 = vpop.eup %4383  ;;  %4391 = vrcp.f32 %v1216_v54  ;;  %v2127_v30 = vadd.f32 1.0, %v7439_v61  ;;  %v1364_v37 = vmul.f32 %v4767_v59, %v4378_v57  ;;  %v3075_v36 = vand.u32 2147483647, %v7409_v15 }
 0x25f   :  { %v4386_v17 = vpop.eup %4385  ;;  %4393 = vlog2.f32 %v3096_v0  ;;  %v891_v55 = vsel %vm890_vm7, %v7358_v56, %v889_v48  ;;  %v3073_v12 = vadd.f32 1.0, %v3072_v3  ;;  %v2139_v26 = vmul.f32 -0.5, %v7411_v33  ;;  %v7517_v0 = vpop.xlane.xlu1 %379 }
 0x260   :  { %v3080_v29 = vmul.f32 0.6931472, %v4386_v17  ;;  %v2142_v39 = vand.u32 2147483647, %v7411_v33  ;;  %vm885_vm13 = vcmp.eq.f32.partialorder %v7364_v47, 0.0  ;;  %v2126_v16 = vsel %vm7432_vm9, %v2123_v41, %v2120_v53 }
 0x261   :  { %v2111_v9 = vmul.f32 0.6931472, %v4384_v34  ;;  %v3099_v8 = vmul.f32 -0.5, %v7428_v7  ;;  %4395 = vlog2.f32 %v2127_v30  ;;  %v7472_v38 = vsub.f32 0.0, %v7439_v61 }
 0x262   :  { %v3086_v49 = vsel %vm7443_vm10, %v3083_v45, %v3080_v29  ;;  %v894_v19 = vsel %vm892_vm8, %v893_v42, %v891_v55  ;;  %v882_v24 = vmul.f32 %v4376_v4, %v7364_v47  ;;  %v1362_v58 = vmul.f32 %v4768_v21, %v4382_v1 }
 0x263   :  { %v3518_v54 = vsub.f32 %v2126_v16, %v3086_v49  ;;  %vm7480_vm14 = vcmp.lt.f32.partialorder %v3075_v36, 0.0004427343  ;;  %v1218_v43 = vmax.f32 %v894_v19, 1e-15  ;;  %v3074_v31 = vmul.f32 %v3073_v12, %v7409_v15  ;;  %v7539_v19 = vpop.xlane.xlu0 %376  ;;  %v7547_v6 = vpop.xlane.xlu1 %385 }
 0x264   :  { %v4388_v51 = vpop.eup %4387  ;;  %v2140_v20 = vadd.f32 1.0, %v2139_v26  ;;  %v3102_v56 = vand.u32 2147483647, %v7428_v7  ;;  %v3087_v11 = vadd.f32 1.0, %v7472_v38  ;;  %4397 = vrcp.f32 %v1215_v27 }
 0x265   :  { %v4390_v62 = vpop.eup %4389  ;;  %v3614_v22 = vmul.f32 0.5, %v3518_v54  ;;  %v3071_v14 = vmul.f32 0.6931472, %v4388_v51  ;;  %v7489_v10 = vclamps-f32 %v1218_v43, 0.9999999  ;;  %v2117_v2 = vsel %vm7447_vm11, %v2114_v18, %v2111_v9 }
 0x266   :  { %v3100_v63 = vadd.f32 1.0, %v3099_v8  ;;  %4399 = vlog2.f32 %v3087_v11  ;;  %v884_v15 = vsel %vm883_vm12, %v7364_v47, %v882_v24  ;;  %v886_v52 = vand.u32 2147483648, %v7364_v47 }
 0x267   :  { %v3710_v32 = vmul.f32 %v3614_v22, %v1364_v37  ;;  %v3077_v13 = vsel %vm7480_vm14, %v3074_v31, %v3071_v14  ;;  %v2154_v25 = vadd.f32 1.0, %v7489_v10  ;;  %v2138_v35 = vmul.f32 0.6931472, %v4390_v62  ;;  %v4770_v31 = vld [vmem:[%s9156_s0 + $0x1b0] sm:$0xff] }
 0x268   :  { %v4392_v27 = vpop.eup %4391  ;;  %v3517_v28 = vsub.f32 %v2117_v2, %v3077_v13  ;;  %v2141_v5 = vmul.f32 %v7411_v33, %v2140_v20  ;;  %v2130_v4 = vmul.f32 -0.5, %v7439_v61  ;;  %v3090_v50 = vmul.f32 -0.5, %v7472_v38 }
 0x269   :  { %v4394_v23 = vpop.eup %4393  ;;  %3806 = vst.msk [vmem:[%s9157_s1 + $0x1a8] sm:$0xff] %vm200_vm0, %v3710_v32  ;;  %4401 = vlog2.f32 %v2154_v25  ;;  %v7508_v57 = vsub.f32 0.0, %v7489_v10  ;;  %v7512_v48 = vsel %vm885_vm13, %v886_v52, %v884_v15  ;;  %v3101_v40 = vmul.f32 %v3100_v63, %v7428_v7  ;;  %v4769_v7 = vld [vmem:[%s9156_s0 + $0x1b8] sm:$0xff] }
 0x26a   :  { %v3613_v60 = vmul.f32 0.5, %v3517_v28  ;;  %v3098_v33 = vmul.f32 0.6931472, %v4394_v23  ;;  %v1217_v3 = vmax.f32 %v7512_v48, 1e-15  ;;  %v2131_v44 = vadd.f32 1.0, %v2130_v4 }
 0x26b   :  { %v4396_v42 = vpop.eup %4395  ;;  %vm2143_vm15 = vcmp.lt.f32.partialorder %v2142_v39, 0.0004427343  ;;  %vm3103_vm1 = vcmp.lt.f32.partialorder %v3102_v56, 0.0004427343  ;;  %v3114_v1 = vadd.f32 1.0, %v7508_v57  ;;  %v3091_v45 = vadd.f32 1.0, %v3090_v50 }
 0x26c   :  { %v3709_v53 = vmul.f32 %v3613_v60, %v1362_v58  ;;  %v2144_v41 = vsel %vm2143_vm15, %v2141_v5, %v2138_v35  ;;  %v3104_v46 = vsel %vm3103_vm1, %v3101_v40, %v3098_v33  ;;  %v2133_v34 = vand.u32 2147483647, %v7439_v61  ;;  %v7565_v35 = vpop.xlane.xlu0 %382  ;;  %v7577_v60 = vpop.xlane.xlu1 %391  ;;  %v4771_v40 = vld [vmem:[%s9156_s0 + $0x1c8] sm:$0xff] }
 0x26d   :  { %v3520_v47 = vsub.f32 %v2144_v41, %v3104_v46  ;;  %4403 = vlog2.f32 %v3114_v1  ;;  %v1368_v18 = vmul.f32 %v4769_v7, %v4392_v27  ;;  %v3093_v30 = vand.u32 2147483647, %v7472_v38 }
 0x26e   :  { %3805 = vst.msk [vmem:[%s9157_s1 + $0x1a0] sm:$0xff] %vm200_vm0, %v3709_v53  ;;  %4405 = vrcp.f32 %v1218_v43  ;;  %v7528_v17 = vclamps-f32 %v1217_v3, 0.9999999  ;;  %v4398_v59 = vpop.eup %4397  ;;  %v2129_v36 = vmul.f32 0.6931472, %v4396_v42  ;;  %v2157_v55 = vmul.f32 -0.5, %v7489_v10 }
 0x26f   :  { %v3616_v37 = vmul.f32 0.5, %v3520_v47  ;;  %4407 = vrsqrt.f32 %v7517_v0  ;;  %v2132_v12 = vmul.f32 %v7439_v61, %v2131_v44  ;;  %v3117_v26 = vmul.f32 -0.5, %v7508_v57 }
 0x270   :  { %v4400_v29 = vpop.eup %4399  ;;  %v2145_v39 = vadd.f32 1.0, %v7528_v17  ;;  %v3092_v8 = vmul.f32 %v3091_v45, %v7472_v38  ;;  %v7537_v49 = vsub.f32 0.0, %v7528_v17  ;;  %vm2134_vm2 = vcmp.lt.f32.partialorder %v2133_v34, 0.0004427343 }
 0x271   :  { %v3712_v16 = vmul.f32 %v3616_v37, %v1368_v18  ;;  %v3089_v9 = vmul.f32 0.6931472, %v4400_v29  ;;  %vm3094_vm3 = vcmp.lt.f32.partialorder %v3093_v30, 0.0004427343  ;;  %v2160_v24 = vand.u32 2147483647, %v7489_v10  ;;  %v7603_v29 = vpop.xlane.xlu0 %388 }
 0x272   :  { %4409 = vlog2.f32 %v2145_v39  ;;  %v2135_v61 = vsel %vm2134_vm2, %v2132_v12, %v2129_v36  ;;  %v2158_v58 = vadd.f32 1.0, %v2157_v55  ;;  %v3105_v38 = vadd.f32 1.0, %v7537_v49 }
 0x273   :  { %v4402_v54 = vpop.eup %4401  ;;  %3808 = vst.msk [vmem:[%s9157_s1 + $0x1b8] sm:$0xff] %vm200_vm0, %v3712_v16  ;;  %v3095_v21 = vsel %vm3094_vm3, %v3092_v8, %v3089_v9  ;;  %v3118_v51 = vadd.f32 1.0, %v3117_v26  ;;  %4411 = vrsqrt.f32 %v7539_v19  ;;  %v1366_v20 = vmul.f32 %v4770_v31, %v4398_v59 }
 0x274   :  { %v3519_v43 = vsub.f32 %v2135_v61, %v3095_v21  ;;  %v3120_v56 = vand.u32 2147483647, %v7508_v57  ;;  %4413 = vlog2.f32 %v3105_v38  ;;  %v2156_v62 = vmul.f32 0.6931472, %v4402_v54 }
 0x275   :  { %v2148_v22 = vmul.f32 -0.5, %v7528_v17  ;;  %4415 = vrsqrt.f32 %v7547_v6  ;;  %v2159_v2 = vmul.f32 %v7489_v10, %v2158_v58  ;;  %vm7557_vm4 = vcmp.lt.f32.partialorder %v2160_v24, 0.0004427343  ;;  %v4772_v58 = vld [vmem:[%s9156_s0 + $0x1c0] sm:$0xff] }
 0x276   :  { %v3615_v11 = vmul.f32 0.5, %v3519_v43  ;;  %4417 = vrcp.f32 %v1217_v3  ;;  %v3119_v25 = vmul.f32 %v3118_v51, %v7508_v57  ;;  %v3108_v52 = vmul.f32 -0.5, %v7537_v49 }
 0x277   :  { %v4404_v14 = vpop.eup %4403  ;;  %vm3121_vm5 = vcmp.lt.f32.partialorder %v3120_v56, 0.0004427343  ;;  %v2151_v28 = vand.u32 2147483647, %v7528_v17  ;;  %vm904_vm6 = vcmp.eq.f32.partialorder %v7517_v0, inf  ;;  %v2162_v10 = vsel %vm7557_vm4, %v2159_v2, %v2156_v62 }
 0x278   :  { %v4406_v15 = vpop.eup %4405  ;;  %v3711_v32 = vmul.f32 %v3615_v11, %v1366_v20  ;;  %v3116_v13 = vmul.f32 0.6931472, %v4404_v14  ;;  %v2149_v4 = vadd.f32 1.0, %v2148_v22  ;;  %v3111_v57 = vand.u32 2147483647, %v7537_v49  ;;  %v7644_v22 = vpop.xlane.xlu0 %394 }
 0x279   :  { %v4408_v27 = vpop.eup %4407  ;;  %vm906_vm7 = vcmp.eq.f32.partialorder %v7517_v0, 0.0  ;;  %v907_v48 = vand.u32 2147483648, %v7517_v0  ;;  %v1372_v3 = vmul.f32 %v4771_v40, %v4406_v15  ;;  %v3109_v42 = vadd.f32 1.0, %v3108_v52 }
 0x27a   :  { %3807 = vst.msk [vmem:[%s9157_s1 + $0x1b0] sm:$0xff] %vm200_vm0, %v3711_v32  ;;  %v3122_v5 = vsel %vm3121_vm5, %v3119_v25, %v3116_v13  ;;  %v903_v23 = vmul.f32 %v4408_v27, %v7517_v0  ;;  %4419 = vrsqrt.f32 %v7565_v35  ;;  %vm7586_vm8 = vcmp.lt.f32.partialorder %v2151_v28, 0.0004427343 }
 0x27b   :  { %v3522_v50 = vsub.f32 %v2162_v10, %v3122_v5  ;;  %vm897_vm9 = vcmp.eq.f32.partialorder %v7539_v19, inf  ;;  %v2150_v34 = vmul.f32 %v7528_v17, %v2149_v4  ;;  %4421 = vrsqrt.f32 %v7577_v60 }
 0x27c   :  { %v4410_v33 = vpop.eup %4409  ;;  %v905_v1 = vsel %vm904_vm6, %v7517_v0, %v903_v23  ;;  %vm7593_vm10 = vcmp.lt.f32.partialorder %v3111_v57, 0.0004427343  ;;  %vm899_vm11 = vcmp.eq.f32.partialorder %v7539_v19, 0.0  ;;  %v3110_v36 = vmul.f32 %v3109_v42, %v7537_v49 }
 0x27d   :  { %v3618_v53 = vmul.f32 0.5, %v3522_v50  ;;  %v908_v46 = vsel %vm906_vm7, %v907_v48, %v905_v1  ;;  %v4412_v44 = vpop.eup %4411  ;;  %v2147_v47 = vmul.f32 0.6931472, %v4410_v33  ;;  %v900_v17 = vand.u32 2147483648, %v7539_v19 }
 0x27e   :  { %v1220_v45 = vmax.f32 %v908_v46, 1e-15  ;;  %v4414_v7 = vpop.eup %4413  ;;  %v896_v30 = vmul.f32 %v4412_v44, %v7539_v19  ;;  %vm918_vm12 = vcmp.eq.f32.partialorder %v7547_v6, inf  ;;  %vm920_vm13 = vcmp.eq.f32.partialorder %v7547_v6, 0.0 }
 0x27f   :  { %v3714_v18 = vmul.f32 %v3618_v53, %v1372_v3  ;;  %v4416_v59 = vpop.eup %4415  ;;  %v3107_v37 = vmul.f32 0.6931472, %v4414_v7  ;;  %v2153_v16 = vsel %vm7586_vm8, %v2150_v34, %v2147_v47  ;;  %v921_v49 = vand.u32 2147483648, %v7547_v6 }
 0x280   :  { %v7600_v55 = vclamps-f32 %v1220_v45, 0.9999999  ;;  %v4418_v12 = vpop.eup %4417  ;;  %v898_v26 = vsel %vm897_vm9, %v7539_v19, %v896_v30  ;;  %v917_v39 = vmul.f32 %v4416_v59, %v7547_v6  ;;  %vm911_vm14 = vcmp.eq.f32.partialorder %v7565_v35, inf  ;;  %v7635_v19 = vpop.xlane.xlu1 %397 }
 0x281   :  { %3810 = vst.msk [vmem:[%s9157_s1 + $0x1c8] sm:$0xff] %vm200_vm0, %v3714_v18  ;;  %v3113_v9 = vsel %vm7593_vm10, %v3110_v36, %v3107_v37  ;;  %v901_v61 = vsel %vm899_vm11, %v900_v17, %v898_v26  ;;  %v1370_v38 = vmul.f32 %v4772_v58, %v4418_v12  ;;  %vm913_vm15 = vcmp.eq.f32.partialorder %v7565_v35, 0.0 }
 0x282   :  { %v2172_v8 = vadd.f32 1.0, %v7600_v55  ;;  %v3521_v24 = vsub.f32 %v2153_v16, %v3113_v9  ;;  %v7622_v54 = vsub.f32 0.0, %v7600_v55  ;;  %v919_v21 = vsel %vm918_vm12, %v7547_v6, %v917_v39 }
 0x283   :  { %v1219_v43 = vmax.f32 %v901_v61, 1e-15  ;;  %v914_v20 = vand.u32 2147483648, %v7565_v35  ;;  %v7641_v62 = vsel %vm920_vm13, %v921_v49, %v919_v21  ;;  %vm932_vm1 = vcmp.eq.f32.partialorder %v7577_v60, inf }
 0x284   :  { %4423 = vlog2.f32 %v2172_v8  ;;  %v3617_v51 = vmul.f32 0.5, %v3521_v24  ;;  %v3132_v31 = vadd.f32 1.0, %v7622_v54  ;;  %v4420_v56 = vpop.eup %4419  ;;  %v2175_v2 = vmul.f32 -0.5, %v7600_v55  ;;  %v7668_v57 = vpop.xlane.xlu1 %403  ;;  %v4773_v24 = vld [vmem:[%s9156_s0 + $0x1d8] sm:$0xff] }
 0x285   :  { %4425 = vrsqrt.f32 %v7603_v29  ;;  %v7637_v11 = vclamps-f32 %v1219_v43, 0.9999999  ;;  %v935_v63 = vand.u32 2147483648, %v7577_v60  ;;  %v4422_v15 = vpop.eup %4421  ;;  %v3135_v32 = vmul.f32 -0.5, %v7622_v54 }
 0x286   :  { %4427 = vrcp.f32 %v1220_v45  ;;  %v3713_v14 = vmul.f32 %v3617_v51, %v1370_v38  ;;  %v1222_v6 = vmax.f32 %v7641_v62, 1e-15  ;;  %v910_v52 = vmul.f32 %v4420_v56, %v7565_v35 }
 0x287   :  { %4429 = vlog2.f32 %v3132_v31  ;;  %v2163_v13 = vadd.f32 1.0, %v7637_v11  ;;  %v7651_v25 = vsub.f32 0.0, %v7637_v11  ;;  %vm934_vm2 = vcmp.eq.f32.partialorder %v7577_v60, 0.0 }
 0x288   :  { %4431 = vrsqrt.f32 %v7635_v19  ;;  %3809 = vst.msk [vmem:[%s9157_s1 + $0x1c0] sm:$0xff] %vm200_vm0, %v3713_v14  ;;  %v928_v27 = vand.u32 2147483648, %v7603_v29  ;;  %v2178_v28 = vand.u32 2147483647, %v7600_v55  ;;  %v949_v5 = vand.u32 2147483648, %v7635_v19 }
 0x289   :  { %4433 = vrsqrt.f32 %v7644_v22  ;;  %v3123_v10 = vadd.f32 1.0, %v7651_v25  ;;  %v2176_v4 = vadd.f32 1.0, %v2175_v2  ;;  %v3138_v23 = vand.u32 2147483647, %v7622_v54 }
 0x28a   :  { %4435 = vlog2.f32 %v2163_v13  ;;  %v931_v50 = vmul.f32 %v4422_v15, %v7577_v60  ;;  %v3136_v48 = vadd.f32 1.0, %v3135_v32  ;;  %v7670_v33 = vclamps-f32 %v1222_v6, 0.9999999 }
 0x28b   :  { %4437 = vrcp.f32 %v1219_v43  ;;  %v912_v40 = vsel %vm911_vm14, %v7565_v35, %v910_v52  ;;  %v2166_v3 = vmul.f32 -0.5, %v7637_v11  ;;  %v2169_v42 = vand.u32 2147483647, %v7637_v11 }
 0x28c   :  { %4439 = vlog2.f32 %v3123_v10  ;;  %v3126_v1 = vmul.f32 -0.5, %v7651_v25  ;;  %v7680_v53 = vsel %vm913_vm15, %v914_v20, %v912_v40  ;;  %vm7682_vm3 = vcmp.lt.f32.partialorder %v2178_v28, 0.0004427343 }
 0x28d   :  { %v2190_v44 = vadd.f32 1.0, %v7670_v33  ;;  %v7688_v47 = vsub.f32 0.0, %v7670_v33  ;;  %4441 = vrsqrt.f32 %v7668_v57  ;;  %v2177_v45 = vmul.f32 %v7600_v55, %v2176_v4 }
 0x28e   :  { %v4424_v41 = vpop.eup %4423  ;;  %vm7692_vm4 = vcmp.lt.f32.partialorder %v3138_v23, 0.0004427343  ;;  %v1221_v35 = vmax.f32 %v7680_v53, 1e-15  ;;  %v933_v18 = vsel %vm932_vm1, %v7577_v60, %v931_v50  ;;  %v3137_v59 = vmul.f32 %v3136_v48, %v7622_v54 }
 0x28f   :  { %v4426_v34 = vpop.eup %4425  ;;  %v2174_v30 = vmul.f32 0.6931472, %v4424_v41  ;;  %4443 = vlog2.f32 %v2190_v44  ;;  %v3150_v37 = vadd.f32 1.0, %v7688_v47  ;;  %v2167_v17 = vadd.f32 1.0, %v2166_v3 }
 0x290   :  { %v4428_v0 = vpop.eup %4427  ;;  %vm7702_vm5 = vcmp.lt.f32.partialorder %v2169_v42, 0.0004427343  ;;  %v3127_v12 = vadd.f32 1.0, %v3126_v1  ;;  %v3129_v26 = vand.u32 2147483647, %v7651_v25  ;;  %v7715_v8 = vsel %vm934_vm2, %v935_v63, %v933_v18 }
 0x291   :  { %v4430_v36 = vpop.eup %4429  ;;  %4445 = vlog2.f32 %v3150_v37  ;;  %v7711_v9 = vclamps-f32 %v1221_v35, 0.9999999  ;;  %v1376_v54 = vmul.f32 %v4773_v24, %v4428_v0  ;;  %v2193_v61 = vmul.f32 -0.5, %v7670_v33 }
 0x292   :  { %v7707_v39 = vpop.eup %4431  ;;  %v3134_v16 = vmul.f32 0.6931472, %v4430_v36  ;;  %4447 = vrcp.f32 %v1222_v6  ;;  %v2196_v21 = vand.u32 2147483647, %v7670_v33  ;;  %v2180_v38 = vsel %vm7682_vm3, %v2177_v45, %v2174_v30 }
 0x293   :  { %v7717_v49 = vpop.eup %4433  ;;  %v3153_v43 = vmul.f32 -0.5, %v7688_v47  ;;  %v2181_v51 = vadd.f32 1.0, %v7711_v9  ;;  %vm925_vm6 = vcmp.eq.f32.partialorder %v7603_v29, inf  ;;  %v7732_v62 = vsub.f32 0.0, %v7711_v9 }
 0x294   :  { %v4436_v58 = vpop.eup %4435  ;;  %v3140_v60 = vsel %vm7692_vm4, %v3137_v59, %v3134_v16  ;;  %v1224_v14 = vmax.f32 %v7715_v8, 1e-15  ;;  %v2168_v63 = vmul.f32 %v7637_v11, %v2167_v17  ;;  %v3128_v15 = vmul.f32 %v3127_v12, %v7651_v25  ;;  %v4774_v11 = vld [vmem:[%s9156_s0 + $0x1d0] sm:$0xff] }
 0x295   :  { %v4438_v31 = vpop.eup %4437  ;;  %v3524_v20 = vsub.f32 %v2180_v38, %v3140_v60  ;;  %v2165_v56 = vmul.f32 0.6931472, %v4436_v58  ;;  %vm7737_vm7 = vcmp.lt.f32.partialorder %v3129_v26, 0.0004427343  ;;  %4449 = vlog2.f32 %v2181_v51  ;;  %v4775_v58 = vld [vmem:[%s9156_s0 + $0x1e8] sm:$0xff] }
 0x296   :  { %v4440_v2 = vpop.eup %4439  ;;  %v2194_v52 = vadd.f32 1.0, %v2193_v61  ;;  %v3141_v28 = vadd.f32 1.0, %v7732_v62  ;;  %vm927_vm8 = vcmp.eq.f32.partialorder %v7603_v29, 0.0  ;;  %v1374_v4 = vmul.f32 %v4774_v11, %v4438_v31 }
 0x297   :  { %v3620_v13 = vmul.f32 0.5, %v3524_v20  ;;  %v3125_v6 = vmul.f32 0.6931472, %v4440_v2  ;;  %v7743_v10 = vpop.eup %4441  ;;  %v2171_v25 = vsel %vm7702_vm5, %v2168_v63, %v2165_v56  ;;  %vm7750_vm9 = vcmp.lt.f32.partialorder %v2196_v21, 0.0004427343 }
 0x298   :  { %v3154_v50 = vadd.f32 1.0, %v3153_v43  ;;  %4451 = vlog2.f32 %v3141_v28  ;;  %v7756_v3 = vclamps-f32 %v1224_v14, 0.9999999  ;;  %vm946_vm10 = vcmp.eq.f32.partialorder %v7635_v19, inf }
 0x299   :  { %v3716_v48 = vmul.f32 %v3620_v13, %v1376_v54  ;;  %v3131_v40 = vsel %vm7737_vm7, %v3128_v15, %v3125_v6  ;;  %v4444_v42 = vpop.eup %4443  ;;  %v3156_v41 = vand.u32 2147483647, %v7688_v47  ;;  %v2184_v46 = vmul.f32 -0.5, %v7711_v9 }
 0x29a   :  { %v3523_v1 = vsub.f32 %v2171_v25, %v3131_v40  ;;  %v924_v44 = vmul.f32 %v4426_v34, %v7603_v29  ;;  %vm948_vm11 = vcmp.eq.f32.partialorder %v7635_v19, 0.0  ;;  %v2192_v45 = vmul.f32 0.6931472, %v4444_v42 }
 0x29b   :  { %3812 = vst.msk [vmem:[%s9157_s1 + $0x1d8] sm:$0xff] %vm200_vm0, %v3716_v48  ;;  %v2195_v7 = vmul.f32 %v7670_v33, %v2194_v52  ;;  %v3144_v18 = vmul.f32 -0.5, %v7732_v62  ;;  %v2208_v0 = vadd.f32 1.0, %v7756_v3  ;;  %v4446_v30 = vpop.eup %4445  ;;  %4453 = vrcp.f32 %v1221_v35 }
 0x29c   :  { %v3619_v59 = vmul.f32 0.5, %v3523_v1  ;;  %v2187_v34 = vand.u32 2147483647, %v7711_v9  ;;  %v7774_v37 = vsub.f32 0.0, %v7756_v3  ;;  %v4448_v36 = vpop.eup %4447  ;;  %v3152_v17 = vmul.f32 0.6931472, %v4446_v30 }
 0x29d   :  { %v3155_v55 = vmul.f32 %v3154_v50, %v7688_v47  ;;  %4455 = vlog2.f32 %v2208_v0  ;;  %v926_v33 = vsel %vm925_vm6, %v7603_v29, %v924_v44  ;;  %vm3157_vm12 = vcmp.lt.f32.partialorder %v3156_v41, 0.0004427343  ;;  %v4776_v1 = vld [vmem:[%s9156_s0 + $0x1e0] sm:$0xff] }
 0x29e   :  { %v3715_v12 = vmul.f32 %v3619_v59, %v1374_v4  ;;  %v2185_v26 = vadd.f32 1.0, %v2184_v46  ;;  %v3168_v53 = vadd.f32 1.0, %v7774_v37  ;;  %v2198_v35 = vsel %vm7750_vm9, %v2195_v7, %v2192_v45 }
 0x29f   :  { %v3158_v16 = vsel %vm3157_vm12, %v3155_v55, %v3152_v17  ;;  %v3145_v8 = vadd.f32 1.0, %v3144_v18  ;;  %v3147_v24 = vand.u32 2147483647, %v7732_v62  ;;  %v4450_v54 = vpop.eup %4449  ;;  %v7792_v61 = vsel %vm927_vm8, %v928_v27, %v926_v33 }
 0x2a0   :  { %3811 = vst.msk [vmem:[%s9157_s1 + $0x1d0] sm:$0xff] %vm200_vm0, %v3715_v12  ;;  %v3526_v47 = vsub.f32 %v2198_v35, %v3158_v16  ;;  %4457 = vlog2.f32 %v3168_v53  ;;  %v945_v21 = vmul.f32 %v7707_v39, %v7635_v19  ;;  %v1380_v38 = vmul.f32 %v4775_v58, %v4448_v36 }
 0x2a1   :  { %vm7799_vm13 = vcmp.lt.f32.partialorder %v2187_v34, 0.0004427343  ;;  %4459 = vrcp.f32 %v1224_v14  ;;  %v2211_v43 = vmul.f32 -0.5, %v7756_v3  ;;  %v2183_v31 = vmul.f32 0.6931472, %v4450_v54 }
 0x2a2   :  { %v3622_v51 = vmul.f32 0.5, %v3526_v47  ;;  %v1223_v29 = vmax.f32 %v7792_v61, 1e-15  ;;  %v947_v27 = vsel %vm946_vm10, %v7635_v19, %v945_v21  ;;  %v4452_v39 = vpop.eup %4451  ;;  %v2186_v20 = vmul.f32 %v7711_v9, %v2185_v26 }
 0x2a3   :  { %vm7809_vm14 = vcmp.lt.f32.partialorder %v3147_v24, 0.0004427343  ;;  %v3171_v2 = vmul.f32 -0.5, %v7774_v37  ;;  %v950_v14 = vsel %vm948_vm11, %v949_v5, %v947_v27  ;;  %v3143_v15 = vmul.f32 0.6931472, %v4452_v39 }
 0x2a4   :  { %v3718_v63 = vmul.f32 %v3622_v51, %v1380_v38  ;;  %v3146_v32 = vmul.f32 %v3145_v8, %v7732_v62  ;;  %v7819_v13 = vclamps-f32 %v1223_v29, 0.9999999  ;;  %v2212_v6 = vadd.f32 1.0, %v2211_v43 }
 0x2a5   :  { %v2214_v9 = vand.u32 2147483647, %v7756_v3  ;;  %v1226_v52 = vmax.f32 %v950_v14, 1e-15  ;;  %vm939_vm15 = vcmp.eq.f32.partialorder %v7644_v22, inf  ;;  %v4454_v28 = vpop.eup %4453  ;;  %v2189_v19 = vsel %vm7799_vm13, %v2186_v20, %v2183_v31 }
 0x2a6   :  { %3814 = vst.msk [vmem:[%s9157_s1 + $0x1e8] sm:$0xff] %vm200_vm0, %v3718_v63  ;;  %v3149_v5 = vsel %vm7809_vm14, %v3146_v32, %v3143_v15  ;;  %v2199_v62 = vadd.f32 1.0, %v7819_v13  ;;  %v938_v11 = vmul.f32 %v7717_v49, %v7644_v22  ;;  %v3172_v23 = vadd.f32 1.0, %v3171_v2 }
 0x2a7   :  { %v4456_v4 = vpop.eup %4455  ;;  %v3525_v25 = vsub.f32 %v2189_v19, %v3149_v5  ;;  %v7835_v50 = vsub.f32 0.0, %v7819_v13  ;;  %v7837_v48 = vclamps-f32 %v1226_v52, 0.9999999  ;;  %v3174_v42 = vand.u32 2147483647, %v7774_v37 }
 0x2a8   :  { %v2210_v40 = vmul.f32 0.6931472, %v4456_v4  ;;  %4461 = vlog2.f32 %v2199_v62  ;;  %vm941_vm1 = vcmp.eq.f32.partialorder %v7644_v22, 0.0  ;;  %v1378_v41 = vmul.f32 %v4776_v1, %v4454_v28 }
 0x2a9   :  { %v3621_v49 = vmul.f32 0.5, %v3525_v25  ;;  %v3159_v46 = vadd.f32 1.0, %v7835_v50  ;;  %v942_v44 = vand.u32 2147483648, %v7644_v22  ;;  %v2213_v7 = vmul.f32 %v7756_v3, %v2212_v6 }
 0x2aa   :  { %v4458_v45 = vpop.eup %4457  ;;  %vm7847_vm2 = vcmp.lt.f32.partialorder %v2214_v9, 0.0004427343  ;;  %v2226_v0 = vadd.f32 1.0, %v7837_v48  ;;  %v940_v30 = vsel %vm939_vm15, %v7644_v22, %v938_v11  ;;  %v3173_v17 = vmul.f32 %v3172_v23, %v7774_v37  ;;  %v7911_v23 = vpop.xlane.xlu1 %409 }
 0x2ab   :  { %v4460_v59 = vpop.eup %4459  ;;  %v3717_v34 = vmul.f32 %v3621_v49, %v1378_v41  ;;  %v3170_v36 = vmul.f32 0.6931472, %v4458_v45  ;;  %4463 = vlog2.f32 %v3159_v46  ;;  %v2216_v55 = vsel %vm7847_vm2, %v2213_v7, %v2210_v40  ;;  %v4778_v45 = vld [vmem:[%s9156_s0 + $0x1f0] sm:$0xff] }
 0x2ac   :  { %vm3175_vm3 = vcmp.lt.f32.partialorder %v3174_v42, 0.0004427343  ;;  %v2202_v3 = vmul.f32 -0.5, %v7819_v13  ;;  %v959_v33 = vmul.f32 %v7743_v10, %v7668_v57  ;;  %4465 = vlog2.f32 %v2226_v0  ;;  %v4777_v10 = vld [vmem:[%s9156_s0 + $0x1f8] sm:$0xff] }
 0x2ad   :  { %3813 = vst.msk [vmem:[%s9157_s1 + $0x1e0] sm:$0xff] %vm200_vm0, %v3717_v34  ;;  %v3176_v12 = vsel %vm3175_vm3, %v3173_v17, %v3170_v36  ;;  %v7866_v26 = vsub.f32 0.0, %v7837_v48  ;;  %v943_v37 = vsel %vm941_vm1, %v942_v44, %v940_v30  ;;  %4467 = vrcp.f32 %v1223_v29 }
 0x2ae   :  { %v3528_v53 = vsub.f32 %v2216_v55, %v3176_v12  ;;  %v3162_v35 = vmul.f32 -0.5, %v7835_v50  ;;  %v1225_v16 = vmax.f32 %v943_v37, 1e-15  ;;  %v1384_v8 = vmul.f32 %v4777_v10, %v4460_v59  ;;  %v4779_v12 = vld [vmem:[%s9156_s0 + $0x208] sm:$0xff] }
 0x2af   :  { %v2229_v24 = vmul.f32 -0.5, %v7837_v48  ;;  %v3186_v54 = vadd.f32 1.0, %v7866_v26  ;;  %4469 = vrcp.f32 %v1226_v52  ;;  %vm960_vm4 = vcmp.eq.f32.partialorder %v7668_v57, inf  ;;  %v7903_v52 = vpop.xlane.xlu0 %400 }
 0x2b0   :  { %v3624_v47 = vmul.f32 0.5, %v3528_v53  ;;  %v7876_v61 = vclamps-f32 %v1225_v16, 0.9999999  ;;  %v2203_v22 = vadd.f32 1.0, %v2202_v3  ;;  %v2205_v21 = vand.u32 2147483647, %v7819_v13 }
 0x2b1   :  { %4471 = vlog2.f32 %v3186_v54  ;;  %v961_v58 = vsel %vm960_vm4, %v7668_v57, %v959_v33  ;;  %v3163_v43 = vadd.f32 1.0, %v3162_v35  ;;  %v963_v31 = vand.u32 2147483648, %v7668_v57 }
 0x2b2   :  { %v4462_v38 = vpop.eup %4461  ;;  %v3720_v60 = vmul.f32 %v3624_v47, %v1384_v8  ;;  %v2217_v51 = vadd.f32 1.0, %v7876_v61  ;;  %v3165_v29 = vand.u32 2147483647, %v7835_v50  ;;  %v2230_v27 = vadd.f32 1.0, %v2229_v24 }
 0x2b3   :  { %v7885_v39 = vsub.f32 0.0, %v7876_v61  ;;  %vm962_vm5 = vcmp.eq.f32.partialorder %v7668_v57, 0.0  ;;  %v2201_v20 = vmul.f32 0.6931472, %v4462_v38  ;;  %v3189_v56 = vmul.f32 -0.5, %v7866_v26  ;;  %v7932_v3 = vpop.xlane.xlu0 %406 }
 0x2b4   :  { %3816 = vst.msk [vmem:[%s9157_s1 + $0x1f8] sm:$0xff] %vm200_vm0, %v3720_v60  ;;  %4473 = vlog2.f32 %v2217_v51  ;;  %v7893_v2 = vsel %vm962_vm5, %v963_v31, %v961_v58  ;;  %v2204_v63 = vmul.f32 %v7819_v13, %v2203_v22  ;;  %vm7896_vm6 = vcmp.lt.f32.partialorder %v2205_v21, 0.0004427343  ;;  %v7956_v31 = vpop.xlane.xlu1 %415 }
 0x2b5   :  { %v4464_v14 = vpop.eup %4463  ;;  %v3177_v57 = vadd.f32 1.0, %v7885_v39  ;;  %v3164_v6 = vmul.f32 %v3163_v43, %v7835_v50  ;;  %4475 = vrcp.f32 %v1225_v16  ;;  %v1228_v9 = vmax.f32 %v7893_v2, 1e-15 }
 0x2b6   :  { %v3161_v32 = vmul.f32 0.6931472, %v4464_v14  ;;  %v4466_v28 = vpop.eup %4465  ;;  %vm3166_vm7 = vcmp.lt.f32.partialorder %v3165_v29, 0.0004427343  ;;  %v2231_v19 = vmul.f32 %v7837_v48, %v2230_v27  ;;  %v2232_v13 = vand.u32 2147483647, %v7837_v48 }
 0x2b7   :  { %4477 = vlog2.f32 %v3177_v57  ;;  %v4468_v5 = vpop.eup %4467  ;;  %v2207_v62 = vsel %vm7896_vm6, %v2204_v63, %v2201_v20  ;;  %v3190_v4 = vadd.f32 1.0, %v3189_v56  ;;  %v7909_v25 = vclamps-f32 %v1228_v9, 0.9999999  ;;  %v4780_v20 = vld [vmem:[%s9156_s0 + $0x200] sm:$0xff]  ;;  %v7962_v2 = vpop.xlane.xlu0 %412 }
 0x2b8   :  { %v3167_v11 = vsel %vm3166_vm7, %v3164_v6, %v3161_v32  ;;  %v3192_v40 = vand.u32 2147483647, %v7866_v26  ;;  %v2220_v42 = vmul.f32 -0.5, %v7876_v61  ;;  %4479 = vrsqrt.f32 %v7903_v52 }
 0x2b9   :  { %v3527_v50 = vsub.f32 %v2207_v62, %v3167_v11  ;;  %v4470_v1 = vpop.eup %4469  ;;  %v2228_v48 = vmul.f32 0.6931472, %v4466_v28  ;;  %v3180_v41 = vmul.f32 -0.5, %v7885_v39  ;;  %v2244_v49 = vadd.f32 1.0, %v7909_v25 }
 0x2ba   :  { %v7919_v46 = vsub.f32 0.0, %v7909_v25  ;;  %v1382_v7 = vmul.f32 %v4778_v45, %v4468_v5  ;;  %vm7924_vm8 = vcmp.lt.f32.partialorder %v2232_v13, 0.0004427343  ;;  %4481 = vrsqrt.f32 %v7911_v23 }
 0x2bb   :  { %v4472_v44 = vpop.eup %4471  ;;  %v3623_v18 = vmul.f32 0.5, %v3527_v50  ;;  %v3191_v59 = vmul.f32 %v3190_v4, %v7866_v26  ;;  %v2223_v34 = vand.u32 2147483647, %v7876_v61  ;;  %4483 = vlog2.f32 %v2244_v49 }
 0x2bc   :  { %v3188_v30 = vmul.f32 0.6931472, %v4472_v44  ;;  %vm3193_vm9 = vcmp.lt.f32.partialorder %v3192_v40, 0.0004427343  ;;  %v2221_v17 = vadd.f32 1.0, %v2220_v42  ;;  %v3204_v55 = vadd.f32 1.0, %v7919_v46 }
 0x2bd   :  { %v3719_v36 = vmul.f32 %v3623_v18, %v1382_v7  ;;  %v1388_v37 = vmul.f32 %v4779_v12, %v4470_v1  ;;  %v2234_v53 = vsel %vm7924_vm8, %v2231_v19, %v2228_v48  ;;  %v3181_v35 = vadd.f32 1.0, %v3180_v41  ;;  %v7988_v1 = vpop.xlane.xlu1 %421 }
 0x2be   :  { %v4474_v33 = vpop.eup %4473  ;;  %v3194_v26 = vsel %vm3193_vm9, %v3191_v59, %v3188_v30  ;;  %v3183_v10 = vand.u32 2147483647, %v7885_v39  ;;  %4485 = vlog2.f32 %v3204_v55  ;;  %vm953_vm10 = vcmp.eq.f32.partialorder %v7903_v52, inf }
 0x2bf   :  { %3815 = vst.msk [vmem:[%s9157_s1 + $0x1f0] sm:$0xff] %vm200_vm0, %v3719_v36  ;;  %v3530_v16 = vsub.f32 %v2234_v53, %v3194_v26  ;;  %v4476_v8 = vpop.eup %4475  ;;  %v2219_v24 = vmul.f32 0.6931472, %v4474_v33  ;;  %vm7945_vm11 = vcmp.lt.f32.partialorder %v2223_v34, 0.0004427343  ;;  %v2247_v47 = vmul.f32 -0.5, %v7909_v25 }
 0x2c0   :  { %4487 = vrsqrt.f32 %v7932_v3  ;;  %v2222_v58 = vmul.f32 %v7876_v61, %v2221_v17  ;;  %v2250_v38 = vand.u32 2147483647, %v7909_v25  ;;  %v3182_v43 = vmul.f32 %v3181_v35, %v7885_v39  ;;  %v8013_v17 = vpop.xlane.xlu0 %418 }
 0x2c1   :  { %v4478_v22 = vpop.eup %4477  ;;  %v3626_v21 = vmul.f32 0.5, %v3530_v16  ;;  %4489 = vrcp.f32 %v1228_v9  ;;  %v3207_v51 = vmul.f32 -0.5, %v7919_v46  ;;  %vm955_vm12 = vcmp.eq.f32.partialorder %v7903_v52, 0.0 }
 0x2c2   :  { %v3179_v60 = vmul.f32 0.6931472, %v4478_v22  ;;  %v4480_v29 = vpop.eup %4479  ;;  %v1386_v56 = vmul.f32 %v4780_v20, %v4476_v8  ;;  %vm3184_vm13 = vcmp.lt.f32.partialorder %v3183_v10, 0.0004427343  ;;  %v956_v61 = vand.u32 2147483648, %v7903_v52 }
 0x2c3   :  { %v3722_v27 = vmul.f32 %v3626_v21, %v1388_v37  ;;  %v2225_v39 = vsel %vm7945_vm11, %v2222_v58, %v2219_v24  ;;  %v2248_v63 = vadd.f32 1.0, %v2247_v47  ;;  %v952_v15 = vmul.f32 %v4480_v29, %v7903_v52  ;;  %v4781_v37 = vld [vmem:[%s9156_s0 + $0x218] sm:$0xff] }
 0x2c4   :  { %v3185_v14 = vsel %vm3184_vm13, %v3182_v43, %v3179_v60  ;;  %v4482_v57 = vpop.eup %4481  ;;  %vm7971_vm14 = vcmp.lt.f32.partialorder %v2250_v38, 0.0004427343  ;;  %v3210_v9 = vand.u32 2147483647, %v7919_v46  ;;  %4491 = vrsqrt.f32 %v7956_v31 }
 0x2c5   :  { %3818 = vst.msk [vmem:[%s9157_s1 + $0x208] sm:$0xff] %vm200_vm0, %v3722_v27  ;;  %v3529_v32 = vsub.f32 %v2225_v39, %v3185_v14  ;;  %v4484_v28 = vpop.eup %4483  ;;  %v3208_v19 = vadd.f32 1.0, %v3207_v51  ;;  %v954_v13 = vsel %vm953_vm10, %v7903_v52, %v952_v15  ;;  %v973_v5 = vmul.f32 %v4482_v57, %v7911_v23 }
 0x2c6   :  { %4493 = vrsqrt.f32 %v7962_v2  ;;  %v957_v11 = vsel %vm955_vm12, %v956_v61, %v954_v13  ;;  %vm974_vm15 = vcmp.eq.f32.partialorder %v7911_v23, inf  ;;  %v977_v4 = vand.u32 2147483648, %v7911_v23 }
 0x2c7   :  { %v3625_v62 = vmul.f32 0.5, %v3529_v32  ;;  %v2246_v50 = vmul.f32 0.6931472, %v4484_v28  ;;  %v1227_v40 = vmax.f32 %v957_v11, 1e-15  ;;  %v975_v42 = vsel %vm974_vm15, %v7911_v23, %v973_v5  ;;  %v8056_v32 = vpop.xlane.xlu1 %427 }
 0x2c8   :  { %vm976_vm1 = vcmp.eq.f32.partialorder %v7911_v23, 0.0  ;;  %v4486_v48 = vpop.eup %4485  ;;  %v2249_v49 = vmul.f32 %v7909_v25, %v2248_v63  ;;  %vm7991_vm2 = vcmp.lt.f32.partialorder %v3210_v9, 0.0004427343  ;;  %v3209_v18 = vmul.f32 %v3208_v19, %v7919_v46 }
 0x2c9   :  { %v3721_v41 = vmul.f32 %v3625_v62, %v1386_v56  ;;  %v978_v52 = vsel %vm976_vm1, %v977_v4, %v975_v42  ;;  %v3206_v7 = vmul.f32 0.6931472, %v4486_v48  ;;  %v7996_v0 = vclamps-f32 %v1227_v40, 0.9999999 }
 0x2ca   :  { %v4488_v45 = vpop.eup %4487  ;;  %v1230_v30 = vmax.f32 %v978_v52, 1e-15  ;;  %vm967_vm3 = vcmp.eq.f32.partialorder %v7932_v3, inf  ;;  %vm969_vm4 = vcmp.eq.f32.partialorder %v7932_v3, 0.0  ;;  %v970_v25 = vand.u32 2147483648, %v7932_v3 }
 0x2cb   :  { %v4490_v59 = vpop.eup %4489  ;;  %3817 = vst.msk [vmem:[%s9157_s1 + $0x200] sm:$0xff] %vm200_vm0, %v3721_v41  ;;  %4495 = vrsqrt.f32 %v7988_v1  ;;  %v2252_v23 = vsel %vm7971_vm14, %v2249_v49, %v2246_v50  ;;  %v3212_v46 = vsel %vm7991_vm2, %v3209_v18, %v3206_v7  ;;  %v2235_v34 = vadd.f32 1.0, %v7996_v0 }
 0x2cc   :  { %v966_v36 = vmul.f32 %v4488_v45, %v7932_v3  ;;  %vm988_vm5 = vcmp.eq.f32.partialorder %v7956_v31, inf  ;;  %v3532_v55 = vsub.f32 %v2252_v23, %v3212_v46  ;;  %4497 = vrcp.f32 %v1227_v40 }
 0x2cd   :  { %v2571_v33 = vsub.f32 0.0, %v7996_v0  ;;  %v8016_v12 = vclamps-f32 %v1230_v30, 0.9999999  ;;  %v1392_v53 = vmul.f32 %v4781_v37, %v4490_v59  ;;  %4499 = vlog2.f32 %v2235_v34 }
 0x2ce   :  { %vm990_vm6 = vcmp.eq.f32.partialorder %v7956_v31, 0.0  ;;  %v991_v26 = vand.u32 2147483648, %v7956_v31  ;;  %v4492_v35 = vpop.eup %4491  ;;  %v3628_v16 = vmul.f32 0.5, %v3532_v55  ;;  %vm981_vm7 = vcmp.eq.f32.partialorder %v7962_v2, inf }
 0x2cf   :  { %v3195_v10 = vadd.f32 1.0, %v2571_v33  ;;  %4501 = vrsqrt.f32 %v8013_v17  ;;  %v2238_v24 = vmul.f32 -0.5, %v7996_v0  ;;  %v2262_v54 = vadd.f32 1.0, %v8016_v12 }
 0x2d0   :  { %v4494_v8 = vpop.eup %4493  ;;  %4503 = vrcp.f32 %v1230_v30  ;;  %v968_v47 = vsel %vm967_vm3, %v7932_v3, %v966_v36  ;;  %v3724_v22 = vmul.f32 %v3628_v16, %v1392_v53  ;;  %vm983_vm8 = vcmp.eq.f32.partialorder %v7962_v2, 0.0 }
 0x2d1   :  { %4505 = vlog2.f32 %v3195_v10  ;;  %v984_v21 = vand.u32 2147483648, %v7962_v2  ;;  %v3198_v58 = vmul.f32 -0.5, %v2571_v33  ;;  %v8033_v38 = vsub.f32 0.0, %v8016_v12 }
 0x2d2   :  { %4507 = vlog2.f32 %v2262_v54  ;;  %v1005_v60 = vand.u32 2147483648, %v7988_v1  ;;  %3820 = vst.msk [vmem:[%s9157_s1 + $0x218] sm:$0xff] %vm200_vm0, %v3724_v22  ;;  %v2265_v43 = vmul.f32 -0.5, %v8016_v12  ;;  %v971_v51 = vsel %vm969_vm4, %v970_v25, %v968_v47 }
 0x2d3   :  { %v987_v29 = vmul.f32 %v4492_v35, %v7956_v31  ;;  %v980_v27 = vmul.f32 %v4494_v8, %v7962_v2  ;;  %v2239_v20 = vadd.f32 1.0, %v2238_v24  ;;  %v2241_v56 = vand.u32 2147483647, %v7996_v0  ;;  %v4783_v8 = vld [vmem:[%s9156_s0 + $0x228] sm:$0xff] }
 0x2d4   :  { %v3201_v61 = vand.u32 2147483647, %v2571_v33  ;;  %v3222_v39 = vadd.f32 1.0, %v8033_v38  ;;  %v2268_v63 = vand.u32 2147483647, %v8016_v12  ;;  %v3199_v6 = vadd.f32 1.0, %v3198_v58 }
 0x2d5   :  { %v8047_v14 = vpop.eup %4495  ;;  %v1229_v15 = vmax.f32 %v971_v51, 1e-15  ;;  %v989_v3 = vsel %vm988_vm5, %v7956_v31, %v987_v29  ;;  %v982_v57 = vsel %vm981_vm7, %v7962_v2, %v980_v27  ;;  %v998_v28 = vand.u32 2147483648, %v8013_v17 }
 0x2d6   :  { %4509 = vlog2.f32 %v3222_v39  ;;  %v992_v9 = vsel %vm990_vm6, %v991_v26, %v989_v3  ;;  %v4498_v19 = vpop.eup %4497  ;;  %v2266_v13 = vadd.f32 1.0, %v2265_v43  ;;  %v8065_v11 = vsel %vm983_vm8, %v984_v21, %v982_v57 }
 0x2d7   :  { %v8061_v5 = vclamps-f32 %v1229_v15, 0.9999999  ;;  %v1232_v62 = vmax.f32 %v992_v9, 1e-15  ;;  %v4500_v4 = vpop.eup %4499  ;;  %vm8067_vm9 = vcmp.lt.f32.partialorder %v2241_v56, 0.0004427343  ;;  %4511 = vrsqrt.f32 %v8056_v32 }
 0x2d8   :  { %vm8071_vm10 = vcmp.lt.f32.partialorder %v3201_v61, 0.0004427343  ;;  %v3225_v31 = vmul.f32 -0.5, %v8033_v38  ;;  %v2237_v48 = vmul.f32 0.6931472, %v4500_v4  ;;  %v2240_v2 = vmul.f32 %v7996_v0, %v2239_v20  ;;  %v4782_v0 = vld [vmem:[%s9156_s0 + $0x210] sm:$0xff] }
 0x2d9   :  { %v8077_v42 = vpop.eup %4501  ;;  %vm8080_vm11 = vcmp.lt.f32.partialorder %v2268_v63, 0.0004427343  ;;  %v2253_v49 = vadd.f32 1.0, %v8061_v5  ;;  %v1231_v44 = vmax.f32 %v8065_v11, 1e-15  ;;  %v3200_v45 = vmul.f32 %v3199_v6, %v2571_v33 }
 0x2da   :  { %v4504_v52 = vpop.eup %4503  ;;  %4513 = vrcp.f32 %v1229_v15  ;;  %v2573_v7 = vsub.f32 0.0, %v8061_v5  ;;  %v8087_v18 = vclamps-f32 %v1232_v62, 0.9999999  ;;  %v1390_v59 = vmul.f32 %v4782_v0, %v4498_v19 }
 0x2db   :  { %v4506_v30 = vpop.eup %4505  ;;  %v2267_v25 = vmul.f32 %v8016_v12, %v2266_v13  ;;  %v3228_v23 = vand.u32 2147483647, %v8033_v38  ;;  %4515 = vlog2.f32 %v2253_v49  ;;  %v3226_v36 = vadd.f32 1.0, %v3225_v31 }
 0x2dc   :  { %v4508_v46 = vpop.eup %4507  ;;  %v3197_v34 = vmul.f32 0.6931472, %v4506_v30  ;;  %v2256_v55 = vmul.f32 -0.5, %v8061_v5  ;;  %v3213_v33 = vadd.f32 1.0, %v2573_v7  ;;  %v2243_v37 = vsel %vm8067_vm9, %v2240_v2, %v2237_v48 }
 0x2dd   :  { %4517 = vrcp.f32 %v1232_v62  ;;  %v2280_v53 = vadd.f32 1.0, %v8087_v18  ;;  %v8100_v26 = vclamps-f32 %v1231_v44, 0.9999999  ;;  %v2264_v35 = vmul.f32 0.6931472, %v4508_v46 }
 0x2de   :  { %v3203_v12 = vsel %vm8071_vm10, %v3200_v45, %v3197_v34  ;;  %4519 = vlog2.f32 %v3213_v33  ;;  %v3216_v16 = vmul.f32 -0.5, %v2573_v7  ;;  %v1396_v24 = vmul.f32 %v4783_v8, %v4504_v52 }
 0x2df   :  { %v3531_v10 = vsub.f32 %v2243_v37, %v3203_v12  ;;  %vm8107_vm12 = vcmp.lt.f32.partialorder %v3228_v23, 0.0004427343  ;;  %v2283_v47 = vmul.f32 -0.5, %v8087_v18  ;;  %vm1002_vm13 = vcmp.eq.f32.partialorder %v7988_v1, inf  ;;  %v4785_v12 = vld [vmem:[%s9156_s0 + $0x238] sm:$0xff] }
 0x2e0   :  { %v4510_v22 = vpop.eup %4509  ;;  %v3227_v21 = vmul.f32 %v3226_v36, %v8033_v38  ;;  %v2259_v58 = vand.u32 2147483647, %v8061_v5  ;;  %4521 = vlog2.f32 %v2280_v53  ;;  %v8116_v43 = vsub.f32 0.0, %v8087_v18 }
 0x2e1   :  { %v3627_v51 = vmul.f32 0.5, %v3531_v10  ;;  %v3224_v29 = vmul.f32 0.6931472, %v4510_v22  ;;  %v2257_v27 = vadd.f32 1.0, %v2256_v55  ;;  %v2271_v20 = vadd.f32 1.0, %v8100_v26  ;;  %v8120_v56 = vpop.eup %4511 }
 0x2e2   :  { %vm1004_vm14 = vcmp.eq.f32.partialorder %v7988_v1, 0.0  ;;  %v2270_v61 = vsel %vm8080_vm11, %v2267_v25, %v2264_v35  ;;  %v3217_v39 = vadd.f32 1.0, %v3216_v16  ;;  %v3219_v38 = vand.u32 2147483647, %v2573_v7 }
 0x2e3   :  { %v3240_v63 = vadd.f32 1.0, %v8116_v43  ;;  %v3723_v15 = vmul.f32 %v3627_v51, %v1390_v59  ;;  %v3230_v3 = vsel %vm8107_vm12, %v3227_v21, %v3224_v29  ;;  %v2284_v57 = vadd.f32 1.0, %v2283_v47 }
 0x2e4   :  { %4523 = vlog2.f32 %v2271_v20  ;;  %vm995_vm15 = vcmp.eq.f32.partialorder %v8013_v17, inf  ;;  %v4514_v6 = vpop.eup %4513  ;;  %v3534_v9 = vsub.f32 %v2270_v61, %v3230_v3  ;;  %v2286_v19 = vand.u32 2147483647, %v8087_v18  ;;  %v8208_v3 = vpop.xlane.xlu0 %424 }
 0x2e5   :  { %4525 = vlog2.f32 %v3240_v63  ;;  %v1001_v13 = vmul.f32 %v8047_v14, %v7988_v1  ;;  %vm997_vm1 = vcmp.eq.f32.partialorder %v8013_v17, 0.0  ;;  %v4516_v62 = vpop.eup %4515  ;;  %3819 = vst.msk [vmem:[%s9157_s1 + $0x210] sm:$0xff] %vm200_vm0, %v3723_v15  ;;  %v2258_v4 = vmul.f32 %v8061_v5, %v2257_v27  ;;  %v4784_v5 = vld [vmem:[%s9156_s0 + $0x220] sm:$0xff] }
 0x2e6   :  { %vm8137_vm2 = vcmp.lt.f32.partialorder %v2259_v58, 0.0004427343  ;;  %v3243_v40 = vmul.f32 -0.5, %v8116_v43  ;;  %v2575_v31 = vsub.f32 0.0, %v8100_v26  ;;  %v3630_v48 = vmul.f32 0.5, %v3534_v9 }
 0x2e7   :  { %v3218_v14 = vmul.f32 %v3217_v39, %v2573_v7  ;;  %vm8143_vm3 = vcmp.lt.f32.partialorder %v3219_v38, 0.0004427343  ;;  %4527 = vrcp.f32 %v1231_v44  ;;  %v4518_v41 = vpop.eup %4517  ;;  %v1394_v49 = vmul.f32 %v4784_v5, %v4514_v6  ;;  %v4786_v7 = vld [vmem:[%s9156_s0 + $0x230] sm:$0xff] }
 0x2e8   :  { %v2255_v52 = vmul.f32 0.6931472, %v4516_v62  ;;  %v2285_v45 = vmul.f32 %v8087_v18, %v2284_v57  ;;  %v3231_v30 = vadd.f32 1.0, %v2575_v31  ;;  %v4520_v0 = vpop.eup %4519  ;;  %v3726_v59 = vmul.f32 %v3630_v48, %v1396_v24 }
 0x2e9   :  { %vm8153_vm4 = vcmp.lt.f32.partialorder %v2286_v19, 0.0004427343  ;;  %v2274_v25 = vmul.f32 -0.5, %v8100_v26  ;;  %v1003_v11 = vsel %vm1002_vm13, %v7988_v1, %v1001_v13  ;;  %v3215_v44 = vmul.f32 0.6931472, %v4520_v0 }
 0x2ea   :  { %v3244_v23 = vadd.f32 1.0, %v3243_v40  ;;  %v3246_v46 = vand.u32 2147483647, %v8116_v43  ;;  %4529 = vlog2.f32 %v3231_v30  ;;  %v4522_v34 = vpop.eup %4521  ;;  %3822 = vst.msk [vmem:[%s9157_s1 + $0x228] sm:$0xff] %vm200_vm0, %v3726_v59  ;;  %v2277_v18 = vand.u32 2147483647, %v8100_v26 }
 0x2eb   :  { %v3234_v36 = vmul.f32 -0.5, %v2575_v31  ;;  %v1006_v55 = vsel %vm1004_vm14, %v1005_v60, %v1003_v11  ;;  %v994_v33 = vmul.f32 %v8077_v42, %v8013_v17  ;;  %vm1016_vm5 = vcmp.eq.f32.partialorder %v8056_v32, inf }
 0x2ec   :  { %v2261_v37 = vsel %vm8137_vm2, %v2258_v4, %v2255_v52  ;;  %v3221_v53 = vsel %vm8143_vm3, %v3218_v14, %v3215_v44  ;;  %v1400_v35 = vmul.f32 %v4785_v12, %v4518_v41  ;;  %v1234_v16 = vmax.f32 %v1006_v55, 1e-15 }
 0x2ed   :  { %v3533_v10 = vsub.f32 %v2261_v37, %v3221_v53  ;;  %v2275_v1 = vadd.f32 1.0, %v2274_v25  ;;  %v3237_v60 = vand.u32 2147483647, %v2575_v31  ;;  %v996_v42 = vsel %vm995_vm15, %v8013_v17, %v994_v33 }
 0x2ee   :  { %v4524_v8 = vpop.eup %4523  ;;  %v2282_v24 = vmul.f32 0.6931472, %v4522_v34  ;;  %vm8184_vm6 = vcmp.lt.f32.partialorder %v3246_v46, 0.0004427343  ;;  %v8188_v47 = vclamps-f32 %v1234_v16, 0.9999999  ;;  %v999_v22 = vsel %vm997_vm1, %v998_v28, %v996_v42  ;;  %v8244_v46 = vpop.xlane.xlu1 %433 }
 0x2ef   :  { %v4526_v21 = vpop.eup %4525  ;;  %v3629_v58 = vmul.f32 0.5, %v3533_v10  ;;  %v3245_v51 = vmul.f32 %v3244_v23, %v8116_v43  ;;  %vm8195_vm7 = vcmp.lt.f32.partialorder %v2277_v18, 0.0004427343  ;;  %v3235_v27 = vadd.f32 1.0, %v3234_v36 }
 0x2f0   :  { %v3242_v20 = vmul.f32 0.6931472, %v4526_v21  ;;  %v2298_v61 = vadd.f32 1.0, %v8188_v47  ;;  %v1233_v39 = vmax.f32 %v999_v22, 1e-15  ;;  %v1015_v38 = vmul.f32 %v8120_v56, %v8056_v32 }
 0x2f1   :  { %v4528_v63 = vpop.eup %4527  ;;  %v3725_v15 = vmul.f32 %v3629_v58, %v1394_v49  ;;  %v2276_v17 = vmul.f32 %v8100_v26, %v2275_v1  ;;  %vm8203_vm8 = vcmp.lt.f32.partialorder %v3237_v60, 0.0004427343  ;;  %v2578_v43 = vsub.f32 0.0, %v8188_v47 }
 0x2f2   :  { %v2288_v57 = vsel %vm8153_vm4, %v2285_v45, %v2282_v24  ;;  %v3248_v6 = vsel %vm8184_vm6, %v3245_v51, %v3242_v20  ;;  %v2273_v9 = vmul.f32 0.6931472, %v4524_v8  ;;  %4531 = vlog2.f32 %v2298_v61  ;;  %v8275_v20 = vpop.xlane.xlu0 %430 }
 0x2f3   :  { %3821 = vst.msk [vmem:[%s9157_s1 + $0x220] sm:$0xff] %vm200_vm0, %v3725_v15  ;;  %v3536_v26 = vsub.f32 %v2288_v57, %v3248_v6  ;;  %v3236_v56 = vmul.f32 %v3235_v27, %v2575_v31  ;;  %4533 = vrcp.f32 %v1234_v16  ;;  %v3258_v19 = vadd.f32 1.0, %v2578_v43 }
 0x2f4   :  { %v4530_v13 = vpop.eup %4529  ;;  %v8218_v62 = vclamps-f32 %v1233_v39, 0.9999999  ;;  %v1017_v4 = vsel %vm1016_vm5, %v8056_v32, %v1015_v38  ;;  %v1019_v50 = vand.u32 2147483648, %v8056_v32  ;;  %4535 = vrsqrt.f32 %v8208_v3 }
 0x2f5   :  { %v3632_v40 = vmul.f32 0.5, %v3536_v26  ;;  %v3233_v48 = vmul.f32 0.6931472, %v4530_v13  ;;  %v2301_v14 = vmul.f32 -0.5, %v8188_v47  ;;  %4537 = vlog2.f32 %v3258_v19 }
 0x2f6   :  { %v2279_v31 = vsel %vm8195_vm7, %v2276_v17, %v2273_v9  ;;  %v3261_v2 = vmul.f32 -0.5, %v2578_v43  ;;  %v2289_v41 = vadd.f32 1.0, %v8218_v62  ;;  %vm1018_vm9 = vcmp.eq.f32.partialorder %v8056_v32, 0.0  ;;  %v4787_v9 = vld [vmem:[%s9156_s0 + $0x248] sm:$0xff] }
 0x2f7   :  { %v3728_v5 = vmul.f32 %v3632_v40, %v1400_v35  ;;  %v3239_v49 = vsel %vm8203_vm8, %v3236_v56, %v3233_v48  ;;  %v8233_v52 = vsub.f32 0.0, %v8218_v62  ;;  %v1020_v45 = vsel %vm1018_vm9, %v1019_v50, %v1017_v4 }
 0x2f8   :  { %v3535_v30 = vsub.f32 %v2279_v31, %v3239_v49  ;;  %4539 = vlog2.f32 %v2289_v41  ;;  %v2302_v0 = vadd.f32 1.0, %v2301_v14  ;;  %v2304_v59 = vand.u32 2147483647, %v8188_v47 }
 0x2f9   :  { %3824 = vst.msk [vmem:[%s9157_s1 + $0x238] sm:$0xff] %vm200_vm0, %v3728_v5  ;;  %v3249_v32 = vadd.f32 1.0, %v8233_v52  ;;  %v1398_v25 = vmul.f32 %v4786_v7, %v4528_v63  ;;  %v3264_v44 = vand.u32 2147483647, %v2578_v43  ;;  %v1236_v23 = vmax.f32 %v1020_v45, 1e-15 }
 0x2fa   :  { %v3631_v11 = vmul.f32 0.5, %v3535_v30  ;;  %v3262_v34 = vadd.f32 1.0, %v3261_v2  ;;  %v2292_v18 = vmul.f32 -0.5, %v8218_v62  ;;  %v2303_v53 = vmul.f32 %v8188_v47, %v2302_v0  ;;  %v4788_v7 = vld [vmem:[%s9156_s0 + $0x240] sm:$0xff] }
 0x2fb   :  { %4541 = vlog2.f32 %v3249_v32  ;;  %v8247_v33 = vclamps-f32 %v1236_v23, 0.9999999  ;;  %vm8250_vm10 = vcmp.lt.f32.partialorder %v2304_v59, 0.0004427343  ;;  %v3252_v35 = vmul.f32 -0.5, %v8233_v52 }
 0x2fc   :  { %v4532_v36 = vpop.eup %4531  ;;  %v3727_v55 = vmul.f32 %v3631_v11, %v1398_v25  ;;  %4543 = vrcp.f32 %v1233_v39  ;;  %vm8260_vm11 = vcmp.lt.f32.partialorder %v3264_v44, 0.0004427343  ;;  %v3263_v24 = vmul.f32 %v3262_v34, %v2578_v43 }
 0x2fd   :  { %v4534_v37 = vpop.eup %4533  ;;  %4545 = vrsqrt.f32 %v8244_v46  ;;  %v2300_v10 = vmul.f32 0.6931472, %v4532_v36  ;;  %v2316_v60 = vadd.f32 1.0, %v8247_v33  ;;  %v8266_v42 = vsub.f32 0.0, %v8247_v33 }
 0x2fe   :  { %v4536_v16 = vpop.eup %4535  ;;  %3823 = vst.msk [vmem:[%s9157_s1 + $0x230] sm:$0xff] %vm200_vm0, %v3727_v55  ;;  %v2293_v54 = vadd.f32 1.0, %v2292_v18  ;;  %v2295_v47 = vand.u32 2147483647, %v8218_v62  ;;  %vm1009_vm12 = vcmp.eq.f32.partialorder %v8208_v3, inf  ;;  %v1012_v58 = vand.u32 2147483648, %v8208_v3 }
 0x2ff   :  { %v4538_v8 = vpop.eup %4537  ;;  %v1008_v22 = vmul.f32 %v4536_v16, %v8208_v3  ;;  %4547 = vlog2.f32 %v2316_v60  ;;  %v3253_v51 = vadd.f32 1.0, %v3252_v35  ;;  %v3276_v29 = vadd.f32 1.0, %v8266_v42 }
 0x300   :  { %v3260_v21 = vmul.f32 0.6931472, %v4538_v8  ;;  %vm1011_vm13 = vcmp.eq.f32.partialorder %v8208_v3, 0.0  ;;  %v2306_v39 = vsel %vm8250_vm10, %v2303_v53, %v2300_v10  ;;  %4549 = vrcp.f32 %v1236_v23 }
 0x301   :  { %v1010_v27 = vsel %vm1009_vm12, %v8208_v3, %v1008_v22  ;;  %v3255_v17 = vand.u32 2147483647, %v8233_v52  ;;  %4551 = vlog2.f32 %v3276_v29  ;;  %v2319_v43 = vmul.f32 -0.5, %v8247_v33  ;;  %v8284_v3 = vpop.xlane.xlu1 %439 }
 0x302   :  { %v4540_v61 = vpop.eup %4539  ;;  %v3266_v38 = vsel %vm8260_vm11, %v3263_v24, %v3260_v21  ;;  %v1013_v63 = vsel %vm1011_vm13, %v1012_v58, %v1010_v27  ;;  %4553 = vrsqrt.f32 %v8275_v20  ;;  %v1404_v26 = vmul.f32 %v4787_v9, %v4534_v37 }
 0x303   :  { %v3538_v15 = vsub.f32 %v2306_v39, %v3266_v38  ;;  %v2291_v28 = vmul.f32 0.6931472, %v4540_v61  ;;  %v1235_v57 = vmax.f32 %v1013_v63, 1e-15  ;;  %v2294_v19 = vmul.f32 %v8218_v62, %v2293_v54 }
 0x304   :  { %vm8290_vm14 = vcmp.lt.f32.partialorder %v2295_v47, 0.0004427343  ;;  %v3254_v40 = vmul.f32 %v3253_v51, %v8233_v52  ;;  %v3279_v48 = vmul.f32 -0.5, %v8266_v42  ;;  %vm3256_vm15 = vcmp.lt.f32.partialorder %v3255_v17, 0.0004427343  ;;  %v4789_v51 = vld [vmem:[%s9156_s0 + $0x258] sm:$0xff] }
 0x305   :  { %v4542_v6 = vpop.eup %4541  ;;  %v3634_v56 = vmul.f32 0.5, %v3538_v15  ;;  %v8296_v14 = vclamps-f32 %v1235_v57, 0.9999999  ;;  %v2322_v41 = vand.u32 2147483647, %v8247_v33  ;;  %4555 = vrsqrt.f32 %v8284_v3  ;;  %v8352_v39 = vpop.xlane.xlu1 %445 }
 0x306   :  { %v4544_v4 = vpop.eup %4543  ;;  %v3251_v50 = vmul.f32 0.6931472, %v4542_v6  ;;  %v2297_v62 = vsel %vm8290_vm14, %v2294_v19, %v2291_v28  ;;  %v2320_v49 = vadd.f32 1.0, %v2319_v43  ;;  %v3282_v30 = vand.u32 2147483647, %v8266_v42 }
 0x307   :  { %v4546_v31 = vpop.eup %4545  ;;  %v3730_v2 = vmul.f32 %v3634_v56, %v1404_v26  ;;  %v2307_v45 = vadd.f32 1.0, %v8296_v14  ;;  %v8309_v0 = vsub.f32 0.0, %v8296_v14  ;;  %v1402_v25 = vmul.f32 %v4788_v7, %v4544_v4 }
 0x308   :  { %v3257_v5 = vsel %vm3256_vm15, %v3254_v40, %v3251_v50  ;;  %v1029_v59 = vmul.f32 %v4546_v31, %v8244_v46  ;;  %v3280_v11 = vadd.f32 1.0, %v3279_v48  ;;  %vm1030_vm1 = vcmp.eq.f32.partialorder %v8244_v46, inf }
 0x309   :  { %3826 = vst.msk [vmem:[%s9157_s1 + $0x248] sm:$0xff] %vm200_vm0, %v3730_v2  ;;  %v3537_v52 = vsub.f32 %v2297_v62, %v3257_v5  ;;  %v4548_v32 = vpop.eup %4547  ;;  %4557 = vlog2.f32 %v2307_v45  ;;  %vm8316_vm2 = vcmp.lt.f32.partialorder %v2322_v41, 0.0004427343  ;;  %v3267_v34 = vadd.f32 1.0, %v8309_v0 }
 0x30a   :  { %vm1032_vm3 = vcmp.eq.f32.partialorder %v8244_v46, 0.0  ;;  %v4550_v18 = vpop.eup %4549  ;;  %v2318_v36 = vmul.f32 0.6931472, %v4548_v32  ;;  %v2321_v55 = vmul.f32 %v8247_v33, %v2320_v49  ;;  %v1031_v37 = vsel %vm1030_vm1, %v8244_v46, %v1029_v59  ;;  %v8331_v33 = vpop.xlane.xlu0 %436 }
 0x30b   :  { %v3633_v44 = vmul.f32 0.5, %v3537_v52  ;;  %v1033_v53 = vand.u32 2147483648, %v8244_v46  ;;  %v4552_v12 = vpop.eup %4551  ;;  %vm8325_vm4 = vcmp.lt.f32.partialorder %v3282_v30, 0.0004427343  ;;  %4559 = vlog2.f32 %v3267_v34 }
 0x30c   :  { %vm1023_vm5 = vcmp.eq.f32.partialorder %v8275_v20, inf  ;;  %v4554_v10 = vpop.eup %4553  ;;  %v3278_v1 = vmul.f32 0.6931472, %v4552_v12  ;;  %v3281_v60 = vmul.f32 %v3280_v11, %v8266_v42  ;;  %4561 = vrcp.f32 %v1235_v57 }
 0x30d   :  { %v3729_v35 = vmul.f32 %v3633_v44, %v1402_v25  ;;  %v1034_v8 = vsel %vm1032_vm3, %v1033_v53, %v1031_v37  ;;  %v2310_v46 = vmul.f32 -0.5, %v8296_v14  ;;  %v3270_v24 = vmul.f32 -0.5, %v8309_v0 }
 0x30e   :  { %v1238_v54 = vmax.f32 %v1034_v8, 1e-15  ;;  %v1022_v47 = vmul.f32 %v4554_v10, %v8275_v20  ;;  %v2324_v22 = vsel %vm8316_vm2, %v2321_v55, %v2318_v36  ;;  %v3284_v42 = vsel %vm8325_vm4, %v3281_v60, %v3278_v1  ;;  %v8399_v23 = vpop.xlane.xlu0 %442 }
 0x30f   :  { %3825 = vst.msk [vmem:[%s9157_s1 + $0x240] sm:$0xff] %vm200_vm0, %v3729_v35  ;;  %vm1025_vm6 = vcmp.eq.f32.partialorder %v8275_v20, 0.0  ;;  %v1026_v21 = vand.u32 2147483648, %v8275_v20  ;;  %v4556_v58 = vpop.eup %4555  ;;  %v1408_v29 = vmul.f32 %v4789_v51, %v4550_v18  ;;  %v3540_v27 = vsub.f32 %v2324_v22, %v3284_v42 }
 0x310   :  { %v8349_v61 = vclamps-f32 %v1238_v54, 0.9999999  ;;  %4563 = vrsqrt.f32 %v8331_v33  ;;  %v2313_v38 = vand.u32 2147483647, %v8296_v14  ;;  %v1024_v63 = vsel %vm1023_vm5, %v8275_v20, %v1022_v47 }
 0x311   :  { %v1043_v15 = vmul.f32 %v4556_v58, %v8284_v3  ;;  %vm1044_vm7 = vcmp.eq.f32.partialorder %v8284_v3, inf  ;;  %v3636_v17 = vmul.f32 0.5, %v3540_v27  ;;  %v2311_v28 = vadd.f32 1.0, %v2310_v46 }
 0x312   :  { %v3271_v43 = vadd.f32 1.0, %v3270_v24  ;;  %v2334_v57 = vadd.f32 1.0, %v8349_v61  ;;  %v8362_v9 = vsub.f32 0.0, %v8349_v61  ;;  %v1027_v26 = vsel %vm1025_vm6, %v1026_v21, %v1024_v63  ;;  %v4791_v63 = vld [vmem:[%s9156_s0 + $0x268] sm:$0xff] }
 0x313   :  { %v4558_v6 = vpop.eup %4557  ;;  %v1045_v56 = vsel %vm1044_vm7, %v8284_v3, %v1043_v15  ;;  %4565 = vrsqrt.f32 %v8352_v39  ;;  %v3732_v19 = vmul.f32 %v3636_v17, %v1408_v29  ;;  %v3273_v13 = vand.u32 2147483647, %v8309_v0 }
 0x314   :  { %4567 = vlog2.f32 %v2334_v57  ;;  %v1047_v4 = vand.u32 2147483648, %v8284_v3  ;;  %v2309_v50 = vmul.f32 0.6931472, %v4558_v6  ;;  %v3294_v40 = vadd.f32 1.0, %v8362_v9 }
 0x315   :  { %4569 = vrcp.f32 %v1238_v54  ;;  %vm1046_vm8 = vcmp.eq.f32.partialorder %v8284_v3, 0.0  ;;  %v4560_v48 = vpop.eup %4559  ;;  %3828 = vst.msk [vmem:[%s9157_s1 + $0x258] sm:$0xff] %vm200_vm0, %v3732_v19  ;;  %v2312_v20 = vmul.f32 %v8296_v14, %v2311_v28  ;;  %vm8377_vm9 = vcmp.lt.f32.partialorder %v2313_v38, 0.0004427343 }
 0x316   :  { %v1237_v2 = vmax.f32 %v1027_v26, 1e-15  ;;  %v8381_v41 = vsel %vm1046_vm8, %v1047_v4, %v1045_v56  ;;  %v4562_v62 = vpop.eup %4561  ;;  %v3269_v5 = vmul.f32 0.6931472, %v4560_v48  ;;  %v3272_v49 = vmul.f32 %v3271_v43, %v8309_v0  ;;  %v4790_v0 = vld [vmem:[%s9156_s0 + $0x250] sm:$0xff] }
 0x317   :  { %v2337_v3 = vmul.f32 -0.5, %v8349_v61  ;;  %4571 = vlog2.f32 %v3294_v40  ;;  %vm3274_vm10 = vcmp.lt.f32.partialorder %v3273_v13, 0.0004427343  ;;  %v1240_v52 = vmax.f32 %v8381_v41, 1e-15 }
 0x318   :  { %v8385_v45 = vclamps-f32 %v1237_v2, 0.9999999  ;;  %v2315_v14 = vsel %vm8377_vm9, %v2312_v20, %v2309_v50  ;;  %v3275_v30 = vsel %vm3274_vm10, %v3272_v49, %v3269_v5  ;;  %vm1037_vm11 = vcmp.eq.f32.partialorder %v8331_v33, inf }
 0x319   :  { %v1040_v59 = vand.u32 2147483648, %v8331_v33  ;;  %v1406_v7 = vmul.f32 %v4790_v0, %v4562_v62  ;;  %v3539_v25 = vsub.f32 %v2315_v14, %v3275_v30  ;;  %v3297_v11 = vmul.f32 -0.5, %v8362_v9 }
 0x31a   :  { %v4564_v32 = vpop.eup %4563  ;;  %v2325_v44 = vadd.f32 1.0, %v8385_v45  ;;  %vm1039_vm12 = vcmp.eq.f32.partialorder %v8331_v33, 0.0  ;;  %vm1058_vm13 = vcmp.eq.f32.partialorder %v8352_v39, inf  ;;  %v2338_v34 = vadd.f32 1.0, %v2337_v3 }
 0x31b   :  { %v2340_v18 = vand.u32 2147483647, %v8349_v61  ;;  %v8403_v36 = vsub.f32 0.0, %v8385_v45  ;;  %v8407_v55 = vclamps-f32 %v1240_v52, 0.9999999  ;;  %v3635_v37 = vmul.f32 0.5, %v3539_v25 }
 0x31c   :  { %v3300_v53 = vand.u32 2147483647, %v8362_v9  ;;  %4573 = vlog2.f32 %v2325_v44  ;;  %vm1060_vm14 = vcmp.eq.f32.partialorder %v8352_v39, 0.0  ;;  %v1036_v10 = vmul.f32 %v4564_v32, %v8331_v33 }
 0x31d   :  { %v4566_v12 = vpop.eup %4565  ;;  %v3285_v35 = vadd.f32 1.0, %v8403_v36  ;;  %v2352_v16 = vadd.f32 1.0, %v8407_v55  ;;  %4575 = vrsqrt.f32 %v8399_v23  ;;  %v3731_v60 = vmul.f32 %v3635_v37, %v1406_v7 }
 0x31e   :  { %v4568_v1 = vpop.eup %4567  ;;  %v3298_v8 = vadd.f32 1.0, %v3297_v11  ;;  %4577 = vrcp.f32 %v1237_v2  ;;  %v1061_v46 = vand.u32 2147483648, %v8352_v39  ;;  %v2339_v54 = vmul.f32 %v8349_v61, %v2338_v34 }
 0x31f   :  { %v4570_v24 = vpop.eup %4569  ;;  %vm8417_vm15 = vcmp.lt.f32.partialorder %v2340_v18, 0.0004427343  ;;  %v2328_v22 = vmul.f32 -0.5, %v8385_v45  ;;  %4579 = vlog2.f32 %v3285_v35  ;;  %3827 = vst.msk [vmem:[%s9157_s1 + $0x250] sm:$0xff] %vm200_vm0, %v3731_v60  ;;  %v2336_v42 = vmul.f32 0.6931472, %v4568_v1 }
 0x320   :  { %vm8426_vm1 = vcmp.lt.f32.partialorder %v3300_v53, 0.0004427343  ;;  %4581 = vlog2.f32 %v2352_v16  ;;  %v8431_v58 = vsub.f32 0.0, %v8407_v55  ;;  %v2331_v29 = vand.u32 2147483647, %v8385_v45 }
 0x321   :  { %v4572_v51 = vpop.eup %4571  ;;  %v3288_v27 = vmul.f32 -0.5, %v8403_v36  ;;  %v1038_v61 = vsel %vm1037_vm11, %v8331_v33, %v1036_v10  ;;  %v1057_v38 = vmul.f32 %v4566_v12, %v8352_v39  ;;  %v1412_v15 = vmul.f32 %v4791_v63, %v4570_v24  ;;  %v4792_v10 = vld [vmem:[%s9156_s0 + $0x260] sm:$0xff] }
 0x322   :  { %v3296_v17 = vmul.f32 0.6931472, %v4572_v51  ;;  %v3299_v28 = vmul.f32 %v3298_v8, %v8362_v9  ;;  %v3312_v43 = vadd.f32 1.0, %v8431_v58  ;;  %v2329_v57 = vadd.f32 1.0, %v2328_v22  ;;  %v8500_v8 = vpop.xlane.xlu1 %451 }
 0x323   :  { %v2355_v6 = vmul.f32 -0.5, %v8407_v55  ;;  %v1041_v26 = vsel %vm1039_vm12, %v1040_v59, %v1038_v61  ;;  %v1059_v56 = vsel %vm1058_vm13, %v8352_v39, %v1057_v38  ;;  %v2342_v19 = vsel %vm8417_vm15, %v2339_v54, %v2336_v42 }
 0x324   :  { %v3302_v13 = vsel %vm8426_vm1, %v3299_v28, %v3296_v17  ;;  %4583 = vlog2.f32 %v3312_v43  ;;  %v1239_v9 = vmax.f32 %v1041_v26, 1e-15  ;;  %vm8454_vm2 = vcmp.lt.f32.partialorder %v2331_v29, 0.0004427343 }
 0x325   :  { %v3542_v4 = vsub.f32 %v2342_v19, %v3302_v13  ;;  %v3289_v40 = vadd.f32 1.0, %v3288_v27  ;;  %v8460_v33 = vsel %vm1060_vm14, %v1061_v46, %v1059_v56  ;;  %vm1051_vm3 = vcmp.eq.f32.partialorder %v8399_v23, inf  ;;  %v8531_v19 = vpop.xlane.xlu0 %448 }
 0x326   :  { %v4574_v48 = vpop.eup %4573  ;;  %v3291_v20 = vand.u32 2147483647, %v8403_v36  ;;  %4585 = vrcp.f32 %v1240_v52  ;;  %v3315_v31 = vmul.f32 -0.5, %v8431_v58  ;;  %v8467_v2 = vclamps-f32 %v1239_v9, 0.9999999  ;;  %v8575_v37 = vpop.xlane.xlu1 %457 }
 0x327   :  { %v4576_v62 = vpop.eup %4575  ;;  %v3638_v5 = vmul.f32 0.5, %v3542_v4  ;;  %v2356_v49 = vadd.f32 1.0, %v2355_v6  ;;  %v2358_v3 = vand.u32 2147483647, %v8407_v55  ;;  %v1242_v39 = vmax.f32 %v8460_v33, 1e-15 }
 0x328   :  { %v4578_v14 = vpop.eup %4577  ;;  %v2327_v30 = vmul.f32 0.6931472, %v4574_v48  ;;  %v2330_v59 = vmul.f32 %v8385_v45, %v2329_v57  ;;  %v2343_v32 = vadd.f32 1.0, %v8467_v2  ;;  %v8474_v41 = vsub.f32 0.0, %v8467_v2 }
 0x329   :  { %v4580_v52 = vpop.eup %4579  ;;  %v3734_v0 = vmul.f32 %v3638_v5, %v1412_v15  ;;  %v3290_v7 = vmul.f32 %v3289_v40, %v8403_v36  ;;  %v3318_v25 = vand.u32 2147483647, %v8431_v58  ;;  %v8480_v11 = vclamps-f32 %v1242_v39, 0.9999999 }
 0x32a   :  { %vm1053_vm4 = vcmp.eq.f32.partialorder %v8399_v23, 0.0  ;;  %v4582_v44 = vpop.eup %4581  ;;  %v3287_v34 = vmul.f32 0.6931472, %v4580_v52  ;;  %v3316_v45 = vadd.f32 1.0, %v3315_v31  ;;  %4587 = vlog2.f32 %v2343_v32 }
 0x32b   :  { %v1050_v18 = vmul.f32 %v4576_v62, %v8399_v23  ;;  %3830 = vst.msk [vmem:[%s9157_s1 + $0x268] sm:$0xff] %vm200_vm0, %v3734_v0  ;;  %vm3292_vm5 = vcmp.lt.f32.partialorder %v3291_v20, 0.0004427343  ;;  %v2357_v36 = vmul.f32 %v8407_v55, %v2356_v49  ;;  %vm8489_vm6 = vcmp.lt.f32.partialorder %v2358_v3, 0.0004427343 }
 0x32c   :  { %v3303_v53 = vadd.f32 1.0, %v8474_v41  ;;  %v2333_v12 = vsel %vm8454_vm2, %v2330_v59, %v2327_v30  ;;  %v3293_v35 = vsel %vm3292_vm5, %v3290_v7, %v3287_v34  ;;  %4589 = vrcp.f32 %v1239_v9  ;;  %v4793_v9 = vld [vmem:[%s9156_s0 + $0x278] sm:$0xff]  ;;  %v4794_v7 = vld [vmem:[%s9156_s0 + $0x270] sm:$0xff] }
 0x32d   :  { %v2370_v16 = vadd.f32 1.0, %v8480_v11  ;;  %v1410_v1 = vmul.f32 %v4792_v10, %v4578_v14  ;;  %v3541_v60 = vsub.f32 %v2333_v12, %v3293_v35  ;;  %v2354_v55 = vmul.f32 0.6931472, %v4582_v44 }
 0x32e   :  { %4591 = vlog2.f32 %v3303_v53  ;;  %v4584_v46 = vpop.eup %4583  ;;  %v3317_v24 = vmul.f32 %v3316_v45, %v8431_v58  ;;  %vm8503_vm7 = vcmp.lt.f32.partialorder %v3318_v25, 0.0004427343  ;;  %v2346_v47 = vmul.f32 -0.5, %v8467_v2 }
 0x32f   :  { %v1052_v22 = vsel %vm1051_vm3, %v8399_v23, %v1050_v18  ;;  %v3637_v42 = vmul.f32 0.5, %v3541_v60  ;;  %v3314_v21 = vmul.f32 0.6931472, %v4584_v46  ;;  %4593 = vlog2.f32 %v2370_v16 }
 0x330   :  { %v8512_v51 = vsub.f32 0.0, %v8480_v11  ;;  %v4586_v29 = vpop.eup %4585  ;;  %v3306_v27 = vmul.f32 -0.5, %v8474_v41  ;;  %v2373_v58 = vmul.f32 -0.5, %v8480_v11  ;;  %v1054_v61 = vand.u32 2147483648, %v8399_v23 }
 0x331   :  { %4595 = vrsqrt.f32 %v8500_v8  ;;  %v3733_v38 = vmul.f32 %v3637_v42, %v1410_v1  ;;  %v2360_v63 = vsel %vm8489_vm6, %v2357_v36, %v2354_v55  ;;  %v3320_v15 = vsel %vm8503_vm7, %v3317_v24, %v3314_v21  ;;  %v8581_v1 = vpop.xlane.xlu0 %454 }
 0x332   :  { %v3330_v17 = vadd.f32 1.0, %v8512_v51  ;;  %v3544_v28 = vsub.f32 %v2360_v63, %v3320_v15  ;;  %v2349_v43 = vand.u32 2147483647, %v8467_v2  ;;  %v1055_v57 = vsel %vm1053_vm4, %v1054_v61, %v1052_v22 }
 0x333   :  { %3829 = vst.msk [vmem:[%s9157_s1 + $0x260] sm:$0xff] %vm200_vm0, %v3733_v38  ;;  %v2347_v6 = vadd.f32 1.0, %v2346_v47  ;;  %v3309_v26 = vand.u32 2147483647, %v8474_v41  ;;  %v1241_v56 = vmax.f32 %v1055_v57, 1e-15  ;;  %v1416_v4 = vmul.f32 %v4793_v9, %v4586_v29 }
 0x334   :  { %4597 = vlog2.f32 %v3330_v17  ;;  %v4588_v13 = vpop.eup %4587  ;;  %v3640_v23 = vmul.f32 0.5, %v3544_v28  ;;  %v3307_v50 = vadd.f32 1.0, %v3306_v27  ;;  %v2374_v40 = vadd.f32 1.0, %v2373_v58  ;;  %v4795_v28 = vld [vmem:[%s9156_s0 + $0x288] sm:$0xff] }
 0x335   :  { %4599 = vrcp.f32 %v1242_v39  ;;  %v2376_v48 = vand.u32 2147483647, %v8480_v11  ;;  %v8539_v20 = vclamps-f32 %v1241_v56, 0.9999999  ;;  %v2345_v5 = vmul.f32 0.6931472, %v4588_v13 }
 0x336   :  { %v4590_v31 = vpop.eup %4589  ;;  %v3736_v62 = vmul.f32 %v3640_v23, %v1416_v4  ;;  %v3333_v49 = vmul.f32 -0.5, %v8512_v51  ;;  %4601 = vrsqrt.f32 %v8531_v19  ;;  %v2348_v14 = vmul.f32 %v8467_v2, %v2347_v6 }
 0x337   :  { %vm8544_vm8 = vcmp.lt.f32.partialorder %v2349_v43, 0.0004427343  ;;  %vm8548_vm9 = vcmp.lt.f32.partialorder %v3309_v26, 0.0004427343  ;;  %v2361_v39 = vadd.f32 1.0, %v8539_v20  ;;  %v3308_v32 = vmul.f32 %v3307_v50, %v8474_v41 }
 0x338   :  { %v4592_v3 = vpop.eup %4591  ;;  %3832 = vst.msk [vmem:[%s9157_s1 + $0x278] sm:$0xff] %vm200_vm0, %v3736_v62  ;;  %v2375_v2 = vmul.f32 %v8480_v11, %v2374_v40  ;;  %v8560_v52 = vsub.f32 0.0, %v8539_v20  ;;  %v1414_v25 = vmul.f32 %v4794_v7, %v4590_v31  ;;  %vm8565_vm10 = vcmp.lt.f32.partialorder %v2376_v48, 0.0004427343  ;;  %v8616_v40 = vpop.xlane.xlu1 %463 }
 0x339   :  { %v3305_v59 = vmul.f32 0.6931472, %v4592_v3  ;;  %v4594_v0 = vpop.eup %4593  ;;  %v3336_v34 = vand.u32 2147483647, %v8512_v51  ;;  %4603 = vlog2.f32 %v2361_v39  ;;  %v2351_v41 = vsel %vm8544_vm8, %v2348_v14, %v2345_v5 }
 0x33a   :  { %v3334_v18 = vadd.f32 1.0, %v3333_v49  ;;  %v3321_v36 = vadd.f32 1.0, %v8560_v52  ;;  %4605 = vrcp.f32 %v1241_v56  ;;  %vm1072_vm11 = vcmp.eq.f32.partialorder %v8500_v8, inf }
 0x33b   :  { %v4596_v45 = vpop.eup %4595  ;;  %v3311_v11 = vsel %vm8548_vm9, %v3308_v32, %v3305_v59  ;;  %v2372_v35 = vmul.f32 0.6931472, %v4594_v0  ;;  %v2364_v16 = vmul.f32 -0.5, %v8539_v20  ;;  %v1075_v10 = vand.u32 2147483648, %v8500_v8 }
 0x33c   :  { %v3543_v53 = vsub.f32 %v2351_v41, %v3311_v11  ;;  %v1071_v12 = vmul.f32 %v4596_v45, %v8500_v8  ;;  %4607 = vlog2.f32 %v3321_v36  ;;  %vm1074_vm12 = vcmp.eq.f32.partialorder %v8500_v8, 0.0 }
 0x33d   :  { %4609 = vrsqrt.f32 %v8575_v37  ;;  %v3335_v54 = vmul.f32 %v3334_v18, %v8512_v51  ;;  %vm3337_vm13 = vcmp.lt.f32.partialorder %v3336_v34, 0.0004427343  ;;  %v3324_v21 = vmul.f32 -0.5, %v8560_v52 }
 0x33e   :  { %v4598_v60 = vpop.eup %4597  ;;  %v3639_v55 = vmul.f32 0.5, %v3543_v53  ;;  %v1073_v46 = vsel %vm1072_vm11, %v8500_v8, %v1071_v12  ;;  %4611 = vrsqrt.f32 %v8581_v1  ;;  %v2378_v58 = vsel %vm8565_vm10, %v2375_v2, %v2372_v35 }
 0x33f   :  { %v3332_v24 = vmul.f32 0.6931472, %v4598_v60  ;;  %v1076_v47 = vsel %vm1074_vm12, %v1075_v10, %v1073_v46  ;;  %v4600_v22 = vpop.eup %4599  ;;  %v2365_v8 = vadd.f32 1.0, %v2364_v16  ;;  %v2367_v38 = vand.u32 2147483647, %v8539_v20  ;;  %v8655_v16 = vpop.xlane.xlu0 %460 }
 0x340   :  { %v3735_v42 = vmul.f32 %v3639_v55, %v1414_v25  ;;  %v1244_v29 = vmax.f32 %v1076_v47, 1e-15  ;;  %v4602_v27 = vpop.eup %4601  ;;  %v3327_v63 = vand.u32 2147483647, %v8560_v52  ;;  %v1420_v43 = vmul.f32 %v4795_v28, %v4600_v22  ;;  %v4796_v25 = vld [vmem:[%s9156_s0 + $0x280] sm:$0xff] }
 0x341   :  { %v3338_v61 = vsel %vm3337_vm13, %v3335_v54, %v3332_v24  ;;  %v1064_v17 = vmul.f32 %v4602_v27, %v8531_v19  ;;  %vm1065_vm14 = vcmp.eq.f32.partialorder %v8531_v19, inf  ;;  %vm1067_vm15 = vcmp.eq.f32.partialorder %v8531_v19, 0.0 }
 0x342   :  { %3831 = vst.msk [vmem:[%s9157_s1 + $0x270] sm:$0xff] %vm200_vm0, %v3735_v42  ;;  %v3546_v51 = vsub.f32 %v2378_v58, %v3338_v61  ;;  %v8597_v15 = vclamps-f32 %v1244_v29, 0.9999999  ;;  %v3325_v26 = vadd.f32 1.0, %v3324_v21  ;;  %v1068_v13 = vand.u32 2147483648, %v8531_v19  ;;  %v8682_v61 = vpop.xlane.xlu1 %469 }
 0x343   :  { %v4604_v57 = vpop.eup %4603  ;;  %v2366_v9 = vmul.f32 %v8539_v20, %v2365_v8  ;;  %vm8608_vm1 = vcmp.lt.f32.partialorder %v2367_v38, 0.0004427343  ;;  %v1066_v50 = vsel %vm1065_vm14, %v8531_v19, %v1064_v17  ;;  %vm8618_vm2 = vcmp.lt.f32.partialorder %v3327_v63, 0.0004427343 }
 0x344   :  { %v3642_v6 = vmul.f32 0.5, %v3546_v51  ;;  %v2388_v56 = vadd.f32 1.0, %v8597_v15  ;;  %v8613_v23 = vsub.f32 0.0, %v8597_v15  ;;  %v4606_v48 = vpop.eup %4605  ;;  %v2363_v62 = vmul.f32 0.6931472, %v4604_v57 }
 0x345   :  { %vm1086_vm3 = vcmp.eq.f32.partialorder %v8575_v37, inf  ;;  %vm1088_vm4 = vcmp.eq.f32.partialorder %v8575_v37, 0.0  ;;  %v3326_v30 = vmul.f32 %v3325_v26, %v8560_v52  ;;  %v1069_v33 = vsel %vm1067_vm15, %v1068_v13, %v1066_v50 }
 0x346   :  { %v3738_v31 = vmul.f32 %v3642_v6, %v1420_v43  ;;  %4613 = vlog2.f32 %v2388_v56  ;;  %v4608_v20 = vpop.eup %4607  ;;  %v3348_v49 = vadd.f32 1.0, %v8613_v23  ;;  %v2391_v39 = vmul.f32 -0.5, %v8597_v15 }
 0x347   :  { %4615 = vrcp.f32 %v1244_v29  ;;  %v4610_v3 = vpop.eup %4609  ;;  %v3323_v14 = vmul.f32 0.6931472, %v4608_v20  ;;  %v1243_v59 = vmax.f32 %v1069_v33, 1e-15  ;;  %v1089_v32 = vand.u32 2147483648, %v8575_v37 }
 0x348   :  { %3834 = vst.msk [vmem:[%s9157_s1 + $0x288] sm:$0xff] %vm200_vm0, %v3738_v31  ;;  %4617 = vrsqrt.f32 %v8616_v40  ;;  %v4612_v2 = vpop.eup %4611  ;;  %v2369_v0 = vsel %vm8608_vm1, %v2366_v9, %v2363_v62  ;;  %v3351_v52 = vmul.f32 -0.5, %v8613_v23  ;;  %v1085_v19 = vmul.f32 %v4610_v3, %v8575_v37  ;;  %v4797_v31 = vld [vmem:[%s9156_s0 + $0x298] sm:$0xff] }
 0x349   :  { %4619 = vlog2.f32 %v3348_v49  ;;  %v3329_v7 = vsel %vm8618_vm2, %v3326_v30, %v3323_v14  ;;  %v1418_v44 = vmul.f32 %v4796_v25, %v4606_v48  ;;  %v8644_v45 = vclamps-f32 %v1243_v59, 0.9999999 }
 0x34a   :  { %v3545_v34 = vsub.f32 %v2369_v0, %v3329_v7  ;;  %vm1079_vm5 = vcmp.eq.f32.partialorder %v8581_v1, inf  ;;  %v1087_v41 = vsel %vm1086_vm3, %v8575_v37, %v1085_v19  ;;  %v1078_v11 = vmul.f32 %v4612_v2, %v8581_v1 }
 0x34b   :  { %vm1081_vm6 = vcmp.eq.f32.partialorder %v8581_v1, 0.0  ;;  %v1082_v18 = vand.u32 2147483648, %v8581_v1  ;;  %v2392_v53 = vadd.f32 1.0, %v2391_v39  ;;  %v2394_v12 = vand.u32 2147483647, %v8597_v15 }
 0x34c   :  { %v3641_v36 = vmul.f32 0.5, %v3545_v34  ;;  %v2379_v35 = vadd.f32 1.0, %v8644_v45  ;;  %v3352_v10 = vadd.f32 1.0, %v3351_v52  ;;  %v3354_v60 = vand.u32 2147483647, %v8613_v23 }
 0x34d   :  { %v8659_v55 = vsub.f32 0.0, %v8644_v45  ;;  %v1090_v46 = vsel %vm1088_vm4, %v1089_v32, %v1087_v41  ;;  %v1080_v47 = vsel %vm1079_vm5, %v8581_v1, %v1078_v11  ;;  %vm1100_vm7 = vcmp.eq.f32.partialorder %v8616_v40, inf }
 0x34e   :  { %v3737_v24 = vmul.f32 %v3641_v36, %v1418_v44  ;;  %4621 = vlog2.f32 %v2379_v35  ;;  %v1246_v54 = vmax.f32 %v1090_v46, 1e-15  ;;  %vm1102_vm8 = vcmp.eq.f32.partialorder %v8616_v40, 0.0 }
 0x34f   :  { %v3339_v42 = vadd.f32 1.0, %v8659_v55  ;;  %v1103_v21 = vand.u32 2147483648, %v8616_v40  ;;  %4623 = vrsqrt.f32 %v8655_v16  ;;  %v2393_v29 = vmul.f32 %v8597_v15, %v2392_v53 }
 0x350   :  { %v4614_v22 = vpop.eup %4613  ;;  %3833 = vst.msk [vmem:[%s9157_s1 + $0x280] sm:$0xff] %vm200_vm0, %v3737_v24  ;;  %vm8676_vm9 = vcmp.lt.f32.partialorder %v2394_v12, 0.0004427343  ;;  %4625 = vrcp.f32 %v1243_v59  ;;  %v8680_v58 = vclamps-f32 %v1246_v54, 0.9999999  ;;  %v2382_v51 = vmul.f32 -0.5, %v8644_v45 }
 0x351   :  { %v4616_v37 = vpop.eup %4615  ;;  %v2390_v38 = vmul.f32 0.6931472, %v4614_v22  ;;  %4627 = vlog2.f32 %v3339_v42  ;;  %v8687_v63 = vsel %vm1081_vm6, %v1082_v18, %v1080_v47  ;;  %v3353_v15 = vmul.f32 %v3352_v10, %v8613_v23 }
 0x352   :  { %v4618_v8 = vpop.eup %4617  ;;  %vm8690_vm10 = vcmp.lt.f32.partialorder %v3354_v60, 0.0004427343  ;;  %v3342_v43 = vmul.f32 -0.5, %v8659_v55  ;;  %v2406_v57 = vadd.f32 1.0, %v8680_v58  ;;  %v8697_v26 = vsub.f32 0.0, %v8680_v58 }
 0x353   :  { %v4620_v17 = vpop.eup %4619  ;;  %v1245_v56 = vmax.f32 %v8687_v63, 1e-15  ;;  %4629 = vrsqrt.f32 %v8682_v61  ;;  %v2385_v1 = vand.u32 2147483647, %v8644_v45  ;;  %v1099_v13 = vmul.f32 %v4618_v8, %v8616_v40 }
 0x354   :  { %v3350_v6 = vmul.f32 0.6931472, %v4620_v17  ;;  %4631 = vlog2.f32 %v2406_v57  ;;  %v1096_v9 = vand.u32 2147483648, %v8655_v16  ;;  %v2396_v4 = vsel %vm8676_vm9, %v2393_v29, %v2390_v38 }
 0x355   :  { %v2383_v50 = vadd.f32 1.0, %v2382_v51  ;;  %v3366_v48 = vadd.f32 1.0, %v8697_v26  ;;  %v1424_v62 = vmul.f32 %v4797_v31, %v4616_v37  ;;  %v3343_v20 = vadd.f32 1.0, %v3342_v43 }
 0x356   :  { %v3356_v23 = vsel %vm8690_vm10, %v3353_v15, %v3350_v6  ;;  %v3345_v49 = vand.u32 2147483647, %v8659_v55  ;;  %v2409_v3 = vmul.f32 -0.5, %v8680_v58  ;;  %v8714_v14 = vclamps-f32 %v1245_v56, 0.9999999 }
 0x357   :  { %v3548_v5 = vsub.f32 %v2396_v4, %v3356_v23  ;;  %4633 = vlog2.f32 %v3366_v48  ;;  %v1101_v30 = vsel %vm1100_vm7, %v8616_v40, %v1099_v13  ;;  %vm1093_vm11 = vcmp.eq.f32.partialorder %v8655_v16, inf }
 0x358   :  { %v4622_v33 = vpop.eup %4621  ;;  %4635 = vrcp.f32 %v1246_v54  ;;  %v2412_v59 = vand.u32 2147483647, %v8680_v58  ;;  %v8723_v32 = vsel %vm1102_vm8, %v1103_v21, %v1101_v30  ;;  %v2384_v0 = vmul.f32 %v8644_v45, %v2383_v50 }
 0x359   :  { %v3644_v39 = vmul.f32 0.5, %v3548_v5  ;;  %v4624_v2 = vpop.eup %4623  ;;  %vm8726_vm12 = vcmp.lt.f32.partialorder %v2385_v1, 0.0004427343  ;;  %v3369_v52 = vmul.f32 -0.5, %v8697_v26  ;;  %v2397_v19 = vadd.f32 1.0, %v8714_v14 }
 0x35a   :  { %v4626_v25 = vpop.eup %4625  ;;  %v2381_v34 = vmul.f32 0.6931472, %v4622_v33  ;;  %v8733_v41 = vsub.f32 0.0, %v8714_v14  ;;  %v1248_v40 = vmax.f32 %v8723_v32, 1e-15  ;;  %vm1095_vm13 = vcmp.eq.f32.partialorder %v8655_v16, 0.0 }
 0x35b   :  { %v3740_v44 = vmul.f32 %v3644_v39, %v1424_v62  ;;  %v4628_v11 = vpop.eup %4627  ;;  %v3344_v45 = vmul.f32 %v3343_v20, %v8659_v55  ;;  %vm8738_vm14 = vcmp.lt.f32.partialorder %v3345_v49, 0.0004427343  ;;  %v2410_v36 = vadd.f32 1.0, %v2409_v3  ;;  %v4798_v55 = vld [vmem:[%s9156_s0 + $0x290] sm:$0xff]  ;;  %v4799_v20 = vld [vmem:[%s9156_s0 + $0x2a8] sm:$0xff] }
 0x35c   :  { %4637 = vlog2.f32 %v2397_v19  ;;  %v3341_v53 = vmul.f32 0.6931472, %v4628_v11  ;;  %vm8746_vm15 = vcmp.lt.f32.partialorder %v2412_v59, 0.0004427343  ;;  %v3357_v35 = vadd.f32 1.0, %v8733_v41 }
 0x35d   :  { %3836 = vst.msk [vmem:[%s9157_s1 + $0x298] sm:$0xff] %vm200_vm0, %v3740_v44  ;;  %v1092_v10 = vmul.f32 %v4624_v2, %v8655_v16  ;;  %v4630_v60 = vpop.eup %4629  ;;  %v1422_v46 = vmul.f32 %v4798_v55, %v4626_v25  ;;  %v3370_v24 = vadd.f32 1.0, %v3369_v52  ;;  %v3372_v54 = vand.u32 2147483647, %v8697_v26 }
 0x35e   :  { %v8756_v47 = vclamps-f32 %v1248_v40, 0.9999999  ;;  %v4632_v22 = vpop.eup %4631  ;;  %v2387_v42 = vsel %vm8726_vm12, %v2384_v0, %v2381_v34  ;;  %v3347_v21 = vsel %vm8738_vm14, %v3344_v45, %v3341_v53  ;;  %v2400_v37 = vmul.f32 -0.5, %v8714_v14 }
 0x35f   :  { %4639 = vlog2.f32 %v3357_v35  ;;  %vm1114_vm1 = vcmp.eq.f32.partialorder %v8682_v61, inf  ;;  %v3547_v29 = vsub.f32 %v2387_v42, %v3347_v21  ;;  %v2411_v27 = vmul.f32 %v8680_v58, %v2410_v36  ;;  %v8831_v35 = vpop.xlane.xlu0 %466  ;;  %v8839_v42 = vpop.xlane.xlu1 %475 }
 0x360   :  { %v3360_v8 = vmul.f32 -0.5, %v8733_v41  ;;  %v2424_v38 = vadd.f32 1.0, %v8756_v47  ;;  %v2408_v51 = vmul.f32 0.6931472, %v4632_v22  ;;  %4641 = vrcp.f32 %v1245_v56 }
 0x361   :  { %v8768_v63 = vsub.f32 0.0, %v8756_v47  ;;  %v1094_v17 = vsel %vm1093_vm11, %v8655_v16, %v1092_v10  ;;  %v4634_v15 = vpop.eup %4633  ;;  %v3643_v28 = vmul.f32 0.5, %v3547_v29  ;;  %vm8773_vm2 = vcmp.lt.f32.partialorder %v3372_v54, 0.0004427343 }
 0x362   :  { %v2403_v58 = vand.u32 2147483647, %v8714_v14  ;;  %4643 = vlog2.f32 %v2424_v38  ;;  %v4636_v57 = vpop.eup %4635  ;;  %v3368_v6 = vmul.f32 0.6931472, %v4634_v15  ;;  %v3371_v56 = vmul.f32 %v3370_v24, %v8697_v26 }
 0x363   :  { %v2401_v1 = vadd.f32 1.0, %v2400_v37  ;;  %v3384_v13 = vadd.f32 1.0, %v8768_v63  ;;  %v3739_v4 = vmul.f32 %v3643_v28, %v1422_v46  ;;  %v3361_v23 = vadd.f32 1.0, %v3360_v8  ;;  %v4800_v46 = vld [vmem:[%s9156_s0 + $0x2a0] sm:$0xff] }
 0x364   :  { %v3363_v50 = vand.u32 2147483647, %v8733_v41  ;;  %v1097_v48 = vsel %vm1095_vm13, %v1096_v9, %v1094_v17  ;;  %v2414_v31 = vsel %vm8746_vm15, %v2411_v27, %v2408_v51  ;;  %v3374_v62 = vsel %vm8773_vm2, %v3371_v56, %v3368_v6  ;;  %v8858_v56 = vpop.xlane.xlu0 %472 }
 0x365   :  { %4645 = vlog2.f32 %v3384_v13  ;;  %v1247_v26 = vmax.f32 %v1097_v48, 1e-15  ;;  %3835 = vst.msk [vmem:[%s9157_s1 + $0x290] sm:$0xff] %vm200_vm0, %v3739_v4  ;;  %v1428_v16 = vmul.f32 %v4799_v20, %v4636_v57  ;;  %v3550_v9 = vsub.f32 %v2414_v31, %v3374_v62 }
 0x366   :  { %v4638_v5 = vpop.eup %4637  ;;  %vm8796_vm3 = vcmp.lt.f32.partialorder %v2403_v58, 0.0004427343  ;;  %v1113_v3 = vmul.f32 %v4630_v60, %v8682_v61  ;;  %v2402_v30 = vmul.f32 %v8714_v14, %v2401_v1  ;;  %v2427_v33 = vmul.f32 -0.5, %v8756_v47 }
 0x367   :  { %v3387_v39 = vmul.f32 -0.5, %v8768_v63  ;;  %v8804_v59 = vclamps-f32 %v1247_v26, 0.9999999  ;;  %v3646_v32 = vmul.f32 0.5, %v3550_v9  ;;  %v2399_v2 = vmul.f32 0.6931472, %v4638_v5 }
 0x368   :  { %4647 = vrcp.f32 %v1248_v40  ;;  %v1115_v0 = vsel %vm1114_vm1, %v8682_v61, %v1113_v3  ;;  %v3362_v52 = vmul.f32 %v3361_v23, %v8733_v41  ;;  %vm8810_vm4 = vcmp.lt.f32.partialorder %v3363_v50, 0.0004427343  ;;  %v4801_v50 = vld [vmem:[%s9156_s0 + $0x2b8] sm:$0xff] }
 0x369   :  { %v4640_v7 = vpop.eup %4639  ;;  %v2415_v14 = vadd.f32 1.0, %v8804_v59  ;;  %v1117_v25 = vand.u32 2147483648, %v8682_v61  ;;  %v3742_v44 = vmul.f32 %v3646_v32, %v1428_v16  ;;  %v8817_v11 = vsub.f32 0.0, %v8804_v59 }
 0x36a   :  { %v3359_v34 = vmul.f32 0.6931472, %v4640_v7  ;;  %vm1116_vm5 = vcmp.eq.f32.partialorder %v8682_v61, 0.0  ;;  %v4642_v40 = vpop.eup %4641  ;;  %v2428_v45 = vadd.f32 1.0, %v2427_v33  ;;  %v3388_v18 = vadd.f32 1.0, %v3387_v39 }
 0x36b   :  { %4649 = vlog2.f32 %v2415_v14  ;;  %v8820_v41 = vsel %vm1116_vm5, %v1117_v25, %v1115_v0  ;;  %3838 = vst.msk [vmem:[%s9157_s1 + $0x2a8] sm:$0xff] %vm200_vm0, %v3742_v44  ;;  %v2405_v53 = vsel %vm8796_vm3, %v2402_v30, %v2399_v2  ;;  %v3375_v61 = vadd.f32 1.0, %v8817_v11  ;;  %v8884_v2 = vpop.xlane.xlu1 %481  ;;  %v4802_v0 = vld [vmem:[%s9156_s0 + $0x2b0] sm:$0xff] }
 0x36c   :  { %v4644_v36 = vpop.eup %4643  ;;  %v3365_v12 = vsel %vm8810_vm4, %v3362_v52, %v3359_v34  ;;  %v2430_v60 = vand.u32 2147483647, %v8756_v47  ;;  %v3390_v55 = vand.u32 2147483647, %v8768_v63  ;;  %4651 = vrcp.f32 %v1247_v26 }
 0x36d   :  { %v3549_v10 = vsub.f32 %v2405_v53, %v3365_v12  ;;  %v1426_v24 = vmul.f32 %v4800_v46, %v4642_v40  ;;  %v2426_v54 = vmul.f32 0.6931472, %v4644_v36  ;;  %4653 = vlog2.f32 %v3375_v61 }
 0x36e   :  { %v1250_v22 = vmax.f32 %v8820_v41, 1e-15  ;;  %v2429_v29 = vmul.f32 %v8756_v47, %v2428_v45  ;;  %v3389_v27 = vmul.f32 %v3388_v18, %v8768_v63  ;;  %4655 = vrsqrt.f32 %v8831_v35 }
 0x36f   :  { %v4646_v21 = vpop.eup %4645  ;;  %v3645_v37 = vmul.f32 0.5, %v3549_v10  ;;  %v2418_v38 = vmul.f32 -0.5, %v8804_v59  ;;  %v3378_v51 = vmul.f32 -0.5, %v8817_v11  ;;  %vm2431_vm6 = vcmp.lt.f32.partialorder %v2430_v60, 0.0004427343 }
 0x370   :  { %v3386_v8 = vmul.f32 0.6931472, %v4646_v21  ;;  %v8846_v17 = vclamps-f32 %v1250_v22, 0.9999999  ;;  %vm3391_vm7 = vcmp.lt.f32.partialorder %v3390_v55, 0.0004427343  ;;  %4657 = vrsqrt.f32 %v8839_v42 }
 0x371   :  { %v3741_v15 = vmul.f32 %v3645_v37, %v1426_v24  ;;  %v2432_v43 = vsel %vm2431_vm6, %v2429_v29, %v2426_v54  ;;  %v2421_v57 = vand.u32 2147483647, %v8804_v59  ;;  %v2419_v1 = vadd.f32 1.0, %v2418_v38 }
 0x372   :  { %v4648_v28 = vpop.eup %4647  ;;  %v3392_v58 = vsel %vm3391_vm7, %v3389_v27, %v3386_v8  ;;  %v2442_v47 = vadd.f32 1.0, %v8846_v17  ;;  %v8856_v6 = vsub.f32 0.0, %v8846_v17  ;;  %v3379_v13 = vadd.f32 1.0, %v3378_v51 }
 0x373   :  { %3837 = vst.msk [vmem:[%s9157_s1 + $0x2a0] sm:$0xff] %vm200_vm0, %v3741_v15  ;;  %v3552_v63 = vsub.f32 %v2432_v43, %v3392_v58  ;;  %v3381_v4 = vand.u32 2147483647, %v8817_v11  ;;  %v1432_v48 = vmul.f32 %v4801_v50, %v4648_v28  ;;  %vm1107_vm8 = vcmp.eq.f32.partialorder %v8831_v35, inf  ;;  %v8932_v28 = vpop.xlane.xlu1 %487  ;;  %v4803_v50 = vld [vmem:[%s9156_s0 + $0x2c8] sm:$0xff] }
 0x374   :  { %4659 = vlog2.f32 %v2442_v47  ;;  %v3402_v62 = vadd.f32 1.0, %v8856_v6  ;;  %vm8867_vm9 = vcmp.lt.f32.partialorder %v2421_v57, 0.0004427343  ;;  %v2420_v49 = vmul.f32 %v8804_v59, %v2419_v1 }
 0x375   :  { %v4650_v23 = vpop.eup %4649  ;;  %v3648_v31 = vmul.f32 0.5, %v3552_v63  ;;  %4661 = vrsqrt.f32 %v8858_v56  ;;  %v3380_v3 = vmul.f32 %v3379_v13, %v8817_v11  ;;  %vm8873_vm10 = vcmp.lt.f32.partialorder %v3381_v4, 0.0004427343  ;;  %v8898_v11 = vpop.xlane.xlu0 %478 }
 0x376   :  { %v4652_v26 = vpop.eup %4651  ;;  %v2417_v20 = vmul.f32 0.6931472, %v4650_v23  ;;  %4663 = vlog2.f32 %v3402_v62  ;;  %vm1109_vm11 = vcmp.eq.f32.partialorder %v8831_v35, 0.0  ;;  %v2445_v32 = vmul.f32 -0.5, %v8846_v17 }
 0x377   :  { %v3744_v5 = vmul.f32 %v3648_v31, %v1432_v48  ;;  %v4654_v9 = vpop.eup %4653  ;;  %4665 = vrcp.f32 %v1250_v22  ;;  %v3405_v59 = vmul.f32 -0.5, %v8856_v6  ;;  %v1430_v7 = vmul.f32 %v4802_v0, %v4652_v26 }
 0x378   :  { %v4656_v33 = vpop.eup %4655  ;;  %v3377_v39 = vmul.f32 0.6931472, %v4654_v9  ;;  %v1110_v19 = vand.u32 2147483648, %v8831_v35  ;;  %vm1128_vm12 = vcmp.eq.f32.partialorder %v8839_v42, inf  ;;  %v2423_v25 = vsel %vm8867_vm9, %v2420_v49, %v2417_v20 }
 0x379   :  { %3840 = vst.msk [vmem:[%s9157_s1 + $0x2b8] sm:$0xff] %vm200_vm0, %v3744_v5  ;;  %v1106_v52 = vmul.f32 %v4656_v33, %v8831_v35  ;;  %v2448_v34 = vand.u32 2147483647, %v8846_v17  ;;  %vm1130_vm13 = vcmp.eq.f32.partialorder %v8839_v42, 0.0  ;;  %4667 = vrsqrt.f32 %v8884_v2  ;;  %v8953_v62 = vpop.xlane.xlu0 %484 }
 0x37a   :  { %v4658_v14 = vpop.eup %4657  ;;  %v3383_v44 = vsel %vm8873_vm10, %v3380_v3, %v3377_v39  ;;  %v2446_v41 = vadd.f32 1.0, %v2445_v32  ;;  %v3406_v36 = vadd.f32 1.0, %v3405_v59  ;;  %v1131_v12 = vand.u32 2147483648, %v8839_v42 }
 0x37b   :  { %v3551_v40 = vsub.f32 %v2423_v25, %v3383_v44  ;;  %v1108_v45 = vsel %vm1107_vm8, %v8831_v35, %v1106_v52  ;;  %v1127_v18 = vmul.f32 %v4658_v14, %v8839_v42  ;;  %4669 = vrsqrt.f32 %v8898_v11 }
 0x37c   :  { %v1111_v53 = vsel %vm1109_vm11, %v1110_v19, %v1108_v45  ;;  %v3408_v46 = vand.u32 2147483647, %v8856_v6  ;;  %v2447_v27 = vmul.f32 %v8846_v17, %v2446_v41  ;;  %vm8921_vm14 = vcmp.lt.f32.partialorder %v2448_v34, 0.0004427343 }
 0x37d   :  { %v3647_v10 = vmul.f32 0.5, %v3551_v40  ;;  %v1249_v60 = vmax.f32 %v1111_v53, 1e-15  ;;  %v1129_v55 = vsel %vm1128_vm12, %v8839_v42, %v1127_v18  ;;  %v3407_v38 = vmul.f32 %v3406_v36, %v8856_v6 }
 0x37e   :  { %v4660_v61 = vpop.eup %4659  ;;  %v8915_v24 = vsel %vm1130_vm13, %v1131_v12, %v1129_v55  ;;  %vm3409_vm15 = vcmp.lt.f32.partialorder %v3408_v46, 0.0004427343  ;;  %vm1121_vm1 = vcmp.eq.f32.partialorder %v8858_v56, inf  ;;  %vm1123_vm2 = vcmp.eq.f32.partialorder %v8858_v56, 0.0 }
 0x37f   :  { %v4662_v54 = vpop.eup %4661  ;;  %v3743_v35 = vmul.f32 %v3647_v10, %v1430_v7  ;;  %v2444_v22 = vmul.f32 0.6931472, %v4660_v61  ;;  %v8917_v21 = vclamps-f32 %v1249_v60, 0.9999999  ;;  %v1252_v37 = vmax.f32 %v8915_v24, 1e-15 }
 0x380   :  { %v4664_v29 = vpop.eup %4663  ;;  %v1120_v15 = vmul.f32 %v4662_v54, %v8858_v56  ;;  %v1124_v1 = vand.u32 2147483648, %v8858_v56  ;;  %vm1142_vm3 = vcmp.eq.f32.partialorder %v8884_v2, inf  ;;  %vm1144_vm4 = vcmp.eq.f32.partialorder %v8884_v2, 0.0 }
 0x381   :  { %3839 = vst.msk [vmem:[%s9157_s1 + $0x2b0] sm:$0xff] %vm200_vm0, %v3743_v35  ;;  %v3404_v42 = vmul.f32 0.6931472, %v4664_v29  ;;  %v2433_v51 = vadd.f32 1.0, %v8917_v21  ;;  %v4666_v43 = vpop.eup %4665  ;;  %v8935_v17 = vsub.f32 0.0, %v8917_v21  ;;  %v2450_v47 = vsel %vm8921_vm14, %v2447_v27, %v2444_v22 }
 0x382   :  { %v8937_v58 = vclamps-f32 %v1252_v37, 0.9999999  ;;  %v1122_v23 = vsel %vm1121_vm1, %v8858_v56, %v1120_v15  ;;  %v1436_v48 = vmul.f32 %v4803_v50, %v4666_v43  ;;  %v1145_v20 = vand.u32 2147483648, %v8884_v2 }
 0x383   :  { %v3410_v63 = vsel %vm3409_vm15, %v3407_v38, %v3404_v42  ;;  %4671 = vlog2.f32 %v2433_v51  ;;  %v3393_v6 = vadd.f32 1.0, %v8935_v17  ;;  %v4668_v13 = vpop.eup %4667  ;;  %vm1135_vm5 = vcmp.eq.f32.partialorder %v8898_v11, inf }
 0x384   :  { %v3554_v57 = vsub.f32 %v2450_v47, %v3410_v63  ;;  %4673 = vrsqrt.f32 %v8932_v28  ;;  %v2460_v4 = vadd.f32 1.0, %v8937_v58  ;;  %v8956_v5 = vsub.f32 0.0, %v8937_v58 }
 0x385   :  { %4675 = vrcp.f32 %v1249_v60  ;;  %v4670_v26 = vpop.eup %4669  ;;  %v2436_v9 = vmul.f32 -0.5, %v8917_v21  ;;  %v1125_v49 = vsel %vm1123_vm2, %v1124_v1, %v1122_v23  ;;  %v1141_v3 = vmul.f32 %v4668_v13, %v8884_v2 }
 0x386   :  { %v3650_v31 = vmul.f32 0.5, %v3554_v57  ;;  %4677 = vlog2.f32 %v3393_v6  ;;  %v3396_v30 = vmul.f32 -0.5, %v8935_v17  ;;  %v3420_v33 = vadd.f32 1.0, %v8956_v5 }
 0x387   :  { %4679 = vlog2.f32 %v2460_v4  ;;  %vm1137_vm6 = vcmp.eq.f32.partialorder %v8898_v11, 0.0  ;;  %v2463_v39 = vmul.f32 -0.5, %v8937_v58  ;;  %v1251_v32 = vmax.f32 %v1125_v49, 1e-15 }
 0x388   :  { %v3746_v16 = vmul.f32 %v3650_v31, %v1436_v48  ;;  %4681 = vrsqrt.f32 %v8953_v62  ;;  %v1143_v56 = vsel %vm1142_vm3, %v8884_v2, %v1141_v3  ;;  %v1134_v59 = vmul.f32 %v4670_v26, %v8898_v11 }
 0x389   :  { %v2439_v0 = vand.u32 2147483647, %v8917_v21  ;;  %4683 = vlog2.f32 %v3420_v33  ;;  %v8980_v7 = vsel %vm1144_vm4, %v1145_v20, %v1143_v56  ;;  %v1138_v52 = vand.u32 2147483648, %v8898_v11  ;;  %v4805_v56 = vld [vmem:[%s9156_s0 + $0x2d8] sm:$0xff] }
 0x38a   :  { %3842 = vst.msk [vmem:[%s9157_s1 + $0x2c8] sm:$0xff] %vm200_vm0, %v3746_v16  ;;  %v2437_v19 = vadd.f32 1.0, %v2436_v9  ;;  %v8983_v14 = vclamps-f32 %v1251_v32, 0.9999999  ;;  %v1254_v25 = vmax.f32 %v8980_v7, 1e-15  ;;  %v1136_v44 = vsel %vm1135_vm5, %v8898_v11, %v1134_v59 }
 0x38b   :  { %v3397_v40 = vadd.f32 1.0, %v3396_v30  ;;  %4685 = vrcp.f32 %v1252_v37  ;;  %v3423_v45 = vmul.f32 -0.5, %v8956_v5  ;;  %v1159_v2 = vand.u32 2147483648, %v8932_v28 }
 0x38c   :  { %v3399_v41 = vand.u32 2147483647, %v8935_v17  ;;  %v2464_v36 = vadd.f32 1.0, %v2463_v39  ;;  %v2451_v53 = vadd.f32 1.0, %v8983_v14  ;;  %v1152_v12 = vand.u32 2147483648, %v8953_v62 }
 0x38d   :  { %v4672_v34 = vpop.eup %4671  ;;  %v8995_v60 = vsub.f32 0.0, %v8983_v14  ;;  %v8999_v55 = vclamps-f32 %v1254_v25, 0.9999999  ;;  %v9003_v46 = vsel %vm1137_vm6, %v1138_v52, %v1136_v44  ;;  %v2438_v54 = vmul.f32 %v8917_v21, %v2437_v19 }
 0x38e   :  { %v4674_v18 = vpop.eup %4673  ;;  %v2435_v10 = vmul.f32 0.6931472, %v4672_v34  ;;  %vm9006_vm7 = vcmp.lt.f32.partialorder %v2439_v0, 0.0004427343  ;;  %v2466_v22 = vand.u32 2147483647, %v8937_v58  ;;  %4687 = vlog2.f32 %v2451_v53 }
 0x38f   :  { %v4676_v61 = vpop.eup %4675  ;;  %v3398_v27 = vmul.f32 %v3397_v40, %v8935_v17  ;;  %v3424_v8 = vadd.f32 1.0, %v3423_v45  ;;  %v3411_v42 = vadd.f32 1.0, %v8995_v60  ;;  %vm3400_vm8 = vcmp.lt.f32.partialorder %v3399_v41, 0.0004427343  ;;  %v4804_v17 = vld [vmem:[%s9156_s0 + $0x2c0] sm:$0xff] }
 0x390   :  { %v4678_v24 = vpop.eup %4677  ;;  %v2465_v11 = vmul.f32 %v8937_v58, %v2464_v36  ;;  %v2478_v38 = vadd.f32 1.0, %v8999_v55  ;;  %v1253_v21 = vmax.f32 %v9003_v46, 1e-15  ;;  %v2441_v15 = vsel %vm9006_vm7, %v2438_v54, %v2435_v10 }
 0x391   :  { %v4680_v37 = vpop.eup %4679  ;;  %v3395_v29 = vmul.f32 0.6931472, %v4678_v24  ;;  %v3426_v47 = vand.u32 2147483647, %v8956_v5  ;;  %4689 = vlog2.f32 %v3411_v42  ;;  %vm1156_vm9 = vcmp.eq.f32.partialorder %v8932_v28, inf }
 0x392   :  { %v4682_v51 = vpop.eup %4681  ;;  %v1434_v63 = vmul.f32 %v4804_v17, %v4676_v61  ;;  %v2462_v57 = vmul.f32 0.6931472, %v4680_v37  ;;  %4691 = vrcp.f32 %v1251_v32  ;;  %vm1158_vm10 = vcmp.eq.f32.partialorder %v8932_v28, 0.0 }
 0x393   :  { %v3401_v43 = vsel %vm3400_vm8, %v3398_v27, %v3395_v29  ;;  %v4684_v6 = vpop.eup %4683  ;;  %v3425_v1 = vmul.f32 %v3424_v8, %v8956_v5  ;;  %v2454_v13 = vmul.f32 -0.5, %v8983_v14  ;;  %4693 = vlog2.f32 %v2478_v38 }
 0x394   :  { %v3553_v58 = vsub.f32 %v2441_v15, %v3401_v43  ;;  %v9027_v4 = vsub.f32 0.0, %v8999_v55  ;;  %v3422_v50 = vmul.f32 0.6931472, %v4684_v6  ;;  %v3414_v48 = vmul.f32 -0.5, %v8995_v60 }
 0x395   :  { %v9032_v31 = vclamps-f32 %v1253_v21, 0.9999999  ;;  %vm1149_vm11 = vcmp.eq.f32.partialorder %v8953_v62, inf  ;;  %v4686_v26 = vpop.eup %4685  ;;  %vm2467_vm12 = vcmp.lt.f32.partialorder %v2466_v22, 0.0004427343  ;;  %v1155_v20 = vmul.f32 %v4674_v18, %v8932_v28 }
 0x396   :  { %v3649_v23 = vmul.f32 0.5, %v3553_v58  ;;  %vm3427_vm13 = vcmp.lt.f32.partialorder %v3426_v47, 0.0004427343  ;;  %v3438_v5 = vadd.f32 1.0, %v9027_v4  ;;  %v2468_v9 = vsel %vm2467_vm12, %v2465_v11, %v2462_v57 }
 0x397   :  { %v3428_v49 = vsel %vm3427_vm13, %v3425_v1, %v3422_v50  ;;  %v2469_v3 = vadd.f32 1.0, %v9032_v31  ;;  %v2457_v33 = vand.u32 2147483647, %v8983_v14  ;;  %v2481_v39 = vmul.f32 -0.5, %v8999_v55 }
 0x398   :  { %v3745_v16 = vmul.f32 %v3649_v23, %v1434_v63  ;;  %v3556_v30 = vsub.f32 %v2468_v9, %v3428_v49  ;;  %4695 = vlog2.f32 %v3438_v5  ;;  %vm1151_vm14 = vcmp.eq.f32.partialorder %v8953_v62, 0.0  ;;  %v4688_v32 = vpop.eup %4687 }
 0x399   :  { %v1440_v59 = vmul.f32 %v4805_v56, %v4686_v26  ;;  %v2455_v0 = vadd.f32 1.0, %v2454_v13  ;;  %v3415_v52 = vadd.f32 1.0, %v3414_v48  ;;  %4697 = vrcp.f32 %v1254_v25 }
 0x39a   :  { %3841 = vst.msk [vmem:[%s9157_s1 + $0x2c0] sm:$0xff] %vm200_vm0, %v3745_v16  ;;  %v3652_v19 = vmul.f32 0.5, %v3556_v30  ;;  %v3417_v44 = vand.u32 2147483647, %v8995_v60  ;;  %v3441_v34 = vmul.f32 -0.5, %v9027_v4  ;;  %4699 = vlog2.f32 %v2469_v3  ;;  %v4807_v3 = vld [vmem:[%s9156_s0 + $0x2e8] sm:$0xff] }
 0x39b   :  { %v2453_v40 = vmul.f32 0.6931472, %v4688_v32  ;;  %v9053_v45 = vsub.f32 0.0, %v9032_v31  ;;  %v1157_v18 = vsel %vm1156_vm9, %v8932_v28, %v1155_v20  ;;  %v1148_v41 = vmul.f32 %v4682_v51, %v8953_v62  ;;  %v4690_v36 = vpop.eup %4689 }
 0x39c   :  { %v3748_v53 = vmul.f32 %v3652_v19, %v1440_v59  ;;  %vm9059_vm15 = vcmp.lt.f32.partialorder %v2457_v33, 0.0004427343  ;;  %v2482_v25 = vadd.f32 1.0, %v2481_v39  ;;  %v1160_v61 = vsel %vm1158_vm10, %v1159_v2, %v1157_v18  ;;  %v4692_v10 = vpop.eup %4691 }
 0x39d   :  { %v2456_v24 = vmul.f32 %v8983_v14, %v2455_v0  ;;  %v3413_v54 = vmul.f32 0.6931472, %v4690_v36  ;;  %v3416_v35 = vmul.f32 %v3415_v52, %v8995_v60  ;;  %v3429_v22 = vadd.f32 1.0, %v9053_v45  ;;  %v4694_v37 = vpop.eup %4693 }
 0x39e   :  { %3844 = vst.msk [vmem:[%s9157_s1 + $0x2d8] sm:$0xff] %vm200_vm0, %v3748_v53  ;;  %vm3418_vm1 = vcmp.lt.f32.partialorder %v3417_v44, 0.0004427343  ;;  %v2484_v29 = vand.u32 2147483647, %v8999_v55  ;;  %v1150_v28 = vsel %vm1149_vm11, %v8953_v62, %v1148_v41  ;;  %v3442_v60 = vadd.f32 1.0, %v3441_v34 }
 0x39f   :  { %v1256_v27 = vmax.f32 %v1160_v61, 1e-15  ;;  %v2459_v14 = vsel %vm9059_vm15, %v2456_v24, %v2453_v40  ;;  %v3419_v2 = vsel %vm3418_vm1, %v3416_v35, %v3413_v54  ;;  %4701 = vlog2.f32 %v3429_v22 }
 0x3a0   :  { %v3555_v8 = vsub.f32 %v2459_v14, %v3419_v2  ;;  %v2483_v42 = vmul.f32 %v8999_v55, %v2482_v25  ;;  %v3444_v11 = vand.u32 2147483647, %v9027_v4  ;;  %4703 = vrcp.f32 %v1253_v21  ;;  %v4806_v55 = vld [vmem:[%s9156_s0 + $0x2d0] sm:$0xff]  ;;  %v4808_v25 = vld [vmem:[%s9156_s0 + $0x2e0] sm:$0xff] }
 0x3a1   :  { %v2480_v38 = vmul.f32 0.6931472, %v4694_v37  ;;  %v2472_v51 = vmul.f32 -0.5, %v9032_v31  ;;  %v9085_v15 = vclamps-f32 %v1256_v27, 0.9999999  ;;  %v1153_v43 = vsel %vm1151_vm14, %v1152_v12, %v1150_v28 }
 0x3a2   :  { %v4696_v47 = vpop.eup %4695  ;;  %v1438_v17 = vmul.f32 %v4806_v55, %v4692_v10  ;;  %v3651_v63 = vmul.f32 0.5, %v3555_v8  ;;  %vm9094_vm2 = vcmp.lt.f32.partialorder %v2484_v29, 0.0004427343  ;;  %v3432_v21 = vmul.f32 -0.5, %v9053_v45 }
 0x3a3   :  { %v4698_v58 = vpop.eup %4697  ;;  %v3440_v57 = vmul.f32 0.6931472, %v4696_v47  ;;  %v3443_v6 = vmul.f32 %v3442_v60, %v9027_v4  ;;  %v2496_v62 = vadd.f32 1.0, %v9085_v15  ;;  %v1255_v12 = vmax.f32 %v1153_v43, 1e-15 }
 0x3a4   :  { %v4700_v1 = vpop.eup %4699  ;;  %v3747_v13 = vmul.f32 %v3651_v63, %v1438_v17  ;;  %vm3445_vm3 = vcmp.lt.f32.partialorder %v3444_v11, 0.0004427343  ;;  %v2475_v23 = vand.u32 2147483647, %v9032_v31  ;;  %v2600_v50 = vsub.f32 0.0, %v9085_v15 }
 0x3a5   :  { %v2486_v48 = vsel %vm9094_vm2, %v2483_v42, %v2480_v38  ;;  %v3446_v26 = vsel %vm3445_vm3, %v3443_v6, %v3440_v57  ;;  %v2473_v5 = vadd.f32 1.0, %v2472_v51  ;;  %4705 = vlog2.f32 %v2496_v62 }
 0x3a6   :  { %3843 = vst.msk [vmem:[%s9157_s1 + $0x2d0] sm:$0xff] %vm200_vm0, %v3747_v13  ;;  %v3558_v4 = vsub.f32 %v2486_v48, %v3446_v26  ;;  %v3433_v20 = vadd.f32 1.0, %v3432_v21  ;;  %v3456_v16 = vadd.f32 1.0, %v2600_v50  ;;  %v3435_v9 = vand.u32 2147483647, %v9053_v45  ;;  %v4810_v26 = vld [vmem:[%s9156_s0 + $0x2f0] sm:$0xff] }
 0x3a7   :  { %v9110_v49 = vclamps-f32 %v1255_v12, 0.9999999  ;;  %v1444_v30 = vmul.f32 %v4807_v3, %v4698_v58  ;;  %v2471_v39 = vmul.f32 0.6931472, %v4700_v1  ;;  %v2474_v56 = vmul.f32 %v9032_v31, %v2473_v5  ;;  %v4809_v58 = vld [vmem:[%s9156_s0 + $0x2f8] sm:$0xff] }
 0x3a8   :  { %v3654_v33 = vmul.f32 0.5, %v3558_v4  ;;  %4707 = vlog2.f32 %v3456_v16  ;;  %vm9116_vm4 = vcmp.lt.f32.partialorder %v2475_v23, 0.0004427343  ;;  %v3434_v34 = vmul.f32 %v3433_v20, %v9053_v45 }
 0x3a9   :  { %v4702_v32 = vpop.eup %4701  ;;  %4709 = vrcp.f32 %v1256_v27  ;;  %v2487_v0 = vadd.f32 1.0, %v9110_v49  ;;  %v2599_v40 = vsub.f32 0.0, %v9110_v49  ;;  %vm3436_vm5 = vcmp.lt.f32.partialorder %v3435_v9, 0.0004427343 }
 0x3aa   :  { %v4704_v52 = vpop.eup %4703  ;;  %v3750_v19 = vmul.f32 %v3654_v33, %v1444_v30  ;;  %v3431_v44 = vmul.f32 0.6931472, %v4702_v32  ;;  %v2499_v18 = vmul.f32 -0.5, %v9085_v15  ;;  %v3459_v41 = vmul.f32 -0.5, %v2600_v50 }
 0x3ab   :  { %4711 = vlog2.f32 %v2487_v0  ;;  %v2477_v31 = vsel %vm9116_vm4, %v2474_v56, %v2471_v39  ;;  %v3447_v53 = vadd.f32 1.0, %v2599_v40  ;;  %v1442_v61 = vmul.f32 %v4808_v25, %v4704_v52 }
 0x3ac   :  { %3846 = vst.msk [vmem:[%s9157_s1 + $0x2e8] sm:$0xff] %vm200_vm0, %v3750_v19  ;;  %v3437_v36 = vsel %vm3436_vm5, %v3434_v34, %v3431_v44  ;;  %v2500_v24 = vadd.f32 1.0, %v2499_v18  ;;  %v3460_v54 = vadd.f32 1.0, %v3459_v41  ;;  %v2502_v35 = vand.u32 2147483647, %v9085_v15 }
 0x3ad   :  { %v3557_v7 = vsub.f32 %v2477_v31, %v3437_v36  ;;  %4713 = vlog2.f32 %v3447_v53  ;;  %v3462_v22 = vand.u32 2147483647, %v2600_v50  ;;  %v2490_v27 = vmul.f32 -0.5, %v9110_v49 }
 0x3ae   :  { %4715 = vrcp.f32 %v1255_v12  ;;  %v3450_v28 = vmul.f32 -0.5, %v2599_v40  ;;  %v2501_v60 = vmul.f32 %v9085_v15, %v2500_v24  ;;  %v3461_v42 = vmul.f32 %v3460_v54, %v2600_v50 }
 0x3af   :  { %v4706_v45 = vpop.eup %4705  ;;  %v3653_v10 = vmul.f32 0.5, %v3557_v7  ;;  %vm2503_vm6 = vcmp.lt.f32.partialorder %v2502_v35, 0.0004427343  ;;  %vm3463_vm7 = vcmp.lt.f32.partialorder %v3462_v22, 0.0004427343  ;;  %v2491_v43 = vadd.f32 1.0, %v2490_v27 }
 0x3b0   :  { %v2498_v29 = vmul.f32 0.6931472, %v4706_v45  ;;  %v3451_v47 = vadd.f32 1.0, %v3450_v28  ;;  %v2493_v17 = vand.u32 2147483647, %v9110_v49 }
 0x3b1   :  { %v3749_v37 = vmul.f32 %v3653_v10, %v1442_v61  ;;  %v3453_v63 = vand.u32 2147483647, %v2599_v40  ;;  %v2492_v6 = vmul.f32 %v9110_v49, %v2491_v43 }
 0x3b2   :  { %v4708_v14 = vpop.eup %4707  ;;  %v2504_v38 = vsel %vm2503_vm6, %v2501_v60, %v2498_v29  ;;  %v3452_v12 = vmul.f32 %v3451_v47, %v2599_v40  ;;  %vm2494_vm8 = vcmp.lt.f32.partialorder %v2493_v17, 0.0004427343 }
 0x3b3   :  { %v4710_v2 = vpop.eup %4709  ;;  %3845 = vst.msk [vmem:[%s9157_s1 + $0x2e0] sm:$0xff] %vm200_vm0, %v3749_v37  ;;  %v3458_v8 = vmul.f32 0.6931472, %v4708_v14  ;;  %vm3454_vm9 = vcmp.lt.f32.partialorder %v3453_v63, 0.0004427343 }
 0x3b4   :  { %v1448_v15 = vmul.f32 %v4809_v58, %v4710_v2 }
 0x3b5   :  { %v4712_v11 = vpop.eup %4711  ;;  %v3464_v51 = vsel %vm3463_vm7, %v3461_v42, %v3458_v8 }
 0x3b6   :  { %v3560_v55 = vsub.f32 %v2504_v38, %v3464_v51  ;;  %v2489_v46 = vmul.f32 0.6931472, %v4712_v11 }
 0x3b7   :  { %v4714_v21 = vpop.eup %4713 }
 0x3b8   :  { %v3656_v57 = vmul.f32 0.5, %v3560_v55  ;;  %v3449_v62 = vmul.f32 0.6931472, %v4714_v21  ;;  %v4716_v1 = vpop.eup %4715  ;;  %v2495_v23 = vsel %vm2494_vm8, %v2492_v6, %v2489_v46 }
 0x3b9   :  { %v1446_v5 = vmul.f32 %v4810_v26, %v4716_v1 }
 0x3ba   :  { %v3752_v13 = vmul.f32 %v3656_v57, %v1448_v15  ;;  %v3455_v50 = vsel %vm3454_vm9, %v3452_v12, %v3449_v62 }
 0x3bb   :  { %v3559_v48 = vsub.f32 %v2495_v23, %v3455_v50 }
 0x3bc   :  { %3848 = vst.msk [vmem:[%s9157_s1 + $0x2f8] sm:$0xff] %vm200_vm0, %v3752_v13 }
 0x3bd   :  { %v3655_v4 = vmul.f32 0.5, %v3559_v48 }
 0x3bf   :  { %v3751_v20 = vmul.f32 %v3655_v4, %v1446_v5 }
 0x3c1   :  { %3847 = vst.msk [vmem:[%s9157_s1 + $0x2f0] sm:$0xff] %vm200_vm0, %v3751_v20 }

</bundles_post_ra>
